<compile_context>
chip_gen: v6e
topology: v6e:2x2x1
jax: 0.10.0
libtpu: 0.0.40
codegen_flags: <defaults>
</compile_context>

<pallas_src>
import functools
import math

import jax
import jax.numpy as jnp
from jax.experimental import pallas as pl
from jax.experimental.pallas import tpu as pltpu

# ------------------------- small config consistent with the module -------------------
IN_CH = 3
PT, PH, PW = 2, 2, 2            # patch_size
LAT = 4                         # latent_size  -> spatial token grid LAT x LAT
CFRAMES = 2                     # compressed_frames
FRAMES = CFRAMES + 1
S_TOK = LAT * LAT
C_HID = 32                      # c_hidden
C_COD = 16                      # c_codebook
K_CODE = 64                     # codebook_size
HEADS = 4
N_LAYERS = 1                    # num_layers_enc = num_layers_dec
LN_EPS = 1e-5
BN_EPS = 1e-5


# ------------------------------- in-kernel helpers ------------------------------------
def _ln(x, g, b, eps=LN_EPS):
    mu = jnp.mean(x, axis=-1, keepdims=True)
    var = jnp.mean((x - mu) ** 2, axis=-1, keepdims=True)
    return (x - mu) * jax.lax.rsqrt(var + eps) * g + b


_ERF_A1, _ERF_A2, _ERF_A3, _ERF_A4, _ERF_A5 = (
    0.254829592, -0.284496736, 1.421413741, -1.453152027, 1.061405429)
_ERF_P = 0.3275911


def _erf_approx(z):
    az = jnp.abs(z)
    t = 1.0 / (1.0 + _ERF_P * az)
    poly = t * (_ERF_A1 + t * (_ERF_A2 + t * (_ERF_A3 + t * (_ERF_A4 + t * _ERF_A5))))
    e = 1.0 - poly * jnp.exp(-az * az)
    return jnp.where(z >= 0.0, e, -e)


def _gelu_exact(x):
    # TODO(synk): lax.erf lowering in Mosaic is version-dependent, so the exact-erf GELU
    # is evaluated in-kernel with the A&S 7.1.26 rational approximation (|err| < 1.5e-7).
    return 0.5 * x * (1.0 + _erf_approx(x * (1.0 / math.sqrt(2.0))))


def _full_spec(shape):
    nd = len(shape)
    return pl.BlockSpec(shape, lambda *_: (0,) * nd)


# ------------------------------------ Pallas kernels ----------------------------------
def _linear_kernel(x_ref, w_ref, b_ref, o_ref):
    o_ref[...] = jnp.dot(x_ref[...], w_ref[...],
                         preferred_element_type=jnp.float32) + b_ref[...]


def pallas_linear(x2d, w, b):
    M, K = x2d.shape
    K2, N = w.shape
    assert K == K2
    return pl.pallas_call(
        _linear_kernel,
        grid=(1,),
        in_specs=[_full_spec((M, K)), _full_spec((K, N)), _full_spec((1, N))],
        out_specs=_full_spec((M, N)),
        out_shape=jax.ShapeDtypeStruct((M, N), jnp.float32),
    )(x2d, w, b.reshape(1, N))


def _fused_layer_kernel(x_ref, bias_ref,
                        g1_ref, b1_ref, wq_ref, wk_ref, wv_ref, bq_ref, bk_ref, bv_ref,
                        wo_ref, bo_ref, g2_ref, b2_ref, w1_ref, bf1_ref, w2_ref, bf2_ref,
                        gf_ref, bf_ref, o_ref, *, heads, final_ln):
    """One pre-norm transformer encoder layer, fully fused.

    x_ref is a (Mb, C) slab holding several whole sequences back to back; bias_ref is a
    (Mb, Mb) additive attention mask (0 inside a sequence / causal window, -1e30 outside)
    so attention over all sequences is computed as one block-diagonal softmax-matmul.
    """
    x = x_ref[...]                                   # (Mb, C)
    C = x.shape[1]
    dh = C // heads
    scale = 1.0 / math.sqrt(dh)

    # ---- self-attention block ----
    h = _ln(x, g1_ref[...], b1_ref[...])
    q = jnp.dot(h, wq_ref[...], preferred_element_type=jnp.float32) + bq_ref[...]
    k = jnp.dot(h, wk_ref[...], preferred_element_type=jnp.float32) + bk_ref[...]
    v = jnp.dot(h, wv_ref[...], preferred_element_type=jnp.float32) + bv_ref[...]

    bias = bias_ref[...]                             # (Mb, Mb)
    dcol = jax.lax.broadcasted_iota(jnp.int32, (1, C), 1)
    attn = jnp.zeros_like(x)
    for hh in range(heads):
        # channel mask selects this head's Dh columns; (q*hm)·k == q_h·k_h, and
        # p @ (v*hm) lands the head output in its own columns, so summing over heads
        # reconstructs the concatenated multi-head output without any slicing/reshape.
        hm = jnp.where((dcol >= hh * dh) & (dcol < (hh + 1) * dh), 1.0, 0.0)
        s = jax.lax.dot_general(q * hm, k, (((1,), (1,)), ((), ())),
                                preferred_element_type=jnp.float32) * scale + bias
        m = jnp.max(s, axis=-1, keepdims=True)
        p = jnp.exp(s - m)
        p = p / jnp.sum(p, axis=-1, keepdims=True)
        attn = attn + jnp.dot(p, v * hm, preferred_element_type=jnp.float32)

    x = x + jnp.dot(attn, wo_ref[...], preferred_element_type=jnp.float32) + bo_ref[...]

    # ---- feed-forward block ----
    h2 = _ln(x, g2_ref[...], b2_ref[...])
    f = jnp.dot(h2, w1_ref[...], preferred_element_type=jnp.float32) + bf1_ref[...]
    f = _gelu_exact(f)
    x = x + jnp.dot(f, w2_ref[...], preferred_element_type=jnp.float32) + bf2_ref[...]

    if final_ln:                                     # TransformerEncoder final LayerNorm
        x = _ln(x, gf_ref[...], bf_ref[...])
    o_ref[...] = x


def fused_transformer_layer(x2d, n_seq, seq_len, p, final_ln, causal):
    """x2d: (n_seq*seq_len, C), rows grouped by sequence."""
    M, C = x2d.shape
    G = 2 if n_seq % 2 == 0 else 1                   # split sequences over 2 TCs (v7x)
    Mb = M // G
    nb = n_seq // G

    # Block-diagonal (+ causal) additive mask; identical for every grid block because
    # each block holds whole sequences with the same local structure.
    ids = jnp.repeat(jnp.arange(nb, dtype=jnp.int32), seq_len)
    pos = jnp.tile(jnp.arange(seq_len, dtype=jnp.int32), nb)
    allowed = ids[:, None] == ids[None, :]
    if causal:
        allowed = allowed & (pos[None, :] <= pos[:, None])
    attn_bias = jnp.where(allowed, 0.0, -1e30).astype(jnp.float32)

    wq, wk, wv = jnp.split(p["w_in"], 3, axis=1)
    bq, bk, bv = jnp.split(p["b_in"], 3)
    if final_ln is None:
        gf = jnp.ones((C,), jnp.float32)
        bf = jnp.zeros((C,), jnp.float32)
        apply_final = False
    else:
        gf, bf = final_ln
        apply_final = True

    r = lambda v: v.reshape(1, -1)
    weights = [r(p["ln1_g"]), r(p["ln1_b"]), wq, wk, wv, r(bq), r(bk), r(bv),
               p["w_out"], r(p["b_out"]), r(p["ln2_g"]), r(p["ln2_b"]),
               p["w1"], r(p["b1"]), p["w2"], r(p["b2"]), r(gf), r(bf)]

    in_specs = ([pl.BlockSpec((Mb, C), lambda i: (i, 0)),
                 pl.BlockSpec((Mb, Mb), lambda i: (0, 0))]
                + [pl.BlockSpec(w.shape, lambda i: (0, 0)) for w in weights])

    return pl.pallas_call(
        functools.partial(_fused_layer_kernel, heads=HEADS, final_ln=apply_final),
        grid=(G,),
        in_specs=in_specs,
        out_specs=pl.BlockSpec((Mb, C), lambda i: (i, 0)),
        out_shape=jax.ShapeDtypeStruct((M, C), jnp.float32),
        compiler_params=pltpu.CompilerParams(dimension_semantics=("parallel",)),
    )(x2d, attn_bias, *weights)


def _bottleneck_kernel(x_ref, wm_ref, bm_ref, cb_ref, cbsq_ref, wu_ref, bu_ref,
                       y_ref, loss_ref):
    """cod_mapper (BatchNorm folded) + vector-quantize + commit loss + cod_unmapper."""
    x = x_ref[...]                                                   # (M, C_HID)
    z = jnp.dot(x, wm_ref[...], preferred_element_type=jnp.float32) + bm_ref[...]
    cb = cb_ref[...]                                                 # (K, D)
    z2 = jnp.sum(z * z, axis=-1, keepdims=True)
    zc = jax.lax.dot_general(z, cb, (((1,), (1,)), ((), ())),
                             preferred_element_type=jnp.float32)     # (M, K)
    d = z2 - 2.0 * zc + cbsq_ref[...]                                # squared L2
    kk = d.shape[1]
    dmin = jnp.min(d, axis=-1, keepdims=True)
    col = jax.lax.broadcasted_iota(jnp.int32, d.shape, 1)
    idx = jnp.min(jnp.where(d <= dmin, col, kk), axis=-1, keepdims=True)  # first argmin
    onehot = jnp.where(col == idx, 1.0, 0.0)
    qe = jnp.dot(onehot, cb, preferred_element_type=jnp.float32)     # (M, D)

    # TODO(synk): forward value of the commit loss only; EMA / stop-gradient terms of the
    # reference VectorQuantize are a training/backward concern and are not reproduced.
    diff = qe - z
    denom = float(diff.shape[0] * diff.shape[1])
    loss_ref[...] = jnp.sum(jnp.sum(diff * diff, axis=-1, keepdims=True),
                            axis=0, keepdims=True) * (1.0 / denom)

    y_ref[...] = jnp.dot(qe, wu_ref[...], preferred_element_type=jnp.float32) + bu_ref[...]


def pallas_bottleneck(x2d, wm, bm, codebook, wu, bu):
    M, Ch = x2d.shape
    K, D = codebook.shape
    cb_sq = jnp.sum(codebook * codebook, axis=-1).reshape(1, K)
    y, loss = pl.pallas_call(
        _bottleneck_kernel,
        grid=(1,),
        in_specs=[_full_spec((M, Ch)), _full_spec((Ch, D)), _full_spec((1, D)),
                  _full_spec((K, D)), _full_spec((1, K)),
                  _full_spec((D, Ch)), _full_spec((1, Ch))],
        out_specs=(_full_spec((M, Ch)), _full_spec((1, 1))),
        out_shape=(jax.ShapeDtypeStruct((M, Ch), jnp.float32),
                   jax.ShapeDtypeStruct((1, 1), jnp.float32)),
    )(x2d, wm, bm.reshape(1, D), codebook, cb_sq, wu, bu.reshape(1, Ch))
    return y, loss[0, 0]


# --------------------------- model pieces (glue in plain JAX) --------------------------
def conv2d_patch(img, w, b):
    # nn.Conv2d(IN_CH, C_HID, kernel=stride=(PH,PW)) via patchify + matmul
    B, Cin, H, W = img.shape
    Gh, Gw = H // PH, W // PW
    x = img.reshape(B, Cin, Gh, PH, Gw, PW).transpose(0, 2, 4, 1, 3, 5)
    x = x.reshape(B * Gh * Gw, Cin * PH * PW)
    y = pallas_linear(x, w, b)
    return y.reshape(B, Gh, Gw, C_HID).transpose(0, 3, 1, 2)            # (B,C_HID,Gh,Gw)


def conv3d_patch(vid, w, b):
    # nn.Conv3d(IN_CH, C_HID, kernel=stride=(PT,PH,PW)); vid is (B,Cin,T,H,W)
    B, Cin, T, H, W = vid.shape
    Gt, Gh, Gw = T // PT, H // PH, W // PW
    x = vid.reshape(B, Cin, Gt, PT, Gh, PH, Gw, PW).transpose(0, 2, 4, 6, 1, 3, 5, 7)
    x = x.reshape(B * Gt * Gh * Gw, Cin * PT * PH * PW)
    y = pallas_linear(x, w, b)
    return y.reshape(B, Gt, Gh, Gw, C_HID).transpose(0, 4, 1, 2, 3)     # (B,C_HID,Gt,Gh,Gw)


def convT2d_patch(x, w, b):
    # nn.ConvTranspose2d(C_HID, IN_CH, kernel=stride=(PH,PW)) — non-overlapping => matmul
    # TODO(synk): flattened weight column order is (IN_CH, kH, kW); importing real PyTorch
    # ConvTranspose weights requires a matching reshape/transpose.
    B, Cin, Gh, Gw = x.shape
    xf = x.transpose(0, 2, 3, 1).reshape(B * Gh * Gw, Cin)
    y = pallas_linear(xf, w, jnp.repeat(b, PH * PW))
    y = y.reshape(B, Gh, Gw, IN_CH, PH, PW).transpose(0, 3, 1, 4, 2, 5)
    return y.reshape(B, IN_CH, Gh * PH, Gw * PW)


def convT3d_patch(x, w, b):
    # nn.ConvTranspose3d(C_HID, IN_CH, kernel=stride=(PT,PH,PW))
    B, Cin, Gt, Gh, Gw = x.shape
    xf = x.transpose(0, 2, 3, 4, 1).reshape(B * Gt * Gh * Gw, Cin)
    y = pallas_linear(xf, w, jnp.repeat(b, PT * PH * PW))
    y = y.reshape(B, Gt, Gh, Gw, IN_CH, PT, PH, PW).transpose(0, 4, 1, 5, 2, 6, 3, 7)
    return y.reshape(B, IN_CH, Gt * PT, Gh * PH, Gw * PW)


def transformer_encoder(x2d, n_seq, seq_len, layers, final_ln, causal):
    n = len(layers)
    for i, lp in enumerate(layers):
        x2d = fused_transformer_layer(x2d, n_seq, seq_len, lp,
                                      final_ln if i == n - 1 else None, causal)
    return x2d


def temporal_spatial_attention(x, p, spatial_first):
    B, T, S, C = x.shape

    def spatial(z):
        zf = z.reshape(B * T * S, C)
        zf = transformer_encoder(zf, B * T, S, p["spatial_layers"], p["spatial_ln"],
                                 causal=False)
        return zf.reshape(B, T, S, C)

    def temporal(z):
        zf = z.transpose(0, 2, 1, 3).reshape(B * S * T, C)
        zf = transformer_encoder(zf, B * S, T, p["temporal_layers"], p["temporal_ln"],
                                 causal=True)
        return zf.reshape(B, S, T, C).transpose(0, 2, 1, 3)

    if spatial_first:
        x = x + p["spatial_pe"]
        x = spatial(x)
        x = x + p["temporal_pe"]
        x = temporal(x)
    else:
        x = x + p["temporal_pe"]
        x = temporal(x)
        x = x + p["spatial_pe"]
        x = spatial(x)
    return x


def vivit_forward(params, image, video):
    B = image.shape[0]
    # ------------------------------- Encoder -----------------------------------------
    img_emb = conv2d_patch(image, params["img_patch_w"], params["img_patch_b"])
    vid = jnp.transpose(video, (0, 2, 1, 3, 4))                     # (B, Cin, Traw, H, W)
    vid_emb = conv3d_patch(vid, params["vid_patch_w"], params["vid_patch_b"])
    tok = jnp.concatenate([img_emb[:, :, None], vid_emb], axis=2)   # (B, C_HID, T, LAT, LAT)
    T = tok.shape[2]
    x = tok.reshape(B, C_HID, T, S_TOK).transpose(0, 2, 3, 1)       # (B, T, S, C_HID)
    x = temporal_spatial_attention(x, params["enc_attn"], spatial_first=True)

    # cod_mapper + BatchNorm2d (eval, folded into the linear) + VQ + cod_unmapper, fused.
    # TODO(synk): training-mode VQ reservoir / step-counter updates are stochastic and skipped.
    s = params["bn_gamma"] * jax.lax.rsqrt(params["bn_var"] + BN_EPS)
    wm = params["cod_map_w"] * s[None, :]
    bm = params["cod_map_b"] * s + params["bn_beta"] - params["bn_mean"] * s
    y_flat, commit_loss = pallas_bottleneck(x.reshape(-1, C_HID), wm, bm,
                                            params["codebook"],
                                            params["cod_unmap_w"], params["cod_unmap_b"])
    y = y_flat.reshape(B, T, S_TOK, C_HID)

    # ------------------------------- Decoder -----------------------------------------
    y = temporal_spatial_attention(y, params["dec_attn"], spatial_first=False)
    y = y.transpose(0, 3, 1, 2).reshape(B, C_HID, T, LAT, LAT)
    image_lat, video_lat = y[:, :, 0], y[:, :, 1:]
    video_out = convT3d_patch(video_lat, params["vid_unpatch_w"], params["vid_unpatch_b"])
    image_out = convT2d_patch(image_lat, params["img_unpatch_w"], params["img_unpatch_b"])
    out = jnp.concatenate([image_out[:, :, None], video_out], axis=2).transpose(0, 2, 1, 3, 4)
    return out, commit_loss


# --------------------------------- deterministic init ----------------------------------
def _w(key, shape, scale=0.02):
    return jax.random.normal(key, shape, jnp.float32) * scale


def init_transformer_layer(key, C):
    ks = jax.random.split(key, 4)
    return dict(
        ln1_g=jnp.ones((C,), jnp.float32), ln1_b=jnp.zeros((C,), jnp.float32),
        w_in=_w(ks[0], (C, 3 * C)), b_in=jnp.zeros((3 * C,), jnp.float32),
        w_out=_w(ks[1], (C, C)), b_out=jnp.zeros((C,), jnp.float32),
        ln2_g=jnp.ones((C,), jnp.float32), ln2_b=jnp.zeros((C,), jnp.float32),
        w1=_w(ks[2], (C, 4 * C)), b1=jnp.zeros((4 * C,), jnp.float32),
        w2=_w(ks[3], (4 * C, C)), b2=jnp.zeros((C,), jnp.float32),
    )


def init_tsattn(key, C, S, frames, num_layers):
    ks = jax.random.split(key, 2 * num_layers + 2)
    return dict(
        spatial_layers=[init_transformer_layer(ks[i], C) for i in range(num_layers)],
        temporal_layers=[init_transformer_layer(ks[num_layers + i], C) for i in range(num_layers)],
        spatial_ln=(jnp.ones((C,), jnp.float32), jnp.zeros((C,), jnp.float32)),
        temporal_ln=(jnp.ones((C,), jnp.float32), jnp.zeros((C,), jnp.float32)),
        spatial_pe=_w(ks[-2], (1, 1, S, C), scale=1.0 / math.sqrt(C)),
        temporal_pe=_w(ks[-1], (1, frames, 1, C), scale=1.0 / math.sqrt(C)),
    )


def init_params(key):
    ks = jax.random.split(key, 12)
    return dict(
        img_patch_w=_w(ks[0], (IN_CH * PH * PW, C_HID)),
        img_patch_b=jnp.zeros((C_HID,), jnp.float32),
        vid_patch_w=_w(ks[1], (IN_CH * PT * PH * PW, C_HID)),
        vid_patch_b=jnp.zeros((C_HID,), jnp.float32),
        enc_attn=init_tsattn(ks[2], C_HID, S_TOK, FRAMES, N_LAYERS),
        cod_map_w=_w(ks[3], (C_HID, C_COD)),
        cod_map_b=jnp.zeros((C_COD,), jnp.float32),
        bn_gamma=jnp.ones((C_COD,), jnp.float32), bn_beta=jnp.zeros((C_COD,), jnp.float32),
        bn_mean=jnp.zeros((C_COD,), jnp.float32), bn_var=jnp.ones((C_COD,), jnp.float32),
        codebook=_w(ks[4], (K_CODE, C_COD), scale=1.0),
        cod_unmap_w=_w(ks[5], (C_COD, C_HID)),
        cod_unmap_b=jnp.zeros((C_HID,), jnp.float32),
        dec_attn=init_tsattn(ks[6], C_HID, S_TOK, FRAMES, N_LAYERS),
        img_unpatch_w=_w(ks[7], (C_HID, IN_CH * PH * PW)),
        img_unpatch_b=jnp.zeros((IN_CH,), jnp.float32),
        vid_unpatch_w=_w(ks[8], (C_HID, IN_CH * PT * PH * PW)),
        vid_unpatch_b=jnp.zeros((IN_CH,), jnp.float32),
    )


if __name__ == "__main__":
    key = jax.random.PRNGKey(0)
    k_par, k_img, k_vid = jax.random.split(key, 3)
    params = init_params(k_par)

    # image: (B, C, H, W) NCHW ; video: (B, T, C, H, W)
    image = jax.random.normal(k_img, (2, IN_CH, LAT * PH, LAT * PW), jnp.float32)       # (2,3,8,8)
    video = jax.random.normal(k_vid, (2, CFRAMES * PT, IN_CH, LAT * PH, LAT * PW),
                              jnp.float32)                                              # (2,4,3,8,8)

    decoded, commit_loss = jax.jit(vivit_forward)(params, image, video)
    jax.block_until_ready((decoded, commit_loss))
    assert decoded.shape == (2, 1 + CFRAMES * PT, IN_CH, LAT * PH, LAT * PW)
    assert commit_loss.shape == ()
    print("KERNEL_OK")
</pallas_src>

<mosaic_0001>
module attributes {stable_mosaic.version = 11 : i64} {
  func.func @_linear_kernel(%arg0: i32, %arg1: memref<64x24xf32, #tpu.memory_space<vmem>>, %arg2: memref<24x32xf32, #tpu.memory_space<vmem>>, %arg3: memref<1x32xf32, #tpu.memory_space<vmem>>, %arg4: memref<64x32xf32, #tpu.memory_space<vmem>>) attributes {dimension_semantics = [#tpu.dimension_semantics<arbitrary>], iteration_bounds = array<i64: 1>, scalar_prefetch = 0 : i64, scratch_operands = 0 : i64, tpu.core_type = #tpu.core_type<tc>, window_params = [{pipeline_mode = #tpu.pipeline_mode<synchronous>, transform_indices = @transform_0, window_bounds = array<i64: 64, 24>}, {pipeline_mode = #tpu.pipeline_mode<synchronous>, transform_indices = @transform_1, window_bounds = array<i64: 24, 32>}, {pipeline_mode = #tpu.pipeline_mode<synchronous>, transform_indices = @transform_2, window_bounds = array<i64: 1, 32>}, {pipeline_mode = #tpu.pipeline_mode<synchronous>, transform_indices = @transform_3, window_bounds = array<i64: 64, 32>}]} {
    %c0 = arith.constant 0 : index
    %c0_0 = arith.constant 0 : index
    %0 = vector.load %arg1[%c0, %c0_0] : memref<64x24xf32, #tpu.memory_space<vmem>>, vector<64x24xf32>
    %c0_1 = arith.constant 0 : index
    %c0_2 = arith.constant 0 : index
    %1 = vector.load %arg2[%c0_1, %c0_2] : memref<24x32xf32, #tpu.memory_space<vmem>>, vector<24x32xf32>
    %cst = arith.constant dense<0.000000e+00> : vector<64x32xf32>
    %2 = tpu.matmul %0, %1, %cst {dimension_numbers = #tpu.dot_dimension_numbers<[1], [0], [0], [1], [0, 0, 1, 1], [], []>} : vector<64x24xf32>, vector<24x32xf32>, vector<64x32xf32> -> vector<64x32xf32>
    %c0_3 = arith.constant 0 : index
    %c0_4 = arith.constant 0 : index
    %3 = vector.load %arg3[%c0_3, %c0_4] : memref<1x32xf32, #tpu.memory_space<vmem>>, vector<1x32xf32>
    %4 = vector.broadcast %3 : vector<1x32xf32> to vector<64x32xf32>
    %5 = arith.addf %2, %4 : vector<64x32xf32>
    %c0_5 = arith.constant 0 : index
    %c0_6 = arith.constant 0 : index
    %6 = vector.load %arg4[%c0_5, %c0_6] : memref<64x32xf32, #tpu.memory_space<vmem>>, vector<64x32xf32>
    tpu.vector_store %arg4[%c0_5, %c0_6], %5 {strides = array<i32>} : memref<64x32xf32, #tpu.memory_space<vmem>>, vector<64x32xf32>,
    return
  }
  func.func @transform_0(%arg0: i32) -> (i32, i32) {
    %c0_i32 = arith.constant 0 : i32
    %c0_i32_0 = arith.constant 0 : i32
    %c0_i32_1 = arith.constant 0 : i32
    return %c0_i32, %c0_i32_0 : i32, i32
  }
  func.func @transform_1(%arg0: i32) -> (i32, i32) {
    %c0_i32 = arith.constant 0 : i32
    %c0_i32_0 = arith.constant 0 : i32
    %c0_i32_1 = arith.constant 0 : i32
    return %c0_i32, %c0_i32_0 : i32, i32
  }
  func.func @transform_2(%arg0: i32) -> (i32, i32) {
    %c0_i32 = arith.constant 0 : i32
    %c0_i32_0 = arith.constant 0 : i32
    %c0_i32_1 = arith.constant 0 : i32
    return %c0_i32, %c0_i32_0 : i32, i32
  }
  func.func @transform_3(%arg0: i32) -> (i32, i32) {
    %c0_i32 = arith.constant 0 : i32
    %c0_i32_0 = arith.constant 0 : i32
    %c0_i32_1 = arith.constant 0 : i32
    return %c0_i32, %c0_i32_0 : i32, i32
  }
}

module attributes {stable_mosaic.version = 11 : i64} {
  func.func @_linear_kernel(%arg0: i32, %arg1: memref<32x12xf32, #tpu.memory_space<vmem>>, %arg2: memref<12x32xf32, #tpu.memory_space<vmem>>, %arg3: memref<1x32xf32, #tpu.memory_space<vmem>>, %arg4: memref<32x32xf32, #tpu.memory_space<vmem>>) attributes {dimension_semantics = [#tpu.dimension_semantics<arbitrary>], iteration_bounds = array<i64: 1>, scalar_prefetch = 0 : i64, scratch_operands = 0 : i64, tpu.core_type = #tpu.core_type<tc>, window_params = [{pipeline_mode = #tpu.pipeline_mode<synchronous>, transform_indices = @transform_0, window_bounds = array<i64: 32, 12>}, {pipeline_mode = #tpu.pipeline_mode<synchronous>, transform_indices = @transform_1, window_bounds = array<i64: 12, 32>}, {pipeline_mode = #tpu.pipeline_mode<synchronous>, transform_indices = @transform_2, window_bounds = array<i64: 1, 32>}, {pipeline_mode = #tpu.pipeline_mode<synchronous>, transform_indices = @transform_3, window_bounds = array<i64: 32, 32>}]} {
    %c0 = arith.constant 0 : index
    %c0_0 = arith.constant 0 : index
    %0 = vector.load %arg1[%c0, %c0_0] : memref<32x12xf32, #tpu.memory_space<vmem>>, vector<32x12xf32>
    %c0_1 = arith.constant 0 : index
    %c0_2 = arith.constant 0 : index
    %1 = vector.load %arg2[%c0_1, %c0_2] : memref<12x32xf32, #tpu.memory_space<vmem>>, vector<12x32xf32>
    %cst = arith.constant dense<0.000000e+00> : vector<32x32xf32>
    %2 = tpu.matmul %0, %1, %cst {dimension_numbers = #tpu.dot_dimension_numbers<[1], [0], [0], [1], [0, 0, 1, 1], [], []>} : vector<32x12xf32>, vector<12x32xf32>, vector<32x32xf32> -> vector<32x32xf32>
    %c0_3 = arith.constant 0 : index
    %c0_4 = arith.constant 0 : index
    %3 = vector.load %arg3[%c0_3, %c0_4] : memref<1x32xf32, #tpu.memory_space<vmem>>, vector<1x32xf32>
    %4 = vector.broadcast %3 : vector<1x32xf32> to vector<32x32xf32>
    %5 = arith.addf %2, %4 : vector<32x32xf32>
    %c0_5 = arith.constant 0 : index
    %c0_6 = arith.constant 0 : index
    %6 = vector.load %arg4[%c0_5, %c0_6] : memref<32x32xf32, #tpu.memory_space<vmem>>, vector<32x32xf32>
    tpu.vector_store %arg4[%c0_5, %c0_6], %5 {strides = array<i32>} : memref<32x32xf32, #tpu.memory_space<vmem>>, vector<32x32xf32>,
    return
  }
  func.func @transform_0(%arg0: i32) -> (i32, i32) {
    %c0_i32 = arith.constant 0 : i32
    %c0_i32_0 = arith.constant 0 : i32
    %c0_i32_1 = arith.constant 0 : i32
    return %c0_i32, %c0_i32_0 : i32, i32
  }
  func.func @transform_1(%arg0: i32) -> (i32, i32) {
    %c0_i32 = arith.constant 0 : i32
    %c0_i32_0 = arith.constant 0 : i32
    %c0_i32_1 = arith.constant 0 : i32
    return %c0_i32, %c0_i32_0 : i32, i32
  }
  func.func @transform_2(%arg0: i32) -> (i32, i32) {
    %c0_i32 = arith.constant 0 : i32
    %c0_i32_0 = arith.constant 0 : i32
    %c0_i32_1 = arith.constant 0 : i32
    return %c0_i32, %c0_i32_0 : i32, i32
  }
  func.func @transform_3(%arg0: i32) -> (i32, i32) {
    %c0_i32 = arith.constant 0 : i32
    %c0_i32_0 = arith.constant 0 : i32
    %c0_i32_1 = arith.constant 0 : i32
    return %c0_i32, %c0_i32_0 : i32, i32
  }
}

module attributes {stable_mosaic.version = 11 : i64} {
  func.func @_fused_layer_kernel(%arg0: i32, %arg1: memref<48x32xf32, #tpu.memory_space<vmem>>, %arg2: memref<48x48xf32, #tpu.memory_space<vmem>>, %arg3: memref<1x32xf32, #tpu.memory_space<vmem>>, %arg4: memref<1x32xf32, #tpu.memory_space<vmem>>, %arg5: memref<32x32xf32, #tpu.memory_space<vmem>>, %arg6: memref<32x32xf32, #tpu.memory_space<vmem>>, %arg7: memref<32x32xf32, #tpu.memory_space<vmem>>, %arg8: memref<1x32xf32, #tpu.memory_space<vmem>>, %arg9: memref<1x32xf32, #tpu.memory_space<vmem>>, %arg10: memref<1x32xf32, #tpu.memory_space<vmem>>, %arg11: memref<32x32xf32, #tpu.memory_space<vmem>>, %arg12: memref<1x32xf32, #tpu.memory_space<vmem>>, %arg13: memref<1x32xf32, #tpu.memory_space<vmem>>, %arg14: memref<1x32xf32, #tpu.memory_space<vmem>>, %arg15: memref<32x128xf32, #tpu.memory_space<vmem>>, %arg16: memref<1x128xf32, #tpu.memory_space<vmem>>, %arg17: memref<128x32xf32, #tpu.memory_space<vmem>>, %arg18: memref<1x32xf32, #tpu.memory_space<vmem>>, %arg19: memref<1x32xf32, #tpu.memory_space<vmem>>, %arg20: memref<1x32xf32, #tpu.memory_space<vmem>>, %arg21: memref<48x32xf32, #tpu.memory_space<vmem>>) attributes {dimension_semantics = [#tpu.dimension_semantics<parallel>], iteration_bounds = array<i64: 2>, scalar_prefetch = 0 : i64, scratch_operands = 0 : i64, tpu.core_type = #tpu.core_type<tc>, window_params = [{transform_indices = @transform_0, window_bounds = array<i64: 48, 32>}, {pipeline_mode = #tpu.pipeline_mode<synchronous>, transform_indices = @transform_1, window_bounds = array<i64: 48, 48>}, {pipeline_mode = #tpu.pipeline_mode<synchronous>, transform_indices = @transform_2, window_bounds = array<i64: 1, 32>}, {pipeline_mode = #tpu.pipeline_mode<synchronous>, transform_indices = @transform_3, window_bounds = array<i64: 1, 32>}, {pipeline_mode = #tpu.pipeline_mode<synchronous>, transform_indices = @transform_4, window_bounds = array<i64: 32, 32>}, {pipeline_mode = #tpu.pipeline_mode<synchronous>, transform_indices = @transform_5, window_bounds = array<i64: 32, 32>}, {pipeline_mode = #tpu.pipeline_mode<synchronous>, transform_indices = @transform_6, window_bounds = array<i64: 32, 32>}, {pipeline_mode = #tpu.pipeline_mode<synchronous>, transform_indices = @transform_7, window_bounds = array<i64: 1, 32>}, {pipeline_mode = #tpu.pipeline_mode<synchronous>, transform_indices = @transform_8, window_bounds = array<i64: 1, 32>}, {pipeline_mode = #tpu.pipeline_mode<synchronous>, transform_indices = @transform_9, window_bounds = array<i64: 1, 32>}, {pipeline_mode = #tpu.pipeline_mode<synchronous>, transform_indices = @transform_10, window_bounds = array<i64: 32, 32>}, {pipeline_mode = #tpu.pipeline_mode<synchronous>, transform_indices = @transform_11, window_bounds = array<i64: 1, 32>}, {pipeline_mode = #tpu.pipeline_mode<synchronous>, transform_indices = @transform_12, window_bounds = array<i64: 1, 32>}, {pipeline_mode = #tpu.pipeline_mode<synchronous>, transform_indices = @transform_13, window_bounds = array<i64: 1, 32>}, {pipeline_mode = #tpu.pipeline_mode<synchronous>, transform_indices = @transform_14, window_bounds = array<i64: 32, 128>}, {pipeline_mode = #tpu.pipeline_mode<synchronous>, transform_indices = @transform_15, window_bounds = array<i64: 1, 128>}, {pipeline_mode = #tpu.pipeline_mode<synchronous>, transform_indices = @transform_16, window_bounds = array<i64: 128, 32>}, {pipeline_mode = #tpu.pipeline_mode<synchronous>, transform_indices = @transform_17, window_bounds = array<i64: 1, 32>}, {pipeline_mode = #tpu.pipeline_mode<synchronous>, transform_indices = @transform_18, window_bounds = array<i64: 1, 32>}, {pipeline_mode = #tpu.pipeline_mode<synchronous>, transform_indices = @transform_19, window_bounds = array<i64: 1, 32>}, {transform_indices = @transform_20, window_bounds = array<i64: 48, 32>}]} {
    %c0 = arith.constant 0 : index
    %c0_0 = arith.constant 0 : index
    %0 = vector.load %arg1[%c0, %c0_0] : memref<48x32xf32, #tpu.memory_space<vmem>>, vector<48x32xf32>
    %c0_1 = arith.constant 0 : index
    %c0_2 = arith.constant 0 : index
    %1 = vector.load %arg3[%c0_1, %c0_2] : memref<1x32xf32, #tpu.memory_space<vmem>>, vector<1x32xf32>
    %c0_3 = arith.constant 0 : index
    %c0_4 = arith.constant 0 : index
    %2 = vector.load %arg4[%c0_3, %c0_4] : memref<1x32xf32, #tpu.memory_space<vmem>>, vector<1x32xf32>
    %cst = arith.constant dense<0.000000e+00> : vector<48xf32>
    %3 = vector.multi_reduction <add>, %0, %cst [1] : vector<48x32xf32> to vector<48xf32>
    %4 = vector.shape_cast %3 : vector<48xf32> to vector<48x1xf32>
    %cst_5 = arith.constant 3.200000e+01 : f32
    %5 = vector.broadcast %cst_5 : f32 to vector<48x1xf32>
    %6 = arith.divf %4, %5 : vector<48x1xf32>
    %7 = vector.broadcast %6 : vector<48x1xf32> to vector<48x32xf32>
    %8 = arith.subf %0, %7 : vector<48x32xf32>
    %9 = arith.mulf %8, %8 : vector<48x32xf32>
    %cst_6 = arith.constant dense<0.000000e+00> : vector<48xf32>
    %10 = vector.multi_reduction <add>, %9, %cst_6 [1] : vector<48x32xf32> to vector<48xf32>
    %11 = vector.shape_cast %10 : vector<48xf32> to vector<48x1xf32>
    %cst_7 = arith.constant 3.200000e+01 : f32
    %12 = vector.broadcast %cst_7 : f32 to vector<48x1xf32>
    %13 = arith.divf %11, %12 : vector<48x1xf32>
    %14 = vector.broadcast %6 : vector<48x1xf32> to vector<48x32xf32>
    %15 = arith.subf %0, %14 : vector<48x32xf32>
    %cst_8 = arith.constant 9.99999974E-6 : f32
    %16 = vector.broadcast %cst_8 : f32 to vector<48x1xf32>
    %17 = arith.addf %13, %16 : vector<48x1xf32>
    %18 = math.rsqrt %17 : vector<48x1xf32>
    %19 = vector.broadcast %18 : vector<48x1xf32> to vector<48x32xf32>
    %20 = arith.mulf %15, %19 : vector<48x32xf32>
    %21 = vector.broadcast %1 : vector<1x32xf32> to vector<48x32xf32>
    %22 = arith.mulf %20, %21 : vector<48x32xf32>
    %23 = vector.broadcast %2 : vector<1x32xf32> to vector<48x32xf32>
    %24 = arith.addf %22, %23 : vector<48x32xf32>
    %c0_9 = arith.constant 0 : index
    %c0_10 = arith.constant 0 : index
    %25 = vector.load %arg5[%c0_9, %c0_10] : memref<32x32xf32, #tpu.memory_space<vmem>>, vector<32x32xf32>
    %cst_11 = arith.constant dense<0.000000e+00> : vector<48x32xf32>
    %26 = tpu.matmul %24, %25, %cst_11 {dimension_numbers = #tpu.dot_dimension_numbers<[1], [0], [0], [1], [0, 0, 1, 1], [], []>} : vector<48x32xf32>, vector<32x32xf32>, vector<48x32xf32> -> vector<48x32xf32>
    %c0_12 = arith.constant 0 : index
    %c0_13 = arith.constant 0 : index
    %27 = vector.load %arg8[%c0_12, %c0_13] : memref<1x32xf32, #tpu.memory_space<vmem>>, vector<1x32xf32>
    %28 = vector.broadcast %27 : vector<1x32xf32> to vector<48x32xf32>
    %29 = arith.addf %26, %28 : vector<48x32xf32>
    %c0_14 = arith.constant 0 : index
    %c0_15 = arith.constant 0 : index
    %30 = vector.load %arg6[%c0_14, %c0_15] : memref<32x32xf32, #tpu.memory_space<vmem>>, vector<32x32xf32>
    %cst_16 = arith.constant dense<0.000000e+00> : vector<48x32xf32>
    %31 = tpu.matmul %24, %30, %cst_16 {dimension_numbers = #tpu.dot_dimension_numbers<[1], [0], [0], [1], [0, 0, 1, 1], [], []>} : vector<48x32xf32>, vector<32x32xf32>, vector<48x32xf32> -> vector<48x32xf32>
    %c0_17 = arith.constant 0 : index
    %c0_18 = arith.constant 0 : index
    %32 = vector.load %arg9[%c0_17, %c0_18] : memref<1x32xf32, #tpu.memory_space<vmem>>, vector<1x32xf32>
    %33 = vector.broadcast %32 : vector<1x32xf32> to vector<48x32xf32>
    %34 = arith.addf %31, %33 : vector<48x32xf32>
    %c0_19 = arith.constant 0 : index
    %c0_20 = arith.constant 0 : index
    %35 = vector.load %arg7[%c0_19, %c0_20] : memref<32x32xf32, #tpu.memory_space<vmem>>, vector<32x32xf32>
    %cst_21 = arith.constant dense<0.000000e+00> : vector<48x32xf32>
    %36 = tpu.matmul %24, %35, %cst_21 {dimension_numbers = #tpu.dot_dimension_numbers<[1], [0], [0], [1], [0, 0, 1, 1], [], []>} : vector<48x32xf32>, vector<32x32xf32>, vector<48x32xf32> -> vector<48x32xf32>
    %c0_22 = arith.constant 0 : index
    %c0_23 = arith.constant 0 : index
    %37 = vector.load %arg10[%c0_22, %c0_23] : memref<1x32xf32, #tpu.memory_space<vmem>>, vector<1x32xf32>
    %38 = vector.broadcast %37 : vector<1x32xf32> to vector<48x32xf32>
    %39 = arith.addf %36, %38 : vector<48x32xf32>
    %c0_24 = arith.constant 0 : index
    %c0_25 = arith.constant 0 : index
    %40 = vector.load %arg2[%c0_24, %c0_25] : memref<48x48xf32, #tpu.memory_space<vmem>>, vector<48x48xf32>
    %41 = tpu.iota {dimensions = array<i32: 1>} : vector<1x32xi32>
    %cst_26 = arith.constant 0.000000e+00 : f32
    %42 = vector.broadcast %cst_26 : f32 to vector<48x32xf32>
    %c0_i32 = arith.constant 0 : i32
    %43 = vector.broadcast %c0_i32 : i32 to vector<1x32xi32>
    %44 = arith.cmpi sge, %41, %43 : vector<1x32xi32>
    %c8_i32 = arith.constant 8 : i32
    %45 = vector.broadcast %c8_i32 : i32 to vector<1x32xi32>
    %46 = arith.cmpi slt, %41, %45 : vector<1x32xi32>
    %47 = arith.andi %44, %46 : vector<1x32xi1>
    %cst_27 = arith.constant 1.000000e+00 : f32
    %cst_28 = arith.constant 0.000000e+00 : f32
    %48 = vector.broadcast %cst_27 : f32 to vector<1x32xf32>
    %49 = vector.broadcast %cst_28 : f32 to vector<1x32xf32>
    %50 = arith.select %47, %48, %49 : vector<1x32xi1>, vector<1x32xf32>
    %51 = vector.broadcast %50 : vector<1x32xf32> to vector<48x32xf32>
    %52 = arith.mulf %29, %51 : vector<48x32xf32>
    %cst_29 = arith.constant dense<0.000000e+00> : vector<48x48xf32>
    %53 = tpu.matmul %52, %34, %cst_29 {dimension_numbers = #tpu.dot_dimension_numbers<[1], [1], [0], [0], [0, 0, 1, 0], [], []>} : vector<48x32xf32>, vector<48x32xf32>, vector<48x48xf32> -> vector<48x48xf32>
    %cst_30 = arith.constant 0.353553385 : f32
    %54 = vector.broadcast %cst_30 : f32 to vector<48x48xf32>
    %55 = arith.mulf %53, %54 : vector<48x48xf32>
    %56 = arith.addf %55, %40 : vector<48x48xf32>
    %cst_31 = arith.constant dense<0xFF800000> : vector<48xf32>
    %57 = vector.multi_reduction <maximumf>, %56, %cst_31 [1] : vector<48x48xf32> to vector<48xf32>
    %58 = vector.shape_cast %57 : vector<48xf32> to vector<48x1xf32>
    %59 = vector.broadcast %58 : vector<48x1xf32> to vector<48x48xf32>
    %60 = arith.subf %56, %59 : vector<48x48xf32>
    %61 = math.exp %60 : vector<48x48xf32>
    %cst_32 = arith.constant dense<0.000000e+00> : vector<48xf32>
    %62 = vector.multi_reduction <add>, %61, %cst_32 [1] : vector<48x48xf32> to vector<48xf32>
    %63 = vector.shape_cast %62 : vector<48xf32> to vector<48x1xf32>
    %64 = vector.broadcast %63 : vector<48x1xf32> to vector<48x48xf32>
    %65 = arith.divf %61, %64 : vector<48x48xf32>
    %66 = vector.broadcast %50 : vector<1x32xf32> to vector<48x32xf32>
    %67 = arith.mulf %39, %66 : vector<48x32xf32>
    %cst_33 = arith.constant dense<0.000000e+00> : vector<48x32xf32>
    %68 = tpu.matmul %65, %67, %cst_33 {dimension_numbers = #tpu.dot_dimension_numbers<[1], [0], [0], [1], [0, 0, 1, 1], [], []>} : vector<48x48xf32>, vector<48x32xf32>, vector<48x32xf32> -> vector<48x32xf32>
    %69 = arith.addf %42, %68 : vector<48x32xf32>
    %c8_i32_34 = arith.constant 8 : i32
    %70 = vector.broadcast %c8_i32_34 : i32 to vector<1x32xi32>
    %71 = arith.cmpi sge, %41, %70 : vector<1x32xi32>
    %c16_i32 = arith.constant 16 : i32
    %72 = vector.broadcast %c16_i32 : i32 to vector<1x32xi32>
    %73 = arith.cmpi slt, %41, %72 : vector<1x32xi32>
    %74 = arith.andi %71, %73 : vector<1x32xi1>
    %cst_35 = arith.constant 1.000000e+00 : f32
    %cst_36 = arith.constant 0.000000e+00 : f32
    %75 = vector.broadcast %cst_35 : f32 to vector<1x32xf32>
    %76 = vector.broadcast %cst_36 : f32 to vector<1x32xf32>
    %77 = arith.select %74, %75, %76 : vector<1x32xi1>, vector<1x32xf32>
    %78 = vector.broadcast %77 : vector<1x32xf32> to vector<48x32xf32>
    %79 = arith.mulf %29, %78 : vector<48x32xf32>
    %cst_37 = arith.constant dense<0.000000e+00> : vector<48x48xf32>
    %80 = tpu.matmul %79, %34, %cst_37 {dimension_numbers = #tpu.dot_dimension_numbers<[1], [1], [0], [0], [0, 0, 1, 0], [], []>} : vector<48x32xf32>, vector<48x32xf32>, vector<48x48xf32> -> vector<48x48xf32>
    %cst_38 = arith.constant 0.353553385 : f32
    %81 = vector.broadcast %cst_38 : f32 to vector<48x48xf32>
    %82 = arith.mulf %80, %81 : vector<48x48xf32>
    %83 = arith.addf %82, %40 : vector<48x48xf32>
    %cst_39 = arith.constant dense<0xFF800000> : vector<48xf32>
    %84 = vector.multi_reduction <maximumf>, %83, %cst_39 [1] : vector<48x48xf32> to vector<48xf32>
    %85 = vector.shape_cast %84 : vector<48xf32> to vector<48x1xf32>
    %86 = vector.broadcast %85 : vector<48x1xf32> to vector<48x48xf32>
    %87 = arith.subf %83, %86 : vector<48x48xf32>
    %88 = math.exp %87 : vector<48x48xf32>
    %cst_40 = arith.constant dense<0.000000e+00> : vector<48xf32>
    %89 = vector.multi_reduction <add>, %88, %cst_40 [1] : vector<48x48xf32> to vector<48xf32>
    %90 = vector.shape_cast %89 : vector<48xf32> to vector<48x1xf32>
    %91 = vector.broadcast %90 : vector<48x1xf32> to vector<48x48xf32>
    %92 = arith.divf %88, %91 : vector<48x48xf32>
    %93 = vector.broadcast %77 : vector<1x32xf32> to vector<48x32xf32>
    %94 = arith.mulf %39, %93 : vector<48x32xf32>
    %cst_41 = arith.constant dense<0.000000e+00> : vector<48x32xf32>
    %95 = tpu.matmul %92, %94, %cst_41 {dimension_numbers = #tpu.dot_dimension_numbers<[1], [0], [0], [1], [0, 0, 1, 1], [], []>} : vector<48x48xf32>, vector<48x32xf32>, vector<48x32xf32> -> vector<48x32xf32>
    %96 = arith.addf %69, %95 : vector<48x32xf32>
    %c16_i32_42 = arith.constant 16 : i32
    %97 = vector.broadcast %c16_i32_42 : i32 to vector<1x32xi32>
    %98 = arith.cmpi sge, %41, %97 : vector<1x32xi32>
    %c24_i32 = arith.constant 24 : i32
    %99 = vector.broadcast %c24_i32 : i32 to vector<1x32xi32>
    %100 = arith.cmpi slt, %41, %99 : vector<1x32xi32>
    %101 = arith.andi %98, %100 : vector<1x32xi1>
    %cst_43 = arith.constant 1.000000e+00 : f32
    %cst_44 = arith.constant 0.000000e+00 : f32
    %102 = vector.broadcast %cst_43 : f32 to vector<1x32xf32>
    %103 = vector.broadcast %cst_44 : f32 to vector<1x32xf32>
    %104 = arith.select %101, %102, %103 : vector<1x32xi1>, vector<1x32xf32>
    %105 = vector.broadcast %104 : vector<1x32xf32> to vector<48x32xf32>
    %106 = arith.mulf %29, %105 : vector<48x32xf32>
    %cst_45 = arith.constant dense<0.000000e+00> : vector<48x48xf32>
    %107 = tpu.matmul %106, %34, %cst_45 {dimension_numbers = #tpu.dot_dimension_numbers<[1], [1], [0], [0], [0, 0, 1, 0], [], []>} : vector<48x32xf32>, vector<48x32xf32>, vector<48x48xf32> -> vector<48x48xf32>
    %cst_46 = arith.constant 0.353553385 : f32
    %108 = vector.broadcast %cst_46 : f32 to vector<48x48xf32>
    %109 = arith.mulf %107, %108 : vector<48x48xf32>
    %110 = arith.addf %109, %40 : vector<48x48xf32>
    %cst_47 = arith.constant dense<0xFF800000> : vector<48xf32>
    %111 = vector.multi_reduction <maximumf>, %110, %cst_47 [1] : vector<48x48xf32> to vector<48xf32>
    %112 = vector.shape_cast %111 : vector<48xf32> to vector<48x1xf32>
    %113 = vector.broadcast %112 : vector<48x1xf32> to vector<48x48xf32>
    %114 = arith.subf %110, %113 : vector<48x48xf32>
    %115 = math.exp %114 : vector<48x48xf32>
    %cst_48 = arith.constant dense<0.000000e+00> : vector<48xf32>
    %116 = vector.multi_reduction <add>, %115, %cst_48 [1] : vector<48x48xf32> to vector<48xf32>
    %117 = vector.shape_cast %116 : vector<48xf32> to vector<48x1xf32>
    %118 = vector.broadcast %117 : vector<48x1xf32> to vector<48x48xf32>
    %119 = arith.divf %115, %118 : vector<48x48xf32>
    %120 = vector.broadcast %104 : vector<1x32xf32> to vector<48x32xf32>
    %121 = arith.mulf %39, %120 : vector<48x32xf32>
    %cst_49 = arith.constant dense<0.000000e+00> : vector<48x32xf32>
    %122 = tpu.matmul %119, %121, %cst_49 {dimension_numbers = #tpu.dot_dimension_numbers<[1], [0], [0], [1], [0, 0, 1, 1], [], []>} : vector<48x48xf32>, vector<48x32xf32>, vector<48x32xf32> -> vector<48x32xf32>
    %123 = arith.addf %96, %122 : vector<48x32xf32>
    %c24_i32_50 = arith.constant 24 : i32
    %124 = vector.broadcast %c24_i32_50 : i32 to vector<1x32xi32>
    %125 = arith.cmpi sge, %41, %124 : vector<1x32xi32>
    %c32_i32 = arith.constant 32 : i32
    %126 = vector.broadcast %c32_i32 : i32 to vector<1x32xi32>
    %127 = arith.cmpi slt, %41, %126 : vector<1x32xi32>
    %128 = arith.andi %125, %127 : vector<1x32xi1>
    %cst_51 = arith.constant 1.000000e+00 : f32
    %cst_52 = arith.constant 0.000000e+00 : f32
    %129 = vector.broadcast %cst_51 : f32 to vector<1x32xf32>
    %130 = vector.broadcast %cst_52 : f32 to vector<1x32xf32>
    %131 = arith.select %128, %129, %130 : vector<1x32xi1>, vector<1x32xf32>
    %132 = vector.broadcast %131 : vector<1x32xf32> to vector<48x32xf32>
    %133 = arith.mulf %29, %132 : vector<48x32xf32>
    %cst_53 = arith.constant dense<0.000000e+00> : vector<48x48xf32>
    %134 = tpu.matmul %133, %34, %cst_53 {dimension_numbers = #tpu.dot_dimension_numbers<[1], [1], [0], [0], [0, 0, 1, 0], [], []>} : vector<48x32xf32>, vector<48x32xf32>, vector<48x48xf32> -> vector<48x48xf32>
    %cst_54 = arith.constant 0.353553385 : f32
    %135 = vector.broadcast %cst_54 : f32 to vector<48x48xf32>
    %136 = arith.mulf %134, %135 : vector<48x48xf32>
    %137 = arith.addf %136, %40 : vector<48x48xf32>
    %cst_55 = arith.constant dense<0xFF800000> : vector<48xf32>
    %138 = vector.multi_reduction <maximumf>, %137, %cst_55 [1] : vector<48x48xf32> to vector<48xf32>
    %139 = vector.shape_cast %138 : vector<48xf32> to vector<48x1xf32>
    %140 = vector.broadcast %139 : vector<48x1xf32> to vector<48x48xf32>
    %141 = arith.subf %137, %140 : vector<48x48xf32>
    %142 = math.exp %141 : vector<48x48xf32>
    %cst_56 = arith.constant dense<0.000000e+00> : vector<48xf32>
    %143 = vector.multi_reduction <add>, %142, %cst_56 [1] : vector<48x48xf32> to vector<48xf32>
    %144 = vector.shape_cast %143 : vector<48xf32> to vector<48x1xf32>
    %145 = vector.broadcast %144 : vector<48x1xf32> to vector<48x48xf32>
    %146 = arith.divf %142, %145 : vector<48x48xf32>
    %147 = vector.broadcast %131 : vector<1x32xf32> to vector<48x32xf32>
    %148 = arith.mulf %39, %147 : vector<48x32xf32>
    %cst_57 = arith.constant dense<0.000000e+00> : vector<48x32xf32>
    %149 = tpu.matmul %146, %148, %cst_57 {dimension_numbers = #tpu.dot_dimension_numbers<[1], [0], [0], [1], [0, 0, 1, 1], [], []>} : vector<48x48xf32>, vector<48x32xf32>, vector<48x32xf32> -> vector<48x32xf32>
    %150 = arith.addf %123, %149 : vector<48x32xf32>
    %c0_58 = arith.constant 0 : index
    %c0_59 = arith.constant 0 : index
    %151 = vector.load %arg11[%c0_58, %c0_59] : memref<32x32xf32, #tpu.memory_space<vmem>>, vector<32x32xf32>
    %cst_60 = arith.constant dense<0.000000e+00> : vector<48x32xf32>
    %152 = tpu.matmul %150, %151, %cst_60 {dimension_numbers = #tpu.dot_dimension_numbers<[1], [0], [0], [1], [0, 0, 1, 1], [], []>} : vector<48x32xf32>, vector<32x32xf32>, vector<48x32xf32> -> vector<48x32xf32>
    %153 = arith.addf %0, %152 : vector<48x32xf32>
    %c0_61 = arith.constant 0 : index
    %c0_62 = arith.constant 0 : index
    %154 = vector.load %arg12[%c0_61, %c0_62] : memref<1x32xf32, #tpu.memory_space<vmem>>, vector<1x32xf32>
    %155 = vector.broadcast %154 : vector<1x32xf32> to vector<48x32xf32>
    %156 = arith.addf %153, %155 : vector<48x32xf32>
    %c0_63 = arith.constant 0 : index
    %c0_64 = arith.constant 0 : index
    %157 = vector.load %arg13[%c0_63, %c0_64] : memref<1x32xf32, #tpu.memory_space<vmem>>, vector<1x32xf32>
    %c0_65 = arith.constant 0 : index
    %c0_66 = arith.constant 0 : index
    %158 = vector.load %arg14[%c0_65, %c0_66] : memref<1x32xf32, #tpu.memory_space<vmem>>, vector<1x32xf32>
    %cst_67 = arith.constant dense<0.000000e+00> : vector<48xf32>
    %159 = vector.multi_reduction <add>, %156, %cst_67 [1] : vector<48x32xf32> to vector<48xf32>
    %160 = vector.shape_cast %159 : vector<48xf32> to vector<48x1xf32>
    %cst_68 = arith.constant 3.200000e+01 : f32
    %161 = vector.broadcast %cst_68 : f32 to vector<48x1xf32>
    %162 = arith.divf %160, %161 : vector<48x1xf32>
    %163 = vector.broadcast %162 : vector<48x1xf32> to vector<48x32xf32>
    %164 = arith.subf %156, %163 : vector<48x32xf32>
    %165 = arith.mulf %164, %164 : vector<48x32xf32>
    %cst_69 = arith.constant dense<0.000000e+00> : vector<48xf32>
    %166 = vector.multi_reduction <add>, %165, %cst_69 [1] : vector<48x32xf32> to vector<48xf32>
    %167 = vector.shape_cast %166 : vector<48xf32> to vector<48x1xf32>
    %cst_70 = arith.constant 3.200000e+01 : f32
    %168 = vector.broadcast %cst_70 : f32 to vector<48x1xf32>
    %169 = arith.divf %167, %168 : vector<48x1xf32>
    %170 = vector.broadcast %162 : vector<48x1xf32> to vector<48x32xf32>
    %171 = arith.subf %156, %170 : vector<48x32xf32>
    %cst_71 = arith.constant 9.99999974E-6 : f32
    %172 = vector.broadcast %cst_71 : f32 to vector<48x1xf32>
    %173 = arith.addf %169, %172 : vector<48x1xf32>
    %174 = math.rsqrt %173 : vector<48x1xf32>
    %175 = vector.broadcast %174 : vector<48x1xf32> to vector<48x32xf32>
    %176 = arith.mulf %171, %175 : vector<48x32xf32>
    %177 = vector.broadcast %157 : vector<1x32xf32> to vector<48x32xf32>
    %178 = arith.mulf %176, %177 : vector<48x32xf32>
    %179 = vector.broadcast %158 : vector<1x32xf32> to vector<48x32xf32>
    %180 = arith.addf %178, %179 : vector<48x32xf32>
    %c0_72 = arith.constant 0 : index
    %c0_73 = arith.constant 0 : index
    %181 = vector.load %arg15[%c0_72, %c0_73] : memref<32x128xf32, #tpu.memory_space<vmem>>, vector<32x128xf32>
    %cst_74 = arith.constant dense<0.000000e+00> : vector<48x128xf32>
    %182 = tpu.matmul %180, %181, %cst_74 {dimension_numbers = #tpu.dot_dimension_numbers<[1], [0], [0], [1], [0, 0, 1, 1], [], []>} : vector<48x32xf32>, vector<32x128xf32>, vector<48x128xf32> -> vector<48x128xf32>
    %c0_75 = arith.constant 0 : index
    %c0_76 = arith.constant 0 : index
    %183 = vector.load %arg16[%c0_75, %c0_76] : memref<1x128xf32, #tpu.memory_space<vmem>>, vector<1x128xf32>
    %184 = vector.broadcast %183 : vector<1x128xf32> to vector<48x128xf32>
    %185 = arith.addf %182, %184 : vector<48x128xf32>
    %cst_77 = arith.constant 5.000000e-01 : f32
    %186 = vector.broadcast %cst_77 : f32 to vector<48x128xf32>
    %187 = arith.mulf %186, %185 : vector<48x128xf32>
    %cst_78 = arith.constant 0.707106769 : f32
    %188 = vector.broadcast %cst_78 : f32 to vector<48x128xf32>
    %189 = arith.mulf %185, %188 : vector<48x128xf32>
    %190 = math.absf %189 : vector<48x128xf32>
    %cst_79 = arith.constant 0.327591091 : f32
    %191 = vector.broadcast %cst_79 : f32 to vector<48x128xf32>
    %192 = arith.mulf %191, %190 : vector<48x128xf32>
    %cst_80 = arith.constant 1.000000e+00 : f32
    %193 = vector.broadcast %cst_80 : f32 to vector<48x128xf32>
    %194 = arith.addf %193, %192 : vector<48x128xf32>
    %cst_81 = arith.constant 1.000000e+00 : f32
    %195 = vector.broadcast %cst_81 : f32 to vector<48x128xf32>
    %196 = arith.divf %195, %194 : vector<48x128xf32>
    %cst_82 = arith.constant 1.06140542 : f32
    %197 = vector.broadcast %cst_82 : f32 to vector<48x128xf32>
    %198 = arith.mulf %196, %197 : vector<48x128xf32>
    %cst_83 = arith.constant -1.45315206 : f32
    %199 = vector.broadcast %cst_83 : f32 to vector<48x128xf32>
    %200 = arith.addf %199, %198 : vector<48x128xf32>
    %201 = arith.mulf %196, %200 : vector<48x128xf32>
    %cst_84 = arith.constant 1.42141378 : f32
    %202 = vector.broadcast %cst_84 : f32 to vector<48x128xf32>
    %203 = arith.addf %202, %201 : vector<48x128xf32>
    %204 = arith.mulf %196, %203 : vector<48x128xf32>
    %cst_85 = arith.constant -0.284496725 : f32
    %205 = vector.broadcast %cst_85 : f32 to vector<48x128xf32>
    %206 = arith.addf %205, %204 : vector<48x128xf32>
    %207 = arith.mulf %196, %206 : vector<48x128xf32>
    %cst_86 = arith.constant 0.254829586 : f32
    %208 = vector.broadcast %cst_86 : f32 to vector<48x128xf32>
    %209 = arith.addf %208, %207 : vector<48x128xf32>
    %210 = arith.mulf %196, %209 : vector<48x128xf32>
    %cst_87 = arith.constant 0.000000e+00 : f32
    %211 = vector.broadcast %cst_87 : f32 to vector<48x128xf32>
    %212 = arith.subf %211, %190 : vector<48x128xf32>
    %213 = arith.mulf %212, %190 : vector<48x128xf32>
    %214 = math.exp %213 : vector<48x128xf32>
    %215 = arith.mulf %210, %214 : vector<48x128xf32>
    %cst_88 = arith.constant 1.000000e+00 : f32
    %216 = vector.broadcast %cst_88 : f32 to vector<48x128xf32>
    %217 = arith.subf %216, %215 : vector<48x128xf32>
    %cst_89 = arith.constant 0.000000e+00 : f32
    %218 = vector.broadcast %cst_89 : f32 to vector<48x128xf32>
    %219 = arith.cmpf oge, %189, %218 : vector<48x128xf32>
    %cst_90 = arith.constant 0.000000e+00 : f32
    %220 = vector.broadcast %cst_90 : f32 to vector<48x128xf32>
    %221 = arith.subf %220, %217 : vector<48x128xf32>
    %222 = arith.select %219, %217, %221 : vector<48x128xi1>, vector<48x128xf32>
    %cst_91 = arith.constant 1.000000e+00 : f32
    %223 = vector.broadcast %cst_91 : f32 to vector<48x128xf32>
    %224 = arith.addf %223, %222 : vector<48x128xf32>
    %225 = arith.mulf %187, %224 : vector<48x128xf32>
    %c0_92 = arith.constant 0 : index
    %c0_93 = arith.constant 0 : index
    %226 = vector.load %arg17[%c0_92, %c0_93] : memref<128x32xf32, #tpu.memory_space<vmem>>, vector<128x32xf32>
    %cst_94 = arith.constant dense<0.000000e+00> : vector<48x32xf32>
    %227 = tpu.matmul %225, %226, %cst_94 {dimension_numbers = #tpu.dot_dimension_numbers<[1], [0], [0], [1], [0, 0, 1, 1], [], []>} : vector<48x128xf32>, vector<128x32xf32>, vector<48x32xf32> -> vector<48x32xf32>
    %228 = arith.addf %156, %227 : vector<48x32xf32>
    %c0_95 = arith.constant 0 : index
    %c0_96 = arith.constant 0 : index
    %229 = vector.load %arg18[%c0_95, %c0_96] : memref<1x32xf32, #tpu.memory_space<vmem>>, vector<1x32xf32>
    %230 = vector.broadcast %229 : vector<1x32xf32> to vector<48x32xf32>
    %231 = arith.addf %228, %230 : vector<48x32xf32>
    %c0_97 = arith.constant 0 : index
    %c0_98 = arith.constant 0 : index
    %232 = vector.load %arg19[%c0_97, %c0_98] : memref<1x32xf32, #tpu.memory_space<vmem>>, vector<1x32xf32>
    %c0_99 = arith.constant 0 : index
    %c0_100 = arith.constant 0 : index
    %233 = vector.load %arg20[%c0_99, %c0_100] : memref<1x32xf32, #tpu.memory_space<vmem>>, vector<1x32xf32>
    %cst_101 = arith.constant dense<0.000000e+00> : vector<48xf32>
    %234 = vector.multi_reduction <add>, %231, %cst_101 [1] : vector<48x32xf32> to vector<48xf32>
    %235 = vector.shape_cast %234 : vector<48xf32> to vector<48x1xf32>
    %cst_102 = arith.constant 3.200000e+01 : f32
    %236 = vector.broadcast %cst_102 : f32 to vector<48x1xf32>
    %237 = arith.divf %235, %236 : vector<48x1xf32>
    %238 = vector.broadcast %237 : vector<48x1xf32> to vector<48x32xf32>
    %239 = arith.subf %231, %238 : vector<48x32xf32>
    %240 = arith.mulf %239, %239 : vector<48x32xf32>
    %cst_103 = arith.constant dense<0.000000e+00> : vector<48xf32>
    %241 = vector.multi_reduction <add>, %240, %cst_103 [1] : vector<48x32xf32> to vector<48xf32>
    %242 = vector.shape_cast %241 : vector<48xf32> to vector<48x1xf32>
    %cst_104 = arith.constant 3.200000e+01 : f32
    %243 = vector.broadcast %cst_104 : f32 to vector<48x1xf32>
    %244 = arith.divf %242, %243 : vector<48x1xf32>
    %245 = vector.broadcast %237 : vector<48x1xf32> to vector<48x32xf32>
    %246 = arith.subf %231, %245 : vector<48x32xf32>
    %cst_105 = arith.constant 9.99999974E-6 : f32
    %247 = vector.broadcast %cst_105 : f32 to vector<48x1xf32>
    %248 = arith.addf %244, %247 : vector<48x1xf32>
    %249 = math.rsqrt %248 : vector<48x1xf32>
    %250 = vector.broadcast %249 : vector<48x1xf32> to vector<48x32xf32>
    %251 = arith.mulf %246, %250 : vector<48x32xf32>
    %252 = vector.broadcast %232 : vector<1x32xf32> to vector<48x32xf32>
    %253 = arith.mulf %251, %252 : vector<48x32xf32>
    %254 = vector.broadcast %233 : vector<1x32xf32> to vector<48x32xf32>
    %255 = arith.addf %253, %254 : vector<48x32xf32>
    %c0_106 = arith.constant 0 : index
    %c0_107 = arith.constant 0 : index
    %256 = vector.load %arg21[%c0_106, %c0_107] : memref<48x32xf32, #tpu.memory_space<vmem>>, vector<48x32xf32>
    tpu.vector_store %arg21[%c0_106, %c0_107], %255 {strides = array<i32>} : memref<48x32xf32, #tpu.memory_space<vmem>>, vector<48x32xf32>,
    return
  }
  func.func @transform_0(%arg0: i32) -> (i32, i32) {
    %c0_i32 = arith.constant 0 : i32
    %c0_i32_0 = arith.constant 0 : i32
    return %arg0, %c0_i32 : i32, i32
  }
  func.func @transform_1(%arg0: i32) -> (i32, i32) {
    %c0_i32 = arith.constant 0 : i32
    %c0_i32_0 = arith.constant 0 : i32
    %c0_i32_1 = arith.constant 0 : i32
    return %c0_i32, %c0_i32_0 : i32, i32
  }
  func.func @transform_2(%arg0: i32) -> (i32, i32) {
    %c0_i32 = arith.constant 0 : i32
    %c0_i32_0 = arith.constant 0 : i32
    %c0_i32_1 = arith.constant 0 : i32
    return %c0_i32, %c0_i32_0 : i32, i32
  }
  func.func @transform_3(%arg0: i32) -> (i32, i32) {
    %c0_i32 = arith.constant 0 : i32
    %c0_i32_0 = arith.constant 0 : i32
    %c0_i32_1 = arith.constant 0 : i32
    return %c0_i32, %c0_i32_0 : i32, i32
  }
  func.func @transform_4(%arg0: i32) -> (i32, i32) {
    %c0_i32 = arith.constant 0 : i32
    %c0_i32_0 = arith.constant 0 : i32
    %c0_i32_1 = arith.constant 0 : i32
    return %c0_i32, %c0_i32_0 : i32, i32
  }
  func.func @transform_5(%arg0: i32) -> (i32, i32) {
    %c0_i32 = arith.constant 0 : i32
    %c0_i32_0 = arith.constant 0 : i32
    %c0_i32_1 = arith.constant 0 : i32
    return %c0_i32, %c0_i32_0 : i32, i32
  }
  func.func @transform_6(%arg0: i32) -> (i32, i32) {
    %c0_i32 = arith.constant 0 : i32
    %c0_i32_0 = arith.constant 0 : i32
    %c0_i32_1 = arith.constant 0 : i32
    return %c0_i32, %c0_i32_0 : i32, i32
  }
  func.func @transform_7(%arg0: i32) -> (i32, i32) {
    %c0_i32 = arith.constant 0 : i32
    %c0_i32_0 = arith.constant 0 : i32
    %c0_i32_1 = arith.constant 0 : i32
    return %c0_i32, %c0_i32_0 : i32, i32
  }
  func.func @transform_8(%arg0: i32) -> (i32, i32) {
    %c0_i32 = arith.constant 0 : i32
    %c0_i32_0 = arith.constant 0 : i32
    %c0_i32_1 = arith.constant 0 : i32
    return %c0_i32, %c0_i32_0 : i32, i32
  }
  func.func @transform_9(%arg0: i32) -> (i32, i32) {
    %c0_i32 = arith.constant 0 : i32
    %c0_i32_0 = arith.constant 0 : i32
    %c0_i32_1 = arith.constant 0 : i32
    return %c0_i32, %c0_i32_0 : i32, i32
  }
  func.func @transform_10(%arg0: i32) -> (i32, i32) {
    %c0_i32 = arith.constant 0 : i32
    %c0_i32_0 = arith.constant 0 : i32
    %c0_i32_1 = arith.constant 0 : i32
    return %c0_i32, %c0_i32_0 : i32, i32
  }
  func.func @transform_11(%arg0: i32) -> (i32, i32) {
    %c0_i32 = arith.constant 0 : i32
    %c0_i32_0 = arith.constant 0 : i32
    %c0_i32_1 = arith.constant 0 : i32
    return %c0_i32, %c0_i32_0 : i32, i32
  }
  func.func @transform_12(%arg0: i32) -> (i32, i32) {
    %c0_i32 = arith.constant 0 : i32
    %c0_i32_0 = arith.constant 0 : i32
    %c0_i32_1 = arith.constant 0 : i32
    return %c0_i32, %c0_i32_0 : i32, i32
  }
  func.func @transform_13(%arg0: i32) -> (i32, i32) {
    %c0_i32 = arith.constant 0 : i32
    %c0_i32_0 = arith.constant 0 : i32
    %c0_i32_1 = arith.constant 0 : i32
    return %c0_i32, %c0_i32_0 : i32, i32
  }
  func.func @transform_14(%arg0: i32) -> (i32, i32) {
    %c0_i32 = arith.constant 0 : i32
    %c0_i32_0 = arith.constant 0 : i32
    %c0_i32_1 = arith.constant 0 : i32
    return %c0_i32, %c0_i32_0 : i32, i32
  }
  func.func @transform_15(%arg0: i32) -> (i32, i32) {
    %c0_i32 = arith.constant 0 : i32
    %c0_i32_0 = arith.constant 0 : i32
    %c0_i32_1 = arith.constant 0 : i32
    return %c0_i32, %c0_i32_0 : i32, i32
  }
  func.func @transform_16(%arg0: i32) -> (i32, i32) {
    %c0_i32 = arith.constant 0 : i32
    %c0_i32_0 = arith.constant 0 : i32
    %c0_i32_1 = arith.constant 0 : i32
    return %c0_i32, %c0_i32_0 : i32, i32
  }
  func.func @transform_17(%arg0: i32) -> (i32, i32) {
    %c0_i32 = arith.constant 0 : i32
    %c0_i32_0 = arith.constant 0 : i32
    %c0_i32_1 = arith.constant 0 : i32
    return %c0_i32, %c0_i32_0 : i32, i32
  }
  func.func @transform_18(%arg0: i32) -> (i32, i32) {
    %c0_i32 = arith.constant 0 : i32
    %c0_i32_0 = arith.constant 0 : i32
    %c0_i32_1 = arith.constant 0 : i32
    return %c0_i32, %c0_i32_0 : i32, i32
  }
  func.func @transform_19(%arg0: i32) -> (i32, i32) {
    %c0_i32 = arith.constant 0 : i32
    %c0_i32_0 = arith.constant 0 : i32
    %c0_i32_1 = arith.constant 0 : i32
    return %c0_i32, %c0_i32_0 : i32, i32
  }
  func.func @transform_20(%arg0: i32) -> (i32, i32) {
    %c0_i32 = arith.constant 0 : i32
    %c0_i32_0 = arith.constant 0 : i32
    return %arg0, %c0_i32 : i32, i32
  }
}

module attributes {stable_mosaic.version = 11 : i64} {
  func.func @_bottleneck_kernel(%arg0: i32, %arg1: memref<96x32xf32, #tpu.memory_space<vmem>>, %arg2: memref<32x16xf32, #tpu.memory_space<vmem>>, %arg3: memref<1x16xf32, #tpu.memory_space<vmem>>, %arg4: memref<64x16xf32, #tpu.memory_space<vmem>>, %arg5: memref<1x64xf32, #tpu.memory_space<vmem>>, %arg6: memref<16x32xf32, #tpu.memory_space<vmem>>, %arg7: memref<1x32xf32, #tpu.memory_space<vmem>>, %arg8: memref<96x32xf32, #tpu.memory_space<vmem>>, %arg9: memref<1x1xf32, #tpu.memory_space<vmem>>) attributes {dimension_semantics = [#tpu.dimension_semantics<arbitrary>], iteration_bounds = array<i64: 1>, scalar_prefetch = 0 : i64, scratch_operands = 0 : i64, tpu.core_type = #tpu.core_type<tc>, window_params = [{pipeline_mode = #tpu.pipeline_mode<synchronous>, transform_indices = @transform_0, window_bounds = array<i64: 96, 32>}, {pipeline_mode = #tpu.pipeline_mode<synchronous>, transform_indices = @transform_1, window_bounds = array<i64: 32, 16>}, {pipeline_mode = #tpu.pipeline_mode<synchronous>, transform_indices = @transform_2, window_bounds = array<i64: 1, 16>}, {pipeline_mode = #tpu.pipeline_mode<synchronous>, transform_indices = @transform_3, window_bounds = array<i64: 64, 16>}, {pipeline_mode = #tpu.pipeline_mode<synchronous>, transform_indices = @transform_4, window_bounds = array<i64: 1, 64>}, {pipeline_mode = #tpu.pipeline_mode<synchronous>, transform_indices = @transform_5, window_bounds = array<i64: 16, 32>}, {pipeline_mode = #tpu.pipeline_mode<synchronous>, transform_indices = @transform_6, window_bounds = array<i64: 1, 32>}, {pipeline_mode = #tpu.pipeline_mode<synchronous>, transform_indices = @transform_7, window_bounds = array<i64: 96, 32>}, {pipeline_mode = #tpu.pipeline_mode<synchronous>, transform_indices = @transform_8, window_bounds = array<i64: 1, 1>}]} {
    %c0 = arith.constant 0 : index
    %c0_0 = arith.constant 0 : index
    %0 = vector.load %arg1[%c0, %c0_0] : memref<96x32xf32, #tpu.memory_space<vmem>>, vector<96x32xf32>
    %c0_1 = arith.constant 0 : index
    %c0_2 = arith.constant 0 : index
    %1 = vector.load %arg2[%c0_1, %c0_2] : memref<32x16xf32, #tpu.memory_space<vmem>>, vector<32x16xf32>
    %cst = arith.constant dense<0.000000e+00> : vector<96x16xf32>
    %2 = tpu.matmul %0, %1, %cst {dimension_numbers = #tpu.dot_dimension_numbers<[1], [0], [0], [1], [0, 0, 1, 1], [], []>} : vector<96x32xf32>, vector<32x16xf32>, vector<96x16xf32> -> vector<96x16xf32>
    %c0_3 = arith.constant 0 : index
    %c0_4 = arith.constant 0 : index
    %3 = vector.load %arg3[%c0_3, %c0_4] : memref<1x16xf32, #tpu.memory_space<vmem>>, vector<1x16xf32>
    %4 = vector.broadcast %3 : vector<1x16xf32> to vector<96x16xf32>
    %5 = arith.addf %2, %4 : vector<96x16xf32>
    %c0_5 = arith.constant 0 : index
    %c0_6 = arith.constant 0 : index
    %6 = vector.load %arg4[%c0_5, %c0_6] : memref<64x16xf32, #tpu.memory_space<vmem>>, vector<64x16xf32>
    %7 = arith.mulf %5, %5 : vector<96x16xf32>
    %cst_7 = arith.constant dense<0.000000e+00> : vector<96xf32>
    %8 = vector.multi_reduction <add>, %7, %cst_7 [1] : vector<96x16xf32> to vector<96xf32>
    %9 = vector.shape_cast %8 : vector<96xf32> to vector<96x1xf32>
    %cst_8 = arith.constant dense<0.000000e+00> : vector<96x64xf32>
    %10 = tpu.matmul %5, %6, %cst_8 {dimension_numbers = #tpu.dot_dimension_numbers<[1], [1], [0], [0], [0, 0, 1, 0], [], []>} : vector<96x16xf32>, vector<64x16xf32>, vector<96x64xf32> -> vector<96x64xf32>
    %cst_9 = arith.constant 2.000000e+00 : f32
    %11 = vector.broadcast %cst_9 : f32 to vector<96x64xf32>
    %12 = arith.mulf %11, %10 : vector<96x64xf32>
    %13 = vector.broadcast %9 : vector<96x1xf32> to vector<96x64xf32>
    %14 = arith.subf %13, %12 : vector<96x64xf32>
    %c0_10 = arith.constant 0 : index
    %c0_11 = arith.constant 0 : index
    %15 = vector.load %arg5[%c0_10, %c0_11] : memref<1x64xf32, #tpu.memory_space<vmem>>, vector<1x64xf32>
    %16 = vector.broadcast %15 : vector<1x64xf32> to vector<96x64xf32>
    %17 = arith.addf %14, %16 : vector<96x64xf32>
    %cst_12 = arith.constant dense<0x7F800000> : vector<96xf32>
    %18 = vector.multi_reduction <minimumf>, %17, %cst_12 [1] : vector<96x64xf32> to vector<96xf32>
    %19 = vector.shape_cast %18 : vector<96xf32> to vector<96x1xf32>
    %20 = tpu.iota {dimensions = array<i32: 1>} : vector<96x64xi32>
    %21 = vector.broadcast %19 : vector<96x1xf32> to vector<96x64xf32>
    %22 = arith.cmpf ole, %17, %21 : vector<96x64xf32>
    %c64_i32 = arith.constant 64 : i32
    %23 = vector.broadcast %c64_i32 : i32 to vector<96x64xi32>
    %24 = arith.select %22, %20, %23 : vector<96x64xi1>, vector<96x64xi32>
    %cst_13 = arith.constant dense<2147483647> : vector<96xi32>
    %25 = vector.multi_reduction <minsi>, %24, %cst_13 [1] : vector<96x64xi32> to vector<96xi32>
    %26 = vector.shape_cast %25 : vector<96xi32> to vector<96x1xi32>
    %27 = vector.broadcast %26 : vector<96x1xi32> to vector<96x64xi32>
    %28 = arith.cmpi eq, %20, %27 : vector<96x64xi32>
    %cst_14 = arith.constant 1.000000e+00 : f32
    %cst_15 = arith.constant 0.000000e+00 : f32
    %29 = vector.broadcast %cst_14 : f32 to vector<96x64xf32>
    %30 = vector.broadcast %cst_15 : f32 to vector<96x64xf32>
    %31 = arith.select %28, %29, %30 : vector<96x64xi1>, vector<96x64xf32>
    %cst_16 = arith.constant dense<0.000000e+00> : vector<96x16xf32>
    %32 = tpu.matmul %31, %6, %cst_16 {dimension_numbers = #tpu.dot_dimension_numbers<[1], [0], [0], [1], [0, 0, 1, 1], [], []>} : vector<96x64xf32>, vector<64x16xf32>, vector<96x16xf32> -> vector<96x16xf32>
    %33 = arith.subf %32, %5 : vector<96x16xf32>
    %34 = arith.mulf %33, %33 : vector<96x16xf32>
    %cst_17 = arith.constant dense<0.000000e+00> : vector<96xf32>
    %35 = vector.multi_reduction <add>, %34, %cst_17 [1] : vector<96x16xf32> to vector<96xf32>
    %36 = vector.shape_cast %35 : vector<96xf32> to vector<96x1xf32>
    %cst_18 = arith.constant dense<0.000000e+00> : vector<1xf32>
    %37 = vector.multi_reduction <add>, %36, %cst_18 [0] : vector<96x1xf32> to vector<1xf32>
    %38 = vector.shape_cast %37 : vector<1xf32> to vector<1x1xf32>
    %cst_19 = arith.constant 6.51041686E-4 : f32
    %39 = vector.broadcast %cst_19 : f32 to vector<1x1xf32>
    %40 = arith.mulf %38, %39 : vector<1x1xf32>
    %c0_20 = arith.constant 0 : index
    %c0_21 = arith.constant 0 : index
    %41 = vector.load %arg9[%c0_20, %c0_21] : memref<1x1xf32, #tpu.memory_space<vmem>>, vector<1x1xf32>
    tpu.vector_store %arg9[%c0_20, %c0_21], %40 {strides = array<i32>} : memref<1x1xf32, #tpu.memory_space<vmem>>, vector<1x1xf32>,
    %c0_22 = arith.constant 0 : index
    %c0_23 = arith.constant 0 : index
    %42 = vector.load %arg6[%c0_22, %c0_23] : memref<16x32xf32, #tpu.memory_space<vmem>>, vector<16x32xf32>
    %cst_24 = arith.constant dense<0.000000e+00> : vector<96x32xf32>
    %43 = tpu.matmul %32, %42, %cst_24 {dimension_numbers = #tpu.dot_dimension_numbers<[1], [0], [0], [1], [0, 0, 1, 1], [], []>} : vector<96x16xf32>, vector<16x32xf32>, vector<96x32xf32> -> vector<96x32xf32>
    %c0_25 = arith.constant 0 : index
    %c0_26 = arith.constant 0 : index
    %44 = vector.load %arg7[%c0_25, %c0_26] : memref<1x32xf32, #tpu.memory_space<vmem>>, vector<1x32xf32>
    %45 = vector.broadcast %44 : vector<1x32xf32> to vector<96x32xf32>
    %46 = arith.addf %43, %45 : vector<96x32xf32>
    %c0_27 = arith.constant 0 : index
    %c0_28 = arith.constant 0 : index
    %47 = vector.load %arg8[%c0_27, %c0_28] : memref<96x32xf32, #tpu.memory_space<vmem>>, vector<96x32xf32>
    tpu.vector_store %arg8[%c0_27, %c0_28], %46 {strides = array<i32>} : memref<96x32xf32, #tpu.memory_space<vmem>>, vector<96x32xf32>,
    return
  }
  func.func @transform_0(%arg0: i32) -> (i32, i32) {
    %c0_i32 = arith.constant 0 : i32
    %c0_i32_0 = arith.constant 0 : i32
    %c0_i32_1 = arith.constant 0 : i32
    return %c0_i32, %c0_i32_0 : i32, i32
  }
  func.func @transform_1(%arg0: i32) -> (i32, i32) {
    %c0_i32 = arith.constant 0 : i32
    %c0_i32_0 = arith.constant 0 : i32
    %c0_i32_1 = arith.constant 0 : i32
    return %c0_i32, %c0_i32_0 : i32, i32
  }
  func.func @transform_2(%arg0: i32) -> (i32, i32) {
    %c0_i32 = arith.constant 0 : i32
    %c0_i32_0 = arith.constant 0 : i32
    %c0_i32_1 = arith.constant 0 : i32
    return %c0_i32, %c0_i32_0 : i32, i32
  }
  func.func @transform_3(%arg0: i32) -> (i32, i32) {
    %c0_i32 = arith.constant 0 : i32
    %c0_i32_0 = arith.constant 0 : i32
    %c0_i32_1 = arith.constant 0 : i32
    return %c0_i32, %c0_i32_0 : i32, i32
  }
  func.func @transform_4(%arg0: i32) -> (i32, i32) {
    %c0_i32 = arith.constant 0 : i32
    %c0_i32_0 = arith.constant 0 : i32
    %c0_i32_1 = arith.constant 0 : i32
    return %c0_i32, %c0_i32_0 : i32, i32
  }
  func.func @transform_5(%arg0: i32) -> (i32, i32) {
    %c0_i32 = arith.constant 0 : i32
    %c0_i32_0 = arith.constant 0 : i32
    %c0_i32_1 = arith.constant 0 : i32
    return %c0_i32, %c0_i32_0 : i32, i32
  }
  func.func @transform_6(%arg0: i32) -> (i32, i32) {
    %c0_i32 = arith.constant 0 : i32
    %c0_i32_0 = arith.constant 0 : i32
    %c0_i32_1 = arith.constant 0 : i32
    return %c0_i32, %c0_i32_0 : i32, i32
  }
  func.func @transform_7(%arg0: i32) -> (i32, i32) {
    %c0_i32 = arith.constant 0 : i32
    %c0_i32_0 = arith.constant 0 : i32
    %c0_i32_1 = arith.constant 0 : i32
    return %c0_i32, %c0_i32_0 : i32, i32
  }
  func.func @transform_8(%arg0: i32) -> (i32, i32) {
    %c0_i32 = arith.constant 0 : i32
    %c0_i32_0 = arith.constant 0 : i32
    %c0_i32_1 = arith.constant 0 : i32
    return %c0_i32, %c0_i32_0 : i32, i32
  }
}

module attributes {stable_mosaic.version = 11 : i64} {
  func.func @_linear_kernel(%arg0: i32, %arg1: memref<64x32xf32, #tpu.memory_space<vmem>>, %arg2: memref<32x24xf32, #tpu.memory_space<vmem>>, %arg3: memref<1x24xf32, #tpu.memory_space<vmem>>, %arg4: memref<64x24xf32, #tpu.memory_space<vmem>>) attributes {dimension_semantics = [#tpu.dimension_semantics<arbitrary>], iteration_bounds = array<i64: 1>, scalar_prefetch = 0 : i64, scratch_operands = 0 : i64, tpu.core_type = #tpu.core_type<tc>, window_params = [{pipeline_mode = #tpu.pipeline_mode<synchronous>, transform_indices = @transform_0, window_bounds = array<i64: 64, 32>}, {pipeline_mode = #tpu.pipeline_mode<synchronous>, transform_indices = @transform_1, window_bounds = array<i64: 32, 24>}, {pipeline_mode = #tpu.pipeline_mode<synchronous>, transform_indices = @transform_2, window_bounds = array<i64: 1, 24>}, {pipeline_mode = #tpu.pipeline_mode<synchronous>, transform_indices = @transform_3, window_bounds = array<i64: 64, 24>}]} {
    %c0 = arith.constant 0 : index
    %c0_0 = arith.constant 0 : index
    %0 = vector.load %arg1[%c0, %c0_0] : memref<64x32xf32, #tpu.memory_space<vmem>>, vector<64x32xf32>
    %c0_1 = arith.constant 0 : index
    %c0_2 = arith.constant 0 : index
    %1 = vector.load %arg2[%c0_1, %c0_2] : memref<32x24xf32, #tpu.memory_space<vmem>>, vector<32x24xf32>
    %cst = arith.constant dense<0.000000e+00> : vector<64x24xf32>
    %2 = tpu.matmul %0, %1, %cst {dimension_numbers = #tpu.dot_dimension_numbers<[1], [0], [0], [1], [0, 0, 1, 1], [], []>} : vector<64x32xf32>, vector<32x24xf32>, vector<64x24xf32> -> vector<64x24xf32>
    %c0_3 = arith.constant 0 : index
    %c0_4 = arith.constant 0 : index
    %3 = vector.load %arg3[%c0_3, %c0_4] : memref<1x24xf32, #tpu.memory_space<vmem>>, vector<1x24xf32>
    %4 = vector.broadcast %3 : vector<1x24xf32> to vector<64x24xf32>
    %5 = arith.addf %2, %4 : vector<64x24xf32>
    %c0_5 = arith.constant 0 : index
    %c0_6 = arith.constant 0 : index
    %6 = vector.load %arg4[%c0_5, %c0_6] : memref<64x24xf32, #tpu.memory_space<vmem>>, vector<64x24xf32>
    tpu.vector_store %arg4[%c0_5, %c0_6], %5 {strides = array<i32>} : memref<64x24xf32, #tpu.memory_space<vmem>>, vector<64x24xf32>,
    return
  }
  func.func @transform_0(%arg0: i32) -> (i32, i32) {
    %c0_i32 = arith.constant 0 : i32
    %c0_i32_0 = arith.constant 0 : i32
    %c0_i32_1 = arith.constant 0 : i32
    return %c0_i32, %c0_i32_0 : i32, i32
  }
  func.func @transform_1(%arg0: i32) -> (i32, i32) {
    %c0_i32 = arith.constant 0 : i32
    %c0_i32_0 = arith.constant 0 : i32
    %c0_i32_1 = arith.constant 0 : i32
    return %c0_i32, %c0_i32_0 : i32, i32
  }
  func.func @transform_2(%arg0: i32) -> (i32, i32) {
    %c0_i32 = arith.constant 0 : i32
    %c0_i32_0 = arith.constant 0 : i32
    %c0_i32_1 = arith.constant 0 : i32
    return %c0_i32, %c0_i32_0 : i32, i32
  }
  func.func @transform_3(%arg0: i32) -> (i32, i32) {
    %c0_i32 = arith.constant 0 : i32
    %c0_i32_0 = arith.constant 0 : i32
    %c0_i32_1 = arith.constant 0 : i32
    return %c0_i32, %c0_i32_0 : i32, i32
  }
}

module attributes {stable_mosaic.version = 11 : i64} {
  func.func @_linear_kernel(%arg0: i32, %arg1: memref<32x32xf32, #tpu.memory_space<vmem>>, %arg2: memref<32x12xf32, #tpu.memory_space<vmem>>, %arg3: memref<1x12xf32, #tpu.memory_space<vmem>>, %arg4: memref<32x12xf32, #tpu.memory_space<vmem>>) attributes {dimension_semantics = [#tpu.dimension_semantics<arbitrary>], iteration_bounds = array<i64: 1>, scalar_prefetch = 0 : i64, scratch_operands = 0 : i64, tpu.core_type = #tpu.core_type<tc>, window_params = [{pipeline_mode = #tpu.pipeline_mode<synchronous>, transform_indices = @transform_0, window_bounds = array<i64: 32, 32>}, {pipeline_mode = #tpu.pipeline_mode<synchronous>, transform_indices = @transform_1, window_bounds = array<i64: 32, 12>}, {pipeline_mode = #tpu.pipeline_mode<synchronous>, transform_indices = @transform_2, window_bounds = array<i64: 1, 12>}, {pipeline_mode = #tpu.pipeline_mode<synchronous>, transform_indices = @transform_3, window_bounds = array<i64: 32, 12>}]} {
    %c0 = arith.constant 0 : index
    %c0_0 = arith.constant 0 : index
    %0 = vector.load %arg1[%c0, %c0_0] : memref<32x32xf32, #tpu.memory_space<vmem>>, vector<32x32xf32>
    %c0_1 = arith.constant 0 : index
    %c0_2 = arith.constant 0 : index
    %1 = vector.load %arg2[%c0_1, %c0_2] : memref<32x12xf32, #tpu.memory_space<vmem>>, vector<32x12xf32>
    %cst = arith.constant dense<0.000000e+00> : vector<32x12xf32>
    %2 = tpu.matmul %0, %1, %cst {dimension_numbers = #tpu.dot_dimension_numbers<[1], [0], [0], [1], [0, 0, 1, 1], [], []>} : vector<32x32xf32>, vector<32x12xf32>, vector<32x12xf32> -> vector<32x12xf32>
    %c0_3 = arith.constant 0 : index
    %c0_4 = arith.constant 0 : index
    %3 = vector.load %arg3[%c0_3, %c0_4] : memref<1x12xf32, #tpu.memory_space<vmem>>, vector<1x12xf32>
    %4 = vector.broadcast %3 : vector<1x12xf32> to vector<32x12xf32>
    %5 = arith.addf %2, %4 : vector<32x12xf32>
    %c0_5 = arith.constant 0 : index
    %c0_6 = arith.constant 0 : index
    %6 = vector.load %arg4[%c0_5, %c0_6] : memref<32x12xf32, #tpu.memory_space<vmem>>, vector<32x12xf32>
    tpu.vector_store %arg4[%c0_5, %c0_6], %5 {strides = array<i32>} : memref<32x12xf32, #tpu.memory_space<vmem>>, vector<32x12xf32>,
    return
  }
  func.func @transform_0(%arg0: i32) -> (i32, i32) {
    %c0_i32 = arith.constant 0 : i32
    %c0_i32_0 = arith.constant 0 : i32
    %c0_i32_1 = arith.constant 0 : i32
    return %c0_i32, %c0_i32_0 : i32, i32
  }
  func.func @transform_1(%arg0: i32) -> (i32, i32) {
    %c0_i32 = arith.constant 0 : i32
    %c0_i32_0 = arith.constant 0 : i32
    %c0_i32_1 = arith.constant 0 : i32
    return %c0_i32, %c0_i32_0 : i32, i32
  }
  func.func @transform_2(%arg0: i32) -> (i32, i32) {
    %c0_i32 = arith.constant 0 : i32
    %c0_i32_0 = arith.constant 0 : i32
    %c0_i32_1 = arith.constant 0 : i32
    return %c0_i32, %c0_i32_0 : i32, i32
  }
  func.func @transform_3(%arg0: i32) -> (i32, i32) {
    %c0_i32 = arith.constant 0 : i32
    %c0_i32_0 = arith.constant 0 : i32
    %c0_i32_1 = arith.constant 0 : i32
    return %c0_i32, %c0_i32_0 : i32, i32
  }
}

</mosaic_0001>

<bundles_post_ra>
// kernel: eq.29
= control target key start
LH: loop header
LB: loop body
LE: loop exit
PB: predicated region body
PF: predicated region fallthrough
CT: control target
= control target key end

     0   :  { %vm8_vm0 = vcmask 130048   ;;  %s33_s8 = smov 16   ;;  %vm14_vm1 = vcmask 392448   ;;  %vm20_vm2 = vcmask 261248   ;;  %s50_s0 = inlined_call_operand.vmem [shape: s32[3,16], index: 0, kind: input, shape index: {}]   ;;  %s51_s1 = inlined_call_operand.vmem [shape: s32[48], index: 1, kind: output, shape index: {}]  }
   0x1   :  { %v5_v0 = vld [vmem:[%s50_s0] sm:$0xf]  ;;  %s32_s0 = smov 32  }
   0x2   :  { %6 = vst [vmem:[#allocation1] sm:$0xf] %v5_v0 }
   0x9   :  { %v11_v1 = vld [vmem:[#allocation1 + $0x2] sm:$0x1]   ;;  %v7_v2 = vld [vmem:[#allocation1] sm:$0x1]   ;;  %v17_v3 = vld [vmem:[#allocation1 + $0x1] sm:$0x1]  }
   0xa   :  { %12 = vrot.lane.b32.xlu0 %v11_v1, %s32_s0  ;;  %9 = vst.msk [vmem:[#allocation0] sm:$0x1] %vm8_vm0, %v7_v2  }
   0xe   :  { %18 = vrot.lane.b32.xlu0 %v17_v3, %s33_s8 }
  0x7c   :  { %v13_v4 = vpop.permute.xlu0 %12  }
  0x7d   :  { %15 = vst.msk [vmem:[#allocation0] sm:$0x1] %vm14_vm1, %v13_v4  }
  0x80   :  { %v19_v5 = vpop.permute.xlu0 %18  }
  0x81   :  { %21 = vst.msk [vmem:[#allocation0] sm:$0x1] %vm20_vm2, %v19_v5  }
  0x88   :  { %v26_v6 = vld [vmem:[#allocation0] sm:$0x1] }
  0x89   :  { %29 = vst [vmem:[%s51_s1] sm:$0x1] %v26_v6 }

// kernel: vivit_forward.10
= control target key start
LH: loop header
LB: loop body
LE: loop exit
PB: predicated region body
PF: predicated region fallthrough
CT: control target
= control target key end

     0   :  { %vm32_vm0 = vcmask 195584   ;;  %vm162_vm1 = vcmask 261120   ;;  %s315_s1 = inlined_call_operand.vmem [shape: f32[24,32], index: 1, kind: input, shape index: {}]   ;;  %s316_s0 = inlined_call_operand.vmem [shape: f32[64,24], index: 0, kind: input, shape index: {}]   ;;  %s317_s2 = inlined_call_operand.vmem [shape: f32[1,32], index: 2, kind: input, shape index: {}]   ;;  %s318_s3 = inlined_call_operand.vmem [shape: f32[64,32], index: 3, kind: output, shape index: {}]  }
   0x1   :  { %v24_v0 = vld [vmem:[%s315_s1 + $0x10] sm:$0xff]  ;;  %v23_v1 = vld [vmem:[%s315_s1 + $0x8] sm:$0xff]  ;;  %v22_v2 = vld [vmem:[%s315_s1] sm:$0xff] }
   0x2   :  { %195 = vmatprep.subr.mxu0 %v24_v0  ;;  %213 = vmatprep.subr.mxu1 %v24_v0  ;;  %v14_v3 = vld [vmem:[%s316_s0] sm:$0xff]  ;;  %v15_v5 = vld [vmem:[%s316_s0 + $0x8] sm:$0xff]  ;;  %v16_v7 = vld [vmem:[%s316_s0 + $0x10] sm:$0xff] }
   0x3   :  { %196 = vmatpush3.msra.mxu0 %v24_v0  ;;  %216 = vmatpush3.msra.mxu1 %v24_v0  ;;  %v18_v4 = vld [vmem:[%s316_s0 + $0x20] sm:$0xff]  ;;  %v19_v6 = vld [vmem:[%s316_s0 + $0x28] sm:$0xff]  ;;  %v20_v8 = vld [vmem:[%s316_s0 + $0x30] sm:$0xff] }
   0x4   :  { %197 = vmatprep.subr.mxu0 %v23_v1  ;;  %214 = vmatprep.subr.mxu1 %v23_v1  ;;  %v17_v9 = vld [vmem:[%s316_s0 + $0x18] sm:$0xff]  ;;  %v175_v11 = vld [vmem:[%s317_s2] ss:$0 sm:$0xff] }
   0x5   :  { %198 = vmatpush3.msra.mxu0 %v23_v1  ;;  %217 = vmatpush3.msra.mxu1 %v23_v1  ;;  %v21_v10 = vld [vmem:[%s316_s0 + $0x38] sm:$0xff] }
   0x6   :  { %199 = vmatprep.subr.mxu0 %v22_v2  ;;  %215 = vmatprep.subr.mxu1 %v22_v2 }
   0x7   :  { %200 = vmatpush3.msra.mxu0 %v22_v2  ;;  %218 = vmatpush3.msra.mxu1 %v22_v2 }
   0x8   :  { %201 = vmatprep.mubr.msk.f32.mxu0 %vm32_vm0, %v14_v3  ;;  %207 = vmatprep.mubr.msk.f32.mxu1 %vm32_vm0, %v18_v4 }
   0x9   :  { %202 = vmatmul.mubr.msk.f32.vlgmr.msra.gmra.mxu0 %vm32_vm0, %v15_v5  ;;  %208 = vmatmul.mubr.msk.f32.vlgmr.msra.gmra.mxu1 %vm32_vm0, %v19_v6 }
   0xa   :  { %204 = vmatprep.mubr.msk.f32.mxu0 %vm32_vm0, %v16_v7  ;;  %210 = vmatprep.mubr.msk.f32.mxu1 %vm32_vm0, %v20_v8 }
   0xd   :  { %205 = vmatmul.mubr.msk.f32.gmra.mxu0 %vm32_vm0, %v17_v9  ;;  %211 = vmatmul.mubr.msk.f32.gmra.mxu1 %vm32_vm0, %v21_v10 }
  0xc9   :  { %v203_v12 = vpop.f32.mrf.mxu0  ;;  %v209_v13 = vpop.f32.mrf.mxu1 }
  0xca   :  { %v129_v14 = vadd.f32 %v203_v12, %v175_v11  ;;  %v149_v15 = vadd.f32 %v209_v13, %v175_v11 }
  0xcb   :  { %v123_v16 = vpop.f32.mrf.mxu0  ;;  %v143_v17 = vpop.f32.mrf.mxu1 }
  0xcc   :  { %164 = vst.msk [vmem:[%s318_s3 + $0x8] sm:$0xff] %vm162_vm1, %v129_v14  ;;  %168 = vst.msk [vmem:[%s318_s3 + $0x28] sm:$0xff] %vm162_vm1, %v149_v15  ;;  %v124_v18 = vadd.f32 %v175_v11, %v123_v16  ;;  %v144_v19 = vadd.f32 %v175_v11, %v143_v17 }
  0xcd   :  { %v206_v20 = vpop.f32.mrf.mxu0  ;;  %v212_v21 = vpop.f32.mrf.mxu1 }
  0xce   :  { %163 = vst.msk [vmem:[%s318_s3] sm:$0xff] %vm162_vm1, %v124_v18  ;;  %167 = vst.msk [vmem:[%s318_s3 + $0x20] sm:$0xff] %vm162_vm1, %v144_v19  ;;  %v139_v22 = vadd.f32 %v206_v20, %v175_v11  ;;  %v159_v23 = vadd.f32 %v212_v21, %v175_v11 }
  0xcf   :  { %v133_v24 = vpop.f32.mrf.mxu0  ;;  %v153_v25 = vpop.f32.mrf.mxu1 }
  0xd0   :  { %166 = vst.msk [vmem:[%s318_s3 + $0x18] sm:$0xff] %vm162_vm1, %v139_v22  ;;  %170 = vst.msk [vmem:[%s318_s3 + $0x38] sm:$0xff] %vm162_vm1, %v159_v23  ;;  %v134_v26 = vadd.f32 %v175_v11, %v133_v24  ;;  %v154_v27 = vadd.f32 %v175_v11, %v153_v25 }
  0xd2   :  { %165 = vst.msk [vmem:[%s318_s3 + $0x10] sm:$0xff] %vm162_vm1, %v134_v26  ;;  %169 = vst.msk [vmem:[%s318_s3 + $0x30] sm:$0xff] %vm162_vm1, %v154_v27 }

// kernel: vivit_forward.9
= control target key start
LH: loop header
LB: loop body
LE: loop exit
PB: predicated region body
PF: predicated region fallthrough
CT: control target
= control target key end

     0   :  { %vm40_vm0 = vcmask 1043456   ;;  %vm27_vm1 = vcmask 97280   ;;  %vm129_vm2 = vcmask 261120   ;;  %s217_s1 = inlined_call_operand.vmem [shape: f32[12,32], index: 1, kind: input, shape index: {}]   ;;  %s218_s0 = inlined_call_operand.vmem [shape: f32[32,12], index: 0, kind: input, shape index: {}]   ;;  %s219_s2 = inlined_call_operand.vmem [shape: f32[1,32], index: 2, kind: input, shape index: {}]   ;;  %s220_s3 = inlined_call_operand.vmem [shape: f32[32,32], index: 3, kind: output, shape index: {}]  }
   0x1   :  { %v19_v0 = vld [vmem:[%s217_s1 + $0x8] sm:$0xf]  ;;  %v18_v1 = vld [vmem:[%s217_s1] sm:$0xff]  ;;  %v16_v3 = vld [vmem:[%s218_s0 + $0x10] sm:$0xff] }
   0x2   :  { %150 = vmatprep.subr.msk.mxu0 %vm40_vm0, %v19_v0  ;;  %160 = vmatprep.subr.msk.mxu1 %vm40_vm0, %v19_v0  ;;  %v14_v2 = vld [vmem:[%s218_s0] sm:$0xff]  ;;  %v15_v4 = vld [vmem:[%s218_s0 + $0x8] sm:$0xff]  ;;  %v17_v5 = vld [vmem:[%s218_s0 + $0x18] sm:$0xff] }
   0x3   :  { %151 = vmatpush3.msk.msra.mxu0 %vm40_vm0, %v19_v0  ;;  %162 = vmatpush3.msk.msra.mxu1 %vm40_vm0, %v19_v0  ;;  %v138_v6 = vld [vmem:[%s219_s2] ss:$0 sm:$0xff] }
   0x4   :  { %152 = vmatprep.subr.mxu0 %v18_v1  ;;  %161 = vmatprep.subr.mxu1 %v18_v1 }
   0x5   :  { %153 = vmatpush3.msra.mxu0 %v18_v1  ;;  %163 = vmatpush3.msra.mxu1 %v18_v1 }
   0x6   :  { %154 = vmatprep.mubr.msk.f32.mxu0 %vm27_vm1, %v14_v2  ;;  %157 = vmatprep.mubr.msk.f32.mxu1 %vm27_vm1, %v16_v3 }
   0x7   :  { %155 = vmatmul.mubr.msk.f32.vlgmr.msra.gmra.mxu0 %vm27_vm1, %v15_v4  ;;  %158 = vmatmul.mubr.msk.f32.vlgmr.msra.gmra.mxu1 %vm27_vm1, %v17_v5 }
  0xc7   :  { %v156_v7 = vpop.f32.mrf.mxu0  ;;  %v159_v8 = vpop.f32.mrf.mxu1 }
  0xc8   :  { %v116_v9 = vadd.f32 %v156_v7, %v138_v6  ;;  %v126_v10 = vadd.f32 %v159_v8, %v138_v6 }
  0xc9   :  { %v110_v11 = vpop.f32.mrf.mxu0  ;;  %v120_v12 = vpop.f32.mrf.mxu1 }
  0xca   :  { %131 = vst.msk [vmem:[%s220_s3 + $0x8] sm:$0xff] %vm129_vm2, %v116_v9  ;;  %133 = vst.msk [vmem:[%s220_s3 + $0x18] sm:$0xff] %vm129_vm2, %v126_v10  ;;  %v111_v13 = vadd.f32 %v138_v6, %v110_v11  ;;  %v121_v14 = vadd.f32 %v138_v6, %v120_v12 }
  0xcc   :  { %130 = vst.msk [vmem:[%s220_s3] sm:$0xff] %vm129_vm2, %v111_v13  ;;  %132 = vst.msk [vmem:[%s220_s3 + $0x10] sm:$0xff] %vm129_vm2, %v121_v14 }

// kernel: le.15
= control target key start
LH: loop header
LB: loop body
LE: loop exit
PB: predicated region body
PF: predicated region fallthrough
CT: control target
= control target key end

     0   :  { %s133_s10 = smov 45   ;;  %s134_s11 = smov 39   ;;  %vm3_vm0 = vcmask 23552   ;;  %vm9_vm1 = vcmask 392552   ;;  %vm15_vm2 = vcmask 367952   ;;  %vm21_vm3 = vcmask 343352   ;;  %s209_s0 = inlined_call_operand.vmem [shape: s32[16,3], index: 0, kind: input, shape index: {}]   ;;  %s210_s1 = inlined_call_operand.vmem [shape: s32[48], index: 1, kind: output, shape index: {}]  }
   0x1   :  { %v103_v0 = vld [vmem:[%s209_s0 + $0xf] sm:$0x1]   ;;  %v105_v1 = vld [vmem:[%s209_s0 + $0xd] sm:$0x1]   ;;  %v104_v2 = vld [vmem:[%s209_s0 + $0xe] sm:$0x1]  }
   0x2   :  { %7 = vrot.lane.b32.xlu0 %v103_v0, %s133_s10  ;;  %19 = vrot.lane.b32.xlu1 %v105_v1, %s134_s11  ;;  %v106_v3 = vld [vmem:[%s209_s0 + $0xc] sm:$0x1]   ;;  %s135_s16 = smov 42   ;;  %s136_s17 = smov 36   ;;  %v107_v4 = vld [vmem:[%s209_s0 + $0xb] sm:$0x1]  }
   0x3   :  { %v108_v5 = vld [vmem:[%s209_s0 + $0xa] sm:$0x1]   ;;  %v2_v6 = vld [vmem:[%s209_s0] sm:$0x1]   ;;  %s137_s24 = smov 33   ;;  %s138_s25 = smov 30  }
   0x4   :  { %4 = vst.msk [vmem:[#allocation0] sm:$0x1] %vm3_vm0, %v2_v6   ;;  %v109_v7 = vld [vmem:[%s209_s0 + $0x9] sm:$0x1]   ;;  %v110_v8 = vld [vmem:[%s209_s0 + $0x8] sm:$0x1]  }
   0x5   :  { %s139_s30 = smov 27   ;;  %s140_s2 = smov 24   ;;  %v111_v9 = vld [vmem:[%s209_s0 + $0x7] sm:$0x1]   ;;  %v112_v10 = vld [vmem:[%s209_s0 + $0x6] sm:$0x1]  }
   0x6   :  { %13 = vrot.lane.b32.xlu0 %v104_v2, %s135_s16  ;;  %25 = vrot.lane.b32.xlu1 %v106_v3, %s136_s17  ;;  %s141_s7 = smov 21   ;;  %s142_s8 = smov 18   ;;  %v113_v11 = vld [vmem:[%s209_s0 + $0x5] sm:$0x1]   ;;  %v114_v12 = vld [vmem:[%s209_s0 + $0x4] sm:$0x1]  }
   0x7   :  { %s143_s13 = smov 15   ;;  %s144_s14 = smov 12   ;;  %v115_v13 = vld [vmem:[%s209_s0 + $0x3] sm:$0x1]   ;;  %v116_v14 = vld [vmem:[%s209_s0 + $0x2] sm:$0x1]  }
   0x8   :  { %s145_s19 = smov 9   ;;  %s146_s20 = smov 6   ;;  %v117_v15 = vld [vmem:[%s209_s0 + $0x1] sm:$0x1]   ;;  %vm27_vm4 = vcmask 318752   ;;  %vm33_vm5 = vcmask 294152  }
   0x9   :  { %s147_s0 = smov 3   ;;  %vm39_vm6 = vcmask 269552   ;;  %vm45_vm7 = vcmask 244952   ;;  %vm51_vm8 = vcmask 220352   ;;  %vm57_vm9 = vcmask 195752  }
   0xa   :  { %31 = vrot.lane.b32.xlu0 %v107_v4, %s137_s24  ;;  %37 = vrot.lane.b32.xlu1 %v108_v5, %s138_s25  ;;  %vm63_vm10 = vcmask 171152   ;;  %vm69_vm11 = vcmask 146552   ;;  %vm75_vm12 = vcmask 121952   ;;  %vm81_vm13 = vcmask 97352  }
   0xb   :  { %vm87_vm14 = vcmask 72752   ;;  %vm93_vm15 = vcmask 48152  }
   0xe   :  { %43 = vrot.lane.b32.xlu0 %v109_v7, %s139_s30  ;;  %49 = vrot.lane.b32.xlu1 %v110_v8, %s140_s2 }
  0x12   :  { %55 = vrot.lane.b32.xlu0 %v111_v9, %s141_s7  ;;  %61 = vrot.lane.b32.xlu1 %v112_v10, %s142_s8 }
  0x16   :  { %67 = vrot.lane.b32.xlu0 %v113_v11, %s143_s13  ;;  %73 = vrot.lane.b32.xlu1 %v114_v12, %s144_s14 }
  0x1a   :  { %79 = vrot.lane.b32.xlu0 %v115_v13, %s145_s19  ;;  %85 = vrot.lane.b32.xlu1 %v116_v14, %s146_s20 }
  0x1e   :  { %91 = vrot.lane.b32.xlu0 %v117_v15, %s147_s0 }
  0x74   :  { %v8_v16 = vpop.permute.xlu0 %7   ;;  %v20_v17 = vpop.permute.xlu1 %19  }
  0x75   :  { %10 = vst.msk [vmem:[#allocation0] sm:$0x1] %vm9_vm1, %v8_v16  }
  0x78   :  { %v14_v18 = vpop.permute.xlu0 %13   ;;  %v26_v19 = vpop.permute.xlu1 %25  }
  0x79   :  { %16 = vst.msk [vmem:[#allocation0] sm:$0x1] %vm15_vm2, %v14_v18  }
  0x7a   :  { %22 = vst.msk [vmem:[#allocation0] sm:$0x1] %vm21_vm3, %v20_v17  }
  0x7b   :  { %28 = vst.msk [vmem:[#allocation0] sm:$0x1] %vm27_vm4, %v26_v19  }
  0x7c   :  { %v32_v20 = vpop.permute.xlu0 %31   ;;  %v38_v21 = vpop.permute.xlu1 %37  }
  0x7d   :  { %34 = vst.msk [vmem:[#allocation0] sm:$0x1] %vm33_vm5, %v32_v20  }
  0x7e   :  { %40 = vst.msk [vmem:[#allocation0] sm:$0x1] %vm39_vm6, %v38_v21  }
  0x80   :  { %v44_v22 = vpop.permute.xlu0 %43   ;;  %v50_v23 = vpop.permute.xlu1 %49  }
  0x81   :  { %46 = vst.msk [vmem:[#allocation0] sm:$0x1] %vm45_vm7, %v44_v22  }
  0x82   :  { %52 = vst.msk [vmem:[#allocation0] sm:$0x1] %vm51_vm8, %v50_v23  }
  0x84   :  { %v56_v24 = vpop.permute.xlu0 %55   ;;  %v62_v25 = vpop.permute.xlu1 %61  }
  0x85   :  { %58 = vst.msk [vmem:[#allocation0] sm:$0x1] %vm57_vm9, %v56_v24  }
  0x86   :  { %64 = vst.msk [vmem:[#allocation0] sm:$0x1] %vm63_vm10, %v62_v25  }
  0x88   :  { %v68_v26 = vpop.permute.xlu0 %67   ;;  %v74_v27 = vpop.permute.xlu1 %73  }
  0x89   :  { %70 = vst.msk [vmem:[#allocation0] sm:$0x1] %vm69_vm11, %v68_v26  }
  0x8a   :  { %76 = vst.msk [vmem:[#allocation0] sm:$0x1] %vm75_vm12, %v74_v27  }
  0x8c   :  { %v80_v28 = vpop.permute.xlu0 %79   ;;  %v86_v29 = vpop.permute.xlu1 %85  }
  0x8d   :  { %82 = vst.msk [vmem:[#allocation0] sm:$0x1] %vm81_vm13, %v80_v28  }
  0x8e   :  { %88 = vst.msk [vmem:[#allocation0] sm:$0x1] %vm87_vm14, %v86_v29  }
  0x90   :  { %v92_v30 = vpop.permute.xlu0 %91  }
  0x91   :  { %94 = vst.msk [vmem:[#allocation0] sm:$0x1] %vm93_vm15, %v92_v30  }
  0x98   :  { %v99_v31 = vld [vmem:[#allocation0] sm:$0x1] }
  0x99   :  { %102 = vst [vmem:[%s210_s1] sm:$0x1] %v99_v31 }

// kernel: vivit_forward.16
= control target key start
LH: loop header
LB: loop body
LE: loop exit
PB: predicated region body
PF: predicated region fallthrough
CT: control target
= control target key end

     0   :  { %vm33_vm0 = vcmask 261120   ;;  %vm163_vm1 = vcmask 195584   ;;  %s324_s1 = inlined_call_operand.vmem [shape: f32[32,24], index: 1, kind: input, shape index: {}]   ;;  %s325_s0 = inlined_call_operand.vmem [shape: f32[64,32], index: 0, kind: input, shape index: {}]   ;;  %s326_s2 = inlined_call_operand.vmem [shape: f32[1,24], index: 2, kind: input, shape index: {}]   ;;  %s327_s3 = inlined_call_operand.vmem [shape: f32[64,24], index: 3, kind: output, shape index: {}]  }
   0x1   :  { %v25_v0 = vld [vmem:[%s324_s1 + $0x18] sm:$0xff]  ;;  %v24_v1 = vld [vmem:[%s324_s1 + $0x10] sm:$0xff]  ;;  %v23_v2 = vld [vmem:[%s324_s1 + $0x8] sm:$0xff] }
   0x2   :  { %197 = vmatprep.subr.mxu0 %v25_v0  ;;  %217 = vmatprep.subr.mxu1 %v25_v0  ;;  %v22_v3 = vld [vmem:[%s324_s1] sm:$0xff]  ;;  %v15_v6 = vld [vmem:[%s325_s0 + $0x8] sm:$0xff]  ;;  %v16_v8 = vld [vmem:[%s325_s0 + $0x10] sm:$0xff] }
   0x3   :  { %198 = vmatpush3.msra.mxu0 %v25_v0  ;;  %221 = vmatpush3.msra.mxu1 %v25_v0  ;;  %v14_v4 = vld [vmem:[%s325_s0] sm:$0xff]  ;;  %v19_v7 = vld [vmem:[%s325_s0 + $0x28] sm:$0xff]  ;;  %v20_v9 = vld [vmem:[%s325_s0 + $0x30] sm:$0xff] }
   0x4   :  { %199 = vmatprep.subr.mxu0 %v24_v1  ;;  %218 = vmatprep.subr.mxu1 %v24_v1  ;;  %v18_v5 = vld [vmem:[%s325_s0 + $0x20] sm:$0xff]  ;;  %v17_v10 = vld [vmem:[%s325_s0 + $0x18] sm:$0xff] }
   0x5   :  { %200 = vmatpush3.msra.mxu0 %v24_v1  ;;  %222 = vmatpush3.msra.mxu1 %v24_v1  ;;  %v21_v11 = vld [vmem:[%s325_s0 + $0x38] sm:$0xff]  ;;  %v176_v12 = vld [vmem:[%s326_s2] ss:$0 sm:$0xff] }
   0x6   :  { %201 = vmatprep.subr.mxu0 %v23_v2  ;;  %219 = vmatprep.subr.mxu1 %v23_v2 }
   0x7   :  { %202 = vmatpush3.msra.mxu0 %v23_v2  ;;  %223 = vmatpush3.msra.mxu1 %v23_v2 }
   0x8   :  { %203 = vmatprep.subr.mxu0 %v22_v3  ;;  %220 = vmatprep.subr.mxu1 %v22_v3 }
   0x9   :  { %204 = vmatpush3.msra.mxu0 %v22_v3  ;;  %224 = vmatpush3.msra.mxu1 %v22_v3 }
   0xa   :  { %205 = vmatprep.mubr.msk.f32.mxu0 %vm33_vm0, %v14_v4  ;;  %211 = vmatprep.mubr.msk.f32.mxu1 %vm33_vm0, %v18_v5 }
   0xb   :  { %206 = vmatmul.mubr.msk.f32.vlgmr.msra.gmra.mxu0 %vm33_vm0, %v15_v6  ;;  %212 = vmatmul.mubr.msk.f32.vlgmr.msra.gmra.mxu1 %vm33_vm0, %v19_v7 }
   0xc   :  { %208 = vmatprep.mubr.msk.f32.mxu0 %vm33_vm0, %v16_v8  ;;  %214 = vmatprep.mubr.msk.f32.mxu1 %vm33_vm0, %v20_v9 }
   0xf   :  { %209 = vmatmul.mubr.msk.f32.gmra.mxu0 %vm33_vm0, %v17_v10  ;;  %215 = vmatmul.mubr.msk.f32.gmra.mxu1 %vm33_vm0, %v21_v11 }
  0xcb   :  { %v207_v13 = vpop.f32.mrf.mxu0  ;;  %v213_v14 = vpop.f32.mrf.mxu1 }
  0xcc   :  { %v130_v15 = vadd.f32 %v207_v13, %v176_v12  ;;  %v150_v16 = vadd.f32 %v213_v14, %v176_v12 }
  0xcd   :  { %v124_v17 = vpop.f32.mrf.mxu0  ;;  %v144_v18 = vpop.f32.mrf.mxu1 }
  0xce   :  { %165 = vst.msk [vmem:[%s327_s3 + $0x8] sm:$0xff] %vm163_vm1, %v130_v15  ;;  %169 = vst.msk [vmem:[%s327_s3 + $0x28] sm:$0xff] %vm163_vm1, %v150_v16  ;;  %v125_v19 = vadd.f32 %v176_v12, %v124_v17  ;;  %v145_v20 = vadd.f32 %v176_v12, %v144_v18 }
  0xcf   :  { %v210_v21 = vpop.f32.mrf.mxu0  ;;  %v216_v22 = vpop.f32.mrf.mxu1 }
  0xd0   :  { %164 = vst.msk [vmem:[%s327_s3] sm:$0xff] %vm163_vm1, %v125_v19  ;;  %168 = vst.msk [vmem:[%s327_s3 + $0x20] sm:$0xff] %vm163_vm1, %v145_v20  ;;  %v140_v23 = vadd.f32 %v210_v21, %v176_v12  ;;  %v160_v24 = vadd.f32 %v216_v22, %v176_v12 }
  0xd1   :  { %v134_v25 = vpop.f32.mrf.mxu0  ;;  %v154_v26 = vpop.f32.mrf.mxu1 }
  0xd2   :  { %167 = vst.msk [vmem:[%s327_s3 + $0x18] sm:$0xff] %vm163_vm1, %v140_v23  ;;  %171 = vst.msk [vmem:[%s327_s3 + $0x38] sm:$0xff] %vm163_vm1, %v160_v24  ;;  %v135_v27 = vadd.f32 %v176_v12, %v134_v25  ;;  %v155_v28 = vadd.f32 %v176_v12, %v154_v26 }
  0xd4   :  { %166 = vst.msk [vmem:[%s327_s3 + $0x10] sm:$0xff] %vm163_vm1, %v135_v27  ;;  %170 = vst.msk [vmem:[%s327_s3 + $0x30] sm:$0xff] %vm163_vm1, %v155_v28 }

// kernel: vivit_forward.13
= control target key start
LH: loop header
LB: loop body
LE: loop exit
PB: predicated region body
PF: predicated region fallthrough
CT: control target
= control target key end

     0   :  { %vm52_vm0 = vcmask 261120   ;;  %vm234_vm1 = vcmask 130048   ;;  %s2089_s0 = inlined_call_operand.vmem [shape: f32[96,32], index: 0, kind: input, shape index: {}]   ;;  %s2090_s1 = inlined_call_operand.vmem [shape: f32[32,16], index: 1, kind: input, shape index: {}]   ;;  %s2091_s2 = inlined_call_operand.vmem [shape: f32[1,16], index: 2, kind: input, shape index: {}]   ;;  %s2092_s3 = inlined_call_operand.vmem [shape: f32[64,16], index: 3, kind: input, shape index: {}]   ;;  %s2093_s4 = inlined_call_operand.vmem [shape: f32[1,64], index: 4, kind: input, shape index: {}]   ;;  %s2094_s5 = inlined_call_operand.vmem [shape: f32[16,32], index: 5, kind: input, shape index: {}]   ;;  %s2095_s6 = inlined_call_operand.vmem [shape: f32[1,32], index: 6, kind: input, shape index: {}]   ;;  %s2096_s7 = inlined_call_operand.vmem [shape: f32[96,32], index: 7, kind: output, shape index: {0}]   ;;  %s2097_s8 = inlined_call_operand.hbm [shape: f32[1,1], index: 8, kind: output, shape index: {1}]  }
   0x1   :  { %v44_v0 = vld [vmem:[%s2090_s1 + $0x18] sm:$0xff]  ;;  %v43_v1 = vld [vmem:[%s2090_s1 + $0x10] sm:$0xff]  ;;  %v29_v2 = vld [vmem:[%s2089_s0] sm:$0xff] }
   0x2   :  { %1336 = vmatprep.subr.mxu1 %v44_v0  ;;  %v42_v3 = vld [vmem:[%s2090_s1 + $0x8] sm:$0xff]  ;;  %1344 = vmatprep.mubr.msk.f32.mxu1 %vm52_vm0, %v29_v2  ;;  %v41_v4 = vld [vmem:[%s2090_s1] sm:$0xff]  ;;  %v221_v5 = vld [vmem:[%s2092_s3 + $0x38] sm:$0xff] }
   0x3   :  { %1337 = vmatpush3.msra.mxu1 %v44_v0  ;;  %v30_v6 = vld [vmem:[%s2089_s0 + $0x8] sm:$0xff]  ;;  %1396 = vmatprep.subr.mxu0 %v221_v5  ;;  %v31_v7 = vld [vmem:[%s2089_s0 + $0x10] sm:$0xff] }
   0x4   :  { %1338 = vmatprep.subr.mxu1 %v43_v1  ;;  %v220_v8 = vld [vmem:[%s2092_s3 + $0x30] sm:$0xff]  ;;  %1397 = vmatpush3.msra.mxu0 %v221_v5 }
   0x5   :  { %1339 = vmatpush3.msra.mxu1 %v43_v1 }
   0x6   :  { %1340 = vmatprep.subr.mxu1 %v42_v3 }
   0x7   :  { %1341 = vmatpush3.msra.mxu1 %v42_v3 }
   0x8   :  { %1342 = vmatprep.subr.mxu1 %v41_v4 }
   0x9   :  { %14 = vsyncpa [#allocation3], 0  ;;  %1343 = vmatpush3.msra.mxu1 %v41_v4  ;;  %1398 = vmatprep.subr.mxu0 %v220_v8  ;;  %v32_v9 = vld [vmem:[%s2089_s0 + $0x18] sm:$0xff]  ;;  %v33_v10 = vld [vmem:[%s2089_s0 + $0x20] sm:$0xff]  ;;  %vm499_vm2 = vcmask 523264  }
   0xa   :  { %1345 = vmatmul.mubr.msk.f32.vlgmr.msra.gmra.mxu1 %vm52_vm0, %v30_v6  ;;  %1362 = vmatprep.subr.msk.mxu1 %vm234_vm1, %v221_v5  ;;  %v219_v11 = vld [vmem:[%s2092_s3 + $0x28] sm:$0xff]  ;;  %v218_v13 = vld [vmem:[%s2092_s3 + $0x20] sm:$0xff]  ;;  %v35_v14 = vld [vmem:[%s2089_s0 + $0x30] sm:$0xff] }
   0xb   :  { %1347 = vmatprep.mubr.msk.f32.mxu1 %vm52_vm0, %v31_v7  ;;  %1363 = vmatpush3.xpose.msk.msra.mxu1 %vm234_vm1, %v221_v5  ;;  %v34_v12 = vld [vmem:[%s2089_s0 + $0x28] sm:$0xff]  ;;  %v217_v15 = vld [vmem:[%s2092_s3 + $0x18] sm:$0xff]  ;;  %v37_v17 = vld [vmem:[%s2089_s0 + $0x40] sm:$0xff] }
   0xc   :  { %1364 = vmatprep.subr.msk.mxu1 %vm234_vm1, %v220_v8  ;;  %1399 = vmatpush3.msra.mxu0 %v220_v8  ;;  %v36_v16 = vld [vmem:[%s2089_s0 + $0x38] sm:$0xff]  ;;  %v216_v18 = vld [vmem:[%s2092_s3 + $0x10] sm:$0xff]  ;;  %v38_v19 = vld [vmem:[%s2089_s0 + $0x48] sm:$0xff] }
   0xd   :  { %1400 = vmatprep.subr.mxu0 %v219_v11  ;;  %v215_v20 = vld [vmem:[%s2092_s3 + $0x8] sm:$0xff]  ;;  %v39_v21 = vld [vmem:[%s2089_s0 + $0x50] sm:$0xff]  ;;  %v40_v22 = vld [vmem:[%s2089_s0 + $0x58] sm:$0xff] }
   0xe   :  { %1348 = vmatmul.mubr.msk.f32.gmra.mxu1 %vm52_vm0, %v32_v9  ;;  %1401 = vmatpush3.msra.mxu0 %v219_v11  ;;  %v214_v23 = vld [vmem:[%s2092_s3] sm:$0xff] }
   0xf   :  { %1350 = vmatprep.mubr.msk.f32.mxu1 %vm52_vm0, %v33_v10  ;;  %1365 = vmatpush3.xpose.msk.msra.mxu1 %vm234_vm1, %v220_v8  ;;  %v1207_v24 = vld [vmem:[%s2091_s2] ss:$0 sm:$0xff] }
  0x10   :  { %1366 = vmatprep.subr.msk.mxu1 %vm234_vm1, %v219_v11  ;;  %1402 = vmatprep.subr.mxu0 %v218_v13 }
  0x11   :  { %1403 = vmatpush3.msra.mxu0 %v218_v13 }
  0x12   :  { %1351 = vmatmul.mubr.msk.f32.gmra.mxu1 %vm52_vm0, %v34_v12  ;;  %1404 = vmatprep.subr.mxu0 %v217_v15 }
  0x13   :  { %1353 = vmatprep.mubr.msk.f32.mxu1 %vm52_vm0, %v35_v14  ;;  %1367 = vmatpush3.xpose.msk.msra.mxu1 %vm234_vm1, %v219_v11 }
  0x14   :  { %1368 = vmatprep.subr.msk.mxu1 %vm234_vm1, %v218_v13  ;;  %1405 = vmatpush3.msra.mxu0 %v217_v15 }
  0x15   :  { %1406 = vmatprep.subr.mxu0 %v216_v18 }
  0x16   :  { %1354 = vmatmul.mubr.msk.f32.gmra.mxu1 %vm52_vm0, %v36_v16  ;;  %1407 = vmatpush3.msra.mxu0 %v216_v18  ;;  %v1713_v16 = vld [vmem:[%s2093_s4] ss:$0 sm:$0xff] }
  0x17   :  { %1356 = vmatprep.mubr.msk.f32.mxu1 %vm52_vm0, %v37_v17  ;;  %1369 = vmatpush3.xpose.msk.msra.mxu1 %vm234_vm1, %v218_v13 }
  0x18   :  { %1370 = vmatprep.subr.msk.mxu1 %vm234_vm1, %v217_v15  ;;  %1408 = vmatprep.subr.mxu0 %v215_v20 }
  0x19   :  { %1409 = vmatpush3.msra.mxu0 %v215_v20 }
  0x1a   :  { %1357 = vmatmul.mubr.msk.f32.gmra.mxu1 %vm52_vm0, %v38_v19  ;;  %1410 = vmatprep.subr.mxu0 %v214_v23 }
  0x1b   :  { %1359 = vmatprep.mubr.msk.f32.mxu1 %vm52_vm0, %v39_v21  ;;  %1371 = vmatpush3.xpose.msk.msra.mxu1 %vm234_vm1, %v217_v15 }
  0x1c   :  { %1372 = vmatprep.subr.msk.mxu1 %vm234_vm1, %v216_v18  ;;  %1411 = vmatpush3.msra.mxu0 %v214_v23 }
  0x1e   :  { %1360 = vmatmul.mubr.msk.f32.gmra.mxu1 %vm52_vm0, %v40_v22 }
  0x1f   :  { %1373 = vmatpush3.xpose.msk.msra.mxu1 %vm234_vm1, %v216_v18 }
  0x20   :  { %1374 = vmatprep.subr.msk.mxu1 %vm234_vm1, %v215_v20 }
  0x23   :  { %1375 = vmatpush3.xpose.msk.msra.mxu1 %vm234_vm1, %v215_v20 }
  0x24   :  { %1376 = vmatprep.subr.msk.mxu1 %vm234_vm1, %v214_v23 }
  0x27   :  { %1377 = vmatpush3.xpose.msk.msra.mxu1 %vm234_vm1, %v214_v23 }
  0xca   :  { %v1346_v25 = vpop.f32.mrf.mxu1 }
  0xcb   :  { %v1626_v26 = vadd.f32 %v1346_v25, %v1207_v24 }
  0xcc   :  { %v155_v27 = vpop.f32.mrf.mxu1 }
  0xcd   :  { %v1628_v28 = vadd.f32 %v1207_v24, %v155_v27  ;;  %v223_v32 = vmul.f32 %v1626_v26, %v1626_v26 }
  0xce   :  { %v1349_v29 = vpop.f32.mrf.mxu1 }
  0xcf   :  { %1378 = vmatprep.mubr.msk.f32.mxu1 %vm234_vm1, %v1628_v28  ;;  %v222_v30 = vmul.f32 %v1628_v28, %v1628_v28  ;;  %v1638_v33 = vadd.f32 %v1349_v29, %v1207_v24  ;;  %v238_v39 = vsel %vm234_vm1, %v223_v32, 0.0 }
  0xd0   :  { %v165_v31 = vpop.f32.mrf.mxu1  ;;  %1379 = vmatmul.mubr.msk.f32.vlgmr.msra.gmra.mxu1 %vm234_vm1, %v1626_v26 }
  0xd1   :  { %v1640_v34 = vadd.f32 %v1207_v24, %v165_v31  ;;  %v235_v35 = vsel %vm234_vm1, %v222_v30, 0.0  ;;  %v225_v43 = vmul.f32 %v1638_v33, %v1638_v33 }
  0xd2   :  { %v1352_v36 = vpop.f32.mrf.mxu1  ;;  %236 = vadd.xlane.f32.xlu0 %v235_v35 }
  0xd3   :  { %1381 = vmatprep.mubr.msk.f32.mxu1 %vm234_vm1, %v1640_v34  ;;  %v224_v37 = vmul.f32 %v1640_v34, %v1640_v34  ;;  %v1650_v40 = vadd.f32 %v1352_v36, %v1207_v24  ;;  %v244_v49 = vsel %vm234_vm1, %v225_v43, 0.0 }
  0xd4   :  { %v175_v38 = vpop.f32.mrf.mxu1  ;;  %1382 = vmatmul.mubr.msk.f32.gmra.mxu1 %vm234_vm1, %v1638_v33 }
  0xd5   :  { %v1652_v41 = vadd.f32 %v1207_v24, %v175_v38  ;;  %v241_v42 = vsel %vm234_vm1, %v224_v37, 0.0  ;;  %v227_v51 = vmul.f32 %v1650_v40, %v1650_v40 }
  0xd6   :  { %v1355_v44 = vpop.f32.mrf.mxu1  ;;  %242 = vadd.xlane.f32.xlu1 %v241_v42  ;;  %239 = vadd.xlane.f32.xlu0 %v238_v39 }
  0xd7   :  { %1384 = vmatprep.mubr.msk.f32.mxu1 %vm234_vm1, %v1652_v41  ;;  %v226_v45 = vmul.f32 %v1652_v41, %v1652_v41  ;;  %v1661_v46 = vadd.f32 %v1355_v44, %v1207_v24  ;;  %v250_v58 = vsel %vm234_vm1, %v227_v51, 0.0 }
  0xd8   :  { %v185_v47 = vpop.f32.mrf.mxu1  ;;  %1385 = vmatmul.mubr.msk.f32.gmra.mxu1 %vm234_vm1, %v1650_v40 }
  0xd9   :  { %v1665_v48 = vadd.f32 %v1207_v24, %v185_v47  ;;  %v247_v50 = vsel %vm234_vm1, %v226_v45, 0.0  ;;  %v229_v55 = vmul.f32 %v1661_v46, %v1661_v46 }
  0xda   :  { %v1358_v52 = vpop.f32.mrf.mxu1  ;;  %245 = vadd.xlane.f32.xlu1 %v244_v49  ;;  %248 = vadd.xlane.f32.xlu0 %v247_v50 }
  0xdb   :  { %1387 = vmatprep.mubr.msk.f32.mxu1 %vm234_vm1, %v1665_v48  ;;  %v228_v53 = vmul.f32 %v1665_v48, %v1665_v48  ;;  %v1679_v56 = vadd.f32 %v1358_v52, %v1207_v24  ;;  %v256_v63 = vsel %vm234_vm1, %v229_v55, 0.0 }
  0xdc   :  { %v195_v54 = vpop.f32.mrf.mxu1  ;;  %1388 = vmatmul.mubr.msk.f32.gmra.mxu1 %vm234_vm1, %v1661_v46 }
  0xdd   :  { %v1681_v57 = vadd.f32 %v1207_v24, %v195_v54  ;;  %v253_v59 = vsel %vm234_vm1, %v228_v53, 0.0  ;;  %v231_v3 = vmul.f32 %v1679_v56, %v1679_v56 }
  0xde   :  { %v1361_v60 = vpop.f32.mrf.mxu1  ;;  %251 = vadd.xlane.f32.xlu1 %v250_v58  ;;  %254 = vadd.xlane.f32.xlu0 %v253_v59 }
  0xdf   :  { %1390 = vmatprep.mubr.msk.f32.mxu1 %vm234_vm1, %v1681_v57  ;;  %v230_v61 = vmul.f32 %v1681_v57, %v1681_v57  ;;  %v1692_v0 = vadd.f32 %v1361_v60, %v1207_v24  ;;  %v262_v5 = vsel %vm234_vm1, %v231_v3, 0.0 }
  0xe0   :  { %v205_v62 = vpop.f32.mrf.mxu1  ;;  %1391 = vmatmul.mubr.msk.f32.gmra.mxu1 %vm234_vm1, %v1679_v56 }
  0xe1   :  { %v1694_v1 = vadd.f32 %v1207_v24, %v205_v62  ;;  %v259_v2 = vsel %vm234_vm1, %v230_v61, 0.0  ;;  %v233_v7 = vmul.f32 %v1692_v0, %v1692_v0 }
  0xe2   :  { %257 = vadd.xlane.f32.xlu1 %v256_v63  ;;  %260 = vadd.xlane.f32.xlu0 %v259_v2 }
  0xe3   :  { %1393 = vmatprep.mubr.msk.f32.mxu1 %vm234_vm1, %v1694_v1  ;;  %v232_v4 = vmul.f32 %v1694_v1, %v1694_v1  ;;  %v268_v8 = vsel %vm234_vm1, %v233_v7, 0.0 }
  0xe4   :  { %1394 = vmatmul.mubr.msk.f32.gmra.mxu1 %vm234_vm1, %v1692_v0 }
  0xe5   :  { %v265_v6 = vsel %vm234_vm1, %v232_v4, 0.0 }
  0xe6   :  { %263 = vadd.xlane.f32.xlu1 %v262_v5  ;;  %266 = vadd.xlane.f32.xlu0 %v265_v6 }
  0xea   :  { %269 = vadd.xlane.f32.xlu1 %v268_v8 }
 0x15b   :  { %v237_v10 = vpop.xlane.xlu0 %236 }
 0x15f   :  { %v243_v9 = vpop.xlane.xlu1 %242  ;;  %v240_v12 = vpop.xlane.xlu0 %239 }
 0x163   :  { %v246_v11 = vpop.xlane.xlu1 %245  ;;  %v249_v24 = vpop.xlane.xlu0 %248 }
 0x167   :  { %v252_v19 = vpop.xlane.xlu1 %251  ;;  %v255_v49 = vpop.xlane.xlu0 %254 }
 0x16b   :  { %v258_v39 = vpop.xlane.xlu1 %257  ;;  %v261_v6 = vpop.xlane.xlu0 %260 }
 0x16f   :  { %v264_v62 = vpop.xlane.xlu1 %263 }
 0x190   :  { %v1380_v13 = vpop.f32.mrf.mxu1 }
 0x191   :  { %v457_v14 = vmul.f32 2.0, %v1380_v13 }
 0x192   :  { %v397_v15 = vpop.f32.mrf.mxu1 }
 0x193   :  { %v469_v17 = vsub.f32 %v240_v12, %v457_v14  ;;  %v456_v18 = vmul.f32 2.0, %v397_v15 }
 0x194   :  { %v1383_v20 = vpop.f32.mrf.mxu1 }
 0x195   :  { %v468_v21 = vsub.f32 %v237_v10, %v456_v18  ;;  %v459_v22 = vmul.f32 2.0, %v1383_v20  ;;  %v1716_v23 = vadd.f32 %v1713_v16, %v469_v17  ;;  %v270_v18 = vpop.xlane.xlu1 %269 }
 0x196   :  { %v407_v25 = vpop.f32.mrf.mxu1 }
 0x197   :  { %v471_v27 = vsub.f32 %v246_v11, %v459_v22  ;;  %v458_v29 = vmul.f32 2.0, %v407_v25  ;;  %v503_v30 = vsel %vm499_vm2, %v1716_v23, inf  ;;  %v1721_v31 = vadd.f32 %v1713_v16, %v468_v21  ;;  %v267_v25 = vpop.xlane.xlu0 %266 }
 0x198   :  { %v1386_v32 = vpop.f32.mrf.mxu1  ;;  %504 = vmin.xlane.f32.xlu1 %v503_v30 }
 0x199   :  { %v470_v35 = vsub.f32 %v243_v9, %v458_v29  ;;  %v461_v36 = vmul.f32 2.0, %v1386_v32  ;;  %v500_v37 = vsel %vm499_vm2, %v1721_v31, inf  ;;  %v1726_v38 = vadd.f32 %v1713_v16, %v471_v27 }
 0x19a   :  { %v417_v42 = vpop.f32.mrf.mxu1  ;;  %501 = vmin.xlane.f32.xlu0 %v500_v37  ;;  %v536_v37 = vlaneseq }
 0x19b   :  { %v473_v43 = vsub.f32 %v252_v19, %v461_v36  ;;  %v460_v44 = vmul.f32 2.0, %v417_v42  ;;  %v509_v45 = vsel %vm499_vm2, %v1726_v38, inf  ;;  %v1731_v47 = vadd.f32 %v1713_v16, %v470_v35 }
 0x19c   :  { %v1389_v50 = vpop.f32.mrf.mxu1  ;;  %510 = vmin.xlane.f32.xlu1 %v509_v45 }
 0x19d   :  { %v472_v51 = vsub.f32 %v249_v24, %v460_v44  ;;  %v463_v52 = vmul.f32 2.0, %v1389_v50  ;;  %v506_v53 = vsel %vm499_vm2, %v1731_v47, inf  ;;  %v1736_v54 = vadd.f32 %v1713_v16, %v473_v43 }
 0x19e   :  { %v427_v55 = vpop.f32.mrf.mxu1  ;;  %507 = vmin.xlane.f32.xlu0 %v506_v53 }
 0x19f   :  { %v475_v58 = vsub.f32 %v258_v39, %v463_v52  ;;  %v462_v59 = vmul.f32 2.0, %v427_v55  ;;  %v515_v60 = vsel %vm499_vm2, %v1736_v54, inf  ;;  %v1741_v61 = vadd.f32 %v1713_v16, %v472_v51 }
 0x1a0   :  { %v1392_v63 = vpop.f32.mrf.mxu1  ;;  %516 = vmin.xlane.f32.xlu1 %v515_v60  ;;  %v1775_v39 = vand.u32 127, %v536_v37 }
 0x1a1   :  { %v474_v2 = vsub.f32 %v255_v49, %v462_v59  ;;  %v465_v3 = vmul.f32 2.0, %v1392_v63  ;;  %v512_v4 = vsel %vm499_vm2, %v1741_v61, inf  ;;  %v1746_v5 = vadd.f32 %v1713_v16, %v475_v58 }
 0x1a2   :  { %v437_v7 = vpop.f32.mrf.mxu1  ;;  %513 = vmin.xlane.f32.xlu0 %v512_v4 }
 0x1a3   :  { %v477_v8 = vsub.f32 %v264_v62, %v465_v3  ;;  %v464_v9 = vmul.f32 2.0, %v437_v7  ;;  %v521_v10 = vsel %vm499_vm2, %v1746_v5, inf  ;;  %v1751_v11 = vadd.f32 %v1713_v16, %v474_v2 }
 0x1a4   :  { %v1395_v12 = vpop.f32.mrf.mxu1  ;;  %522 = vmin.xlane.f32.xlu1 %v521_v10 }
 0x1a5   :  { %v476_v13 = vsub.f32 %v261_v6, %v464_v9  ;;  %v467_v14 = vmul.f32 2.0, %v1395_v12  ;;  %v518_v15 = vsel %vm499_vm2, %v1751_v11, inf  ;;  %v1756_v17 = vadd.f32 %v1713_v16, %v477_v8 }
 0x1a6   :  { %v447_v19 = vpop.f32.mrf.mxu1  ;;  %519 = vmin.xlane.f32.xlu0 %v518_v15 }
 0x1a7   :  { %v479_v20 = vsub.f32 %v270_v18, %v467_v14  ;;  %v466_v21 = vmul.f32 2.0, %v447_v19  ;;  %v527_v22 = vsel %vm499_vm2, %v1756_v17, inf  ;;  %v1761_v24 = vadd.f32 %v1713_v16, %v476_v13 }
 0x1a8   :  { %528 = vmin.xlane.f32.xlu1 %v527_v22 }
 0x1a9   :  { %v478_v27 = vsub.f32 %v267_v25, %v466_v21  ;;  %v524_v29 = vsel %vm499_vm2, %v1761_v24, inf  ;;  %v1766_v30 = vadd.f32 %v1713_v16, %v479_v20 }
 0x1aa   :  { %525 = vmin.xlane.f32.xlu0 %v524_v29 }
 0x1ab   :  { %v533_v32 = vsel %vm499_vm2, %v1766_v30, inf  ;;  %v1771_v35 = vadd.f32 %v1713_v16, %v478_v27 }
 0x1ac   :  { %534 = vmin.xlane.f32.xlu1 %v533_v32 }
 0x1ad   :  { %v530_v36 = vsel %vm499_vm2, %v1771_v35, inf }
 0x1ae   :  { %531 = vmin.xlane.f32.xlu0 %v530_v36 }
 0x221   :  { %v505_v42 = vpop.xlane.xlu1 %504 }
 0x222   :  { %vm539_vm3 = vcmp.le.f32.partialorder %v1716_v23, %v505_v42 }
 0x223   :  { %v551_v43 = vsel %vm539_vm3, %v1775_v39, 64  ;;  %v502_v44 = vpop.xlane.xlu0 %501 }
 0x224   :  { %v1780_v45 = vsel %vm499_vm2, %v551_v43, 2147483647  ;;  %vm538_vm4 = vcmp.le.f32.partialorder %v1721_v31, %v502_v44 }
 0x225   :  { %v550_v16 = vsel %vm538_vm4, %v1775_v39, 64  ;;  %v511_v49 = vpop.xlane.xlu1 %510  ;;  %v579_v50 = vshra.s32 %v1780_v45, 16 }
 0x226   :  { %v1786_v51 = vsel %vm499_vm2, %v550_v16, 2147483647  ;;  %vm541_vm5 = vcmp.le.f32.partialorder %v1726_v38, %v511_v49 }
 0x227   :  { %v553_v23 = vsel %vm541_vm5, %v1775_v39, 64  ;;  %v508_v52 = vpop.xlane.xlu0 %507  ;;  %v1790_v53 = vcvt.s32.f32 %v579_v50  ;;  %v564_v55 = vshra.s32 %v1786_v51, 16 }
 0x228   :  { %v1794_v58 = vsel %vm499_vm2, %v553_v23, 2147483647  ;;  %vm540_vm6 = vcmp.le.f32.partialorder %v1731_v47, %v508_v52 }
 0x229   :  { %v552_v31 = vsel %vm540_vm6, %v1775_v39, 64  ;;  %582 = vmin.xlane.f32.xlu1 %v1790_v53  ;;  %v517_v59 = vpop.xlane.xlu1 %516  ;;  %v1799_v60 = vcvt.s32.f32 %v564_v55  ;;  %v609_v38 = vshra.s32 %v1794_v58, 16 }
 0x22a   :  { %v1803_v62 = vsel %vm499_vm2, %v552_v31, 2147483647  ;;  %vm543_vm7 = vcmp.le.f32.partialorder %v1736_v54, %v517_v59  ;;  %v578_v31 = vand.u32 65535, %v1780_v45  ;;  %v563_v59 = vand.u32 65535, %v1786_v51 }
 0x22b   :  { %v555_v63 = vsel %vm543_vm7, %v1775_v39, 64  ;;  %567 = vmin.xlane.f32.xlu0 %v1799_v60  ;;  %v514_v2 = vpop.xlane.xlu0 %513  ;;  %v1808_v47 = vcvt.s32.f32 %v609_v38  ;;  %v594_v3 = vshra.s32 %v1803_v62, 16 }
 0x22c   :  { %v1812_v4 = vsel %vm499_vm2, %v555_v63, 2147483647  ;;  %vm542_vm8 = vcmp.le.f32.partialorder %v1741_v61, %v514_v2  ;;  %v580_v63 = vcvt.s32.f32 %v578_v31  ;;  %v608_v2 = vand.u32 65535, %v1794_v58 }
 0x22d   :  { %v554_v6 = vsel %vm542_vm8, %v1775_v39, 64  ;;  %612 = vmin.xlane.f32.xlu1 %v1808_v47  ;;  %v523_v7 = vpop.xlane.xlu1 %522  ;;  %v1817_v54 = vcvt.s32.f32 %v594_v3  ;;  %v639_v8 = vshra.s32 %v1812_v4, 16 }
 0x22e   :  { %v1821_v9 = vsel %vm499_vm2, %v554_v6, 2147483647  ;;  %vm545_vm9 = vcmp.le.f32.partialorder %v1746_v5, %v523_v7  ;;  %v565_v7 = vcvt.s32.f32 %v563_v59 }
 0x22f   :  { %v557_v10 = vsel %vm545_vm9, %v1775_v39, 64  ;;  %597 = vmin.xlane.f32.xlu0 %v1817_v54  ;;  %v520_v12 = vpop.xlane.xlu0 %519  ;;  %v1826_v61 = vcvt.s32.f32 %v639_v8  ;;  %v624_v13 = vshra.s32 %v1821_v9, 16  ;;  %v593_v8 = vand.u32 65535, %v1803_v62 }
 0x230   :  { %v1830_v14 = vsel %vm499_vm2, %v557_v10, 2147483647  ;;  %vm544_vm10 = vcmp.le.f32.partialorder %v1751_v11, %v520_v12  ;;  %v610_v10 = vcvt.s32.f32 %v608_v2  ;;  %v638_v12 = vand.u32 65535, %v1812_v4 }
 0x231   :  { %v556_v15 = vsel %vm544_vm10, %v1775_v39, 64  ;;  %642 = vmin.xlane.f32.xlu1 %v1826_v61  ;;  %v529_v18 = vpop.xlane.xlu1 %528  ;;  %v1835_v5 = vcvt.s32.f32 %v624_v13  ;;  %v669_v19 = vshra.s32 %v1830_v14, 16  ;;  %v595_v13 = vcvt.s32.f32 %v593_v8 }
 0x232   :  { %v1839_v20 = vsel %vm499_vm2, %v556_v15, 2147483647  ;;  %vm547_vm11 = vcmp.le.f32.partialorder %v1756_v17, %v529_v18  ;;  %v623_v62 = vand.u32 65535, %v1821_v9  ;;  %v640_v18 = vcvt.s32.f32 %v638_v12 }
 0x233   :  { %v559_v21 = vsel %vm547_vm11, %v1775_v39, 64  ;;  %627 = vmin.xlane.f32.xlu0 %v1835_v5  ;;  %v526_v22 = vpop.xlane.xlu0 %525  ;;  %v1844_v11 = vcvt.s32.f32 %v669_v19  ;;  %v654_v25 = vshra.s32 %v1839_v20, 16  ;;  %v668_v4 = vand.u32 65535, %v1830_v14 }
 0x234   :  { %v1848_v27 = vsel %vm499_vm2, %v559_v21, 2147483647  ;;  %vm546_vm12 = vcmp.le.f32.partialorder %v1761_v24, %v526_v22  ;;  %v625_v21 = vcvt.s32.f32 %v623_v62  ;;  %v653_v9 = vand.u32 65535, %v1839_v20 }
 0x235   :  { %v558_v29 = vsel %vm546_vm12, %v1775_v39, 64  ;;  %672 = vmin.xlane.f32.xlu1 %v1844_v11  ;;  %v535_v32 = vpop.xlane.xlu1 %534  ;;  %v1853_v17 = vcvt.s32.f32 %v654_v25  ;;  %v699_v36 = vshra.s32 %v1848_v27, 16  ;;  %v670_v25 = vcvt.s32.f32 %v668_v4 }
 0x236   :  { %v1857_v37 = vsel %vm499_vm2, %v558_v29, 2147483647  ;;  %vm549_vm13 = vcmp.le.f32.partialorder %v1766_v30, %v535_v32  ;;  %v698_v14 = vand.u32 65535, %v1848_v27  ;;  %v655_v32 = vcvt.s32.f32 %v653_v9 }
 0x237   :  { %v561_v42 = vsel %vm549_vm13, %v1775_v39, 64  ;;  %657 = vmin.xlane.f32.xlu0 %v1853_v17  ;;  %v532_v43 = vpop.xlane.xlu0 %531  ;;  %v1862_v24 = vcvt.s32.f32 %v699_v36  ;;  %v684_v44 = vshra.s32 %v1857_v37, 16  ;;  %v683_v20 = vand.u32 65535, %v1857_v37 }
 0x238   :  { %v1866_v16 = vsel %vm499_vm2, %v561_v42, 2147483647  ;;  %vm548_vm14 = vcmp.le.f32.partialorder %v1771_v35, %v532_v43  ;;  %v700_v42 = vcvt.s32.f32 %v698_v14  ;;  %v1007_v14 = vld [vmem:[%s2094_s5] sm:$0xff] }
 0x239   :  { %v560_v49 = vsel %vm548_vm14, %v1775_v39, 64  ;;  %702 = vmin.xlane.f32.xlu1 %v1862_v24  ;;  %v1871_v50 = vcvt.s32.f32 %v684_v44  ;;  %v729_v30 = vshra.s32 %v1866_v16, 16  ;;  %v728_v27 = vand.u32 65535, %v1866_v16 }
 0x23a   :  { %v1875_v23 = vsel %vm499_vm2, %v560_v49, 2147483647  ;;  %v685_v44 = vcvt.s32.f32 %v683_v20 }
 0x23b   :  { %687 = vmin.xlane.f32.xlu0 %v1871_v50  ;;  %v1878_v52 = vcvt.s32.f32 %v729_v30  ;;  %v714_v55 = vshra.s32 %v1875_v23, 16  ;;  %v713_v37 = vand.u32 65535, %v1875_v23  ;;  %v730_v30 = vcvt.s32.f32 %v728_v27 }
 0x23d   :  { %732 = vmin.xlane.f32.xlu1 %v1878_v52  ;;  %v1882_v35 = vcvt.s32.f32 %v714_v55  ;;  %v715_v55 = vcvt.s32.f32 %v713_v37 }
 0x23f   :  { %717 = vmin.xlane.f32.xlu0 %v1882_v35 }
 0x2b2   :  { %v1887_v38 = vpop.xlane.xlu1 %582 }
 0x2b3   :  { %vm584_vm15 = vcmp.eq.f32.partialorder %v1790_v53, %v1887_v38  ;;  %v589_v31 = vcvt.f32.s32 %v1887_v38 }
 0x2b4   :  { %v1892_v3 = vpop.xlane.xlu0 %567  ;;  %v585_v6 = vsel %vm584_vm15, %v580_v63, inf }
 0x2b5   :  { %586 = vmin.xlane.f32.xlu1 %v585_v6  ;;  %vm569_vm3 = vcmp.eq.f32.partialorder %v1799_v60, %v1892_v3  ;;  %v574_v59 = vcvt.f32.s32 %v1892_v3  ;;  %v590_v63 = vshll.u32 %v589_v31, 16 }
 0x2b6   :  { %v1897_v45 = vpop.xlane.xlu1 %612  ;;  %v570_v51 = vsel %vm569_vm3, %v565_v7, inf }
 0x2b7   :  { %571 = vmin.xlane.f32.xlu0 %v570_v51  ;;  %vm614_vm4 = vcmp.eq.f32.partialorder %v1808_v47, %v1897_v45  ;;  %v619_v2 = vcvt.f32.s32 %v1897_v45  ;;  %v575_v8 = vshll.u32 %v574_v59, 16 }
 0x2b8   :  { %v1902_v53 = vpop.xlane.xlu0 %597  ;;  %v615_v58 = vsel %vm614_vm4, %v610_v10, inf }
 0x2b9   :  { %616 = vmin.xlane.f32.xlu1 %v615_v58  ;;  %vm599_vm5 = vcmp.eq.f32.partialorder %v1817_v54, %v1902_v53 }
 0x2ba   :  { %v1907_v60 = vpop.xlane.xlu1 %642  ;;  %v600_v15 = vsel %vm599_vm5, %v595_v13, inf  ;;  %v620_v13 = vshll.u32 %v619_v2, 16 }
 0x2bb   :  { %601 = vmin.xlane.f32.xlu0 %v600_v15  ;;  %vm644_vm6 = vcmp.eq.f32.partialorder %v1826_v61, %v1907_v60  ;;  %v649_v12 = vcvt.f32.s32 %v1907_v60 }
 0x2bc   :  { %v1912_v47 = vpop.xlane.xlu0 %627  ;;  %v645_v19 = vsel %vm644_vm6, %v640_v18, inf }
 0x2bd   :  { %646 = vmin.xlane.f32.xlu1 %v645_v19  ;;  %vm629_vm7 = vcmp.eq.f32.partialorder %v1835_v5, %v1912_v47  ;;  %v634_v38 = vcvt.f32.s32 %v1912_v47  ;;  %v650_v19 = vshll.u32 %v649_v12, 16 }
 0x2be   :  { %v1917_v54 = vpop.xlane.xlu1 %672  ;;  %v630_v22 = vsel %vm629_vm7, %v625_v21, inf  ;;  %v1476_v21 = vmov 0.0  }
 0x2bf   :  { %631 = vmin.xlane.f32.xlu0 %v630_v22  ;;  %vm674_vm8 = vcmp.eq.f32.partialorder %v1844_v11, %v1917_v54  ;;  %v679_v60 = vcvt.f32.s32 %v1917_v54 }
 0x2c0   :  { %v1922_v61 = vpop.xlane.xlu0 %657  ;;  %v675_v29 = vsel %vm674_vm8, %v670_v25, inf }
 0x2c1   :  { %676 = vmin.xlane.f32.xlu1 %v675_v29  ;;  %vm659_vm9 = vcmp.eq.f32.partialorder %v1853_v17, %v1922_v61  ;;  %v635_v29 = vshll.u32 %v634_v38, 16  ;;  %v664_v20 = vcvt.f32.s32 %v1922_v61 }
 0x2c2   :  { %v1927_v5 = vpop.xlane.xlu1 %702  ;;  %v660_v36 = vsel %vm659_vm9, %v655_v32, inf }
 0x2c3   :  { %661 = vmin.xlane.f32.xlu0 %v660_v36  ;;  %vm704_vm10 = vcmp.eq.f32.partialorder %v1862_v24, %v1927_v5 }
 0x2c4   :  { %v1932_v11 = vpop.xlane.xlu0 %687  ;;  %v705_v43 = vsel %vm704_vm10, %v700_v42, inf  ;;  %v709_v42 = vcvt.f32.s32 %v1927_v5  ;;  %v665_v5 = vshll.u32 %v664_v20, 16 }
 0x2c5   :  { %706 = vmin.xlane.f32.xlu1 %v705_v43  ;;  %vm689_vm11 = vcmp.eq.f32.partialorder %v1871_v50, %v1932_v11  ;;  %v1008_v50 = vld [vmem:[%s2094_s5 + $0x8] sm:$0xff]  ;;  %v694_v61 = vcvt.f32.s32 %v1932_v11  ;;  %s1477_s5 = smov [#allocation2]  }
 0x2c6   :  { %v1937_v17 = vpop.xlane.xlu1 %732  ;;  %v690_v49 = vsel %vm689_vm11, %v685_v44, inf  ;;  %1430 = vmatprep.subr.mxu0 %v1008_v50  ;;  %v680_v44 = vshll.u32 %v679_v60, 16  ;;  %s1197_s11 = sshll.u32 %s1477_s5, 4  ;;  %s1198_s11 = int_to_ptr.vmem [resolvable:$true] %s1197_s11 }
 0x2c7   :  { %691 = vmin.xlane.f32.xlu0 %v690_v49  ;;  %vm734_vm12 = vcmp.eq.f32.partialorder %v1878_v52, %v1937_v17  ;;  %s1454_s12 = scalar_lea.vmem %s1198_s11, 16  ;;  %s1458_s13 = scalar_lea.vmem %s1198_s11, 32 }
 0x2c8   :  { %v1941_v16 = vpop.xlane.xlu0 %717  ;;  %v735_v24 = vsel %vm734_vm12, %v730_v30, inf  ;;  %p1455_p0 = scmp.ne.s32.totalorder %s1198_s11, %s1454_s12  ;;  %p1459_p1 = scmp.lt.s32.totalorder %s1198_s11, %s1198_s11 }
 0x2c9   :  { %736 = vmin.xlane.f32.xlu1 %v735_v24  ;;  %vm719_vm13 = vcmp.eq.f32.partialorder %v1882_v35, %v1941_v16  ;;  %v604_v35 = vcvt.f32.s32 %v1902_v53  ;;  %p1460_p2 = scmp.lt.s32.totalorder %s1458_s13, %s1454_s12 }
 0x2ca   :  { %v720_v23 = vsel %vm719_vm13, %v715_v55, inf }
 0x2cb   :  { %721 = vmin.xlane.f32.xlu0 %v720_v23  ;;  %v605_v18 = vshll.u32 %v604_v35, 16  ;;  %p1461_p3 = por %p1460_p2, %p1459_p1 }
 0x2cd   :  { %p1462_p4 = pnand %p1461_p3, %p1455_p0 }
 0x33e   :  { %v587_v52 = vpop.xlane.xlu1 %586 }
 0x33f   :  { %v588_v6 = vcvt.f32.s32 %v587_v52  ;;  %v739_v52 = vcvt.f32.s32 %v1937_v17 }
 0x340   :  { %v572_v7 = vpop.xlane.xlu0 %571 }
 0x341   :  { %v591_v51 = vadd.s32 %v590_v63, %v588_v6  ;;  %v573_v10 = vcvt.f32.s32 %v572_v7  ;;  %v695_v6 = vshll.u32 %v694_v61, 16  ;;  %v740_v12 = vshll.u32 %v739_v52, 16 }
 0x342   :  { %v617_v58 = vpop.xlane.xlu1 %616 }
 0x343   :  { %v576_v62 = vadd.s32 %v575_v8, %v573_v10  ;;  %v618_v15 = vcvt.f32.s32 %v617_v58  ;;  %vm743_vm14 = vcmp.eq.s32.totalorder %v1775_v39, %v591_v51  ;;  %v724_v8 = vcvt.f32.s32 %v1941_v16 }
 0x344   :  { %v602_v3 = vpop.xlane.xlu0 %601  ;;  %v755_v47 = vsel %vm743_vm14, 1.0, %v1476_v21 }
 0x345   :  { %v621_v45 = vadd.s32 %v620_v13, %v618_v15  ;;  %v603_v4 = vcvt.f32.s32 %v602_v3  ;;  %vm742_vm15 = vcmp.eq.s32.totalorder %v1775_v39, %v576_v62  ;;  %v725_v16 = vshll.u32 %v724_v8, 16 }
 0x346   :  { %v647_v53 = vpop.xlane.xlu1 %646  ;;  %v754_v9 = vsel %vm742_vm15, 1.0, %v1476_v21 }
 0x347   :  { %v606_v22 = vadd.s32 %v605_v18, %v603_v4  ;;  %v648_v25 = vcvt.f32.s32 %v647_v53  ;;  %1412 = vmatprep.mubr.msk.f32.mxu0 %vm499_vm2, %v754_v9  ;;  %vm745_vm3 = vcmp.eq.s32.totalorder %v1775_v39, %v621_v45 }
 0x348   :  { %1413 = vmatmul.mubr.msk.f32.vlgmr.msra.gmra.mxu0 %vm499_vm2, %v755_v47  ;;  %v632_v32 = vpop.xlane.xlu0 %631  ;;  %v757_v30 = vsel %vm745_vm3, 1.0, %v1476_v21 }
 0x349   :  { %v651_v36 = vadd.s32 %v650_v19, %v648_v25  ;;  %v633_v54 = vcvt.f32.s32 %v632_v32  ;;  %vm744_vm4 = vcmp.eq.s32.totalorder %v1775_v39, %v606_v22  ;;  %1431 = vmatpush3.msra.mxu0 %v1008_v50  ;;  %v710_v50 = vshll.u32 %v709_v42, 16 }
 0x34a   :  { %v677_v27 = vpop.xlane.xlu1 %676  ;;  %v756_v43 = vsel %vm744_vm4, 1.0, %v1476_v21  ;;  %1432 = vmatprep.subr.mxu0 %v1007_v14 }
 0x34b   :  { %v636_v37 = vadd.s32 %v635_v29, %v633_v54  ;;  %v678_v49 = vcvt.f32.s32 %v677_v27  ;;  %1415 = vmatprep.mubr.msk.f32.mxu0 %vm499_vm2, %v756_v43  ;;  %1433 = vmatpush3.msra.mxu0 %v1007_v14  ;;  %vm747_vm5 = vcmp.eq.s32.totalorder %v1775_v39, %v651_v36 }
 0x34c   :  { %1416 = vmatmul.mubr.msk.f32.gmra.mxu0 %vm499_vm2, %v757_v30  ;;  %v662_v24 = vpop.xlane.xlu0 %661  ;;  %v759_v11 = vsel %vm747_vm5, 1.0, %v1476_v21 }
 0x34d   :  { %v681_v55 = vadd.s32 %v680_v44, %v678_v49  ;;  %v663_v23 = vcvt.f32.s32 %v662_v24  ;;  %vm746_vm6 = vcmp.eq.s32.totalorder %v1775_v39, %v636_v37 }
 0x34e   :  { %v707_v31 = vpop.xlane.xlu1 %706  ;;  %v758_v59 = vsel %vm746_vm6, 1.0, %v1476_v21 }
 0x34f   :  { %v666_v63 = vadd.s32 %v665_v5, %v663_v23  ;;  %v708_v2 = vcvt.f32.s32 %v707_v31  ;;  %1418 = vmatprep.mubr.msk.f32.mxu0 %vm499_vm2, %v758_v59  ;;  %vm749_vm7 = vcmp.eq.s32.totalorder %v1775_v39, %v681_v55 }
 0x350   :  { %1419 = vmatmul.mubr.msk.f32.gmra.mxu0 %vm499_vm2, %v759_v11  ;;  %v692_v7 = vpop.xlane.xlu0 %691  ;;  %v761_v62 = vsel %vm749_vm7, 1.0, %v1476_v21 }
 0x351   :  { %v711_v35 = vadd.s32 %v710_v50, %v708_v2  ;;  %v693_v51 = vcvt.f32.s32 %v692_v7  ;;  %vm748_vm8 = vcmp.eq.s32.totalorder %v1775_v39, %v666_v63 }
 0x352   :  { %v737_v10 = vpop.xlane.xlu1 %736  ;;  %v760_v17 = vsel %vm748_vm8, 1.0, %v1476_v21 }
 0x353   :  { %v696_v58 = vadd.s32 %v695_v6, %v693_v51  ;;  %v738_v13 = vcvt.f32.s32 %v737_v10  ;;  %1421 = vmatprep.mubr.msk.f32.mxu0 %vm499_vm2, %v760_v17  ;;  %vm751_vm9 = vcmp.eq.s32.totalorder %v1775_v39, %v711_v35 }
 0x354   :  { %1422 = vmatmul.mubr.msk.f32.gmra.mxu0 %vm499_vm2, %v761_v62  ;;  %v722_v15 = vpop.xlane.xlu0 %721  ;;  %v763_v4 = vsel %vm751_vm9, 1.0, %v1476_v21 }
 0x355   :  { %v741_v38 = vadd.s32 %v740_v12, %v738_v13  ;;  %v723_v3 = vcvt.f32.s32 %v722_v15  ;;  %vm750_vm10 = vcmp.eq.s32.totalorder %v1775_v39, %v696_v58 }
 0x356   :  { %v762_v18 = vsel %vm750_vm10, 1.0, %v1476_v21 }
 0x357   :  { %v726_v45 = vadd.s32 %v725_v16, %v723_v3  ;;  %1424 = vmatprep.mubr.msk.f32.mxu0 %vm499_vm2, %v762_v18  ;;  %vm753_vm11 = vcmp.eq.s32.totalorder %v1775_v39, %v741_v38 }
 0x358   :  { %1425 = vmatmul.mubr.msk.f32.gmra.mxu0 %vm499_vm2, %v763_v4  ;;  %v765_v53 = vsel %vm753_vm11, 1.0, %v1476_v21 }
 0x359   :  { %vm752_vm12 = vcmp.eq.s32.totalorder %v1775_v39, %v726_v45 }
 0x35a   :  { %v764_v19 = vsel %vm752_vm12, 1.0, %v1476_v21 }
 0x35b   :  { %1427 = vmatprep.mubr.msk.f32.mxu0 %vm499_vm2, %v764_v19 }
 0x35c   :  { %1428 = vmatmul.mubr.msk.f32.gmra.mxu0 %vm499_vm2, %v765_v53 }
 0x408   :  { %v1414_v9 = vpop.f32.mrf.mxu0 }
 0x409   :  { %v928_v60 = vsub.f32 %v1414_v9, %v1626_v26 }
 0x40a   :  { %v868_v22 = vpop.f32.mrf.mxu0 }
 0x40b   :  { %v940_v25 = vmul.f32 %v928_v60, %v928_v60  ;;  %v927_v47 = vsub.f32 %v868_v22, %v1628_v28  ;;  %1434 = vmatprep.mubr.msk.f32.mxu0 %vm234_vm1, %v868_v22 }
 0x40c   :  { %v1417_v14 = vpop.f32.mrf.mxu0  ;;  %1435 = vmatmul.mubr.msk.f32.vlgmr.msra.gmra.mxu0 %vm234_vm1, %v1414_v9 }
 0x40d   :  { %v939_v39 = vmul.f32 %v927_v47, %v927_v47  ;;  %v930_v29 = vsub.f32 %v1417_v14, %v1638_v33  ;;  %v954_v32 = vsel %vm234_vm1, %v940_v25, 0.0 }
 0x40e   :  { %955 = vadd.xlane.f32.xlu1 %v954_v32  ;;  %v878_v21 = vpop.f32.mrf.mxu0 }
 0x40f   :  { %v942_v20 = vmul.f32 %v930_v29, %v930_v29  ;;  %v929_v36 = vsub.f32 %v878_v21, %v1640_v34  ;;  %1437 = vmatprep.mubr.msk.f32.mxu0 %vm234_vm1, %v878_v21  ;;  %v951_v26 = vsel %vm234_vm1, %v939_v39, 0.0 }
 0x410   :  { %952 = vadd.xlane.f32.xlu0 %v951_v26  ;;  %v1420_v28 = vpop.f32.mrf.mxu0  ;;  %1438 = vmatmul.mubr.msk.f32.gmra.mxu0 %vm234_vm1, %v1417_v14 }
 0x411   :  { %v941_v54 = vmul.f32 %v929_v36, %v929_v36  ;;  %v932_v42 = vsub.f32 %v1420_v28, %v1650_v40  ;;  %v960_v33 = vsel %vm234_vm1, %v942_v20, 0.0 }
 0x412   :  { %961 = vadd.xlane.f32.xlu1 %v960_v33  ;;  %v888_v27 = vpop.f32.mrf.mxu0 }
 0x413   :  { %v944_v43 = vmul.f32 %v932_v42, %v932_v42  ;;  %v931_v44 = vsub.f32 %v888_v27, %v1652_v41  ;;  %1440 = vmatprep.mubr.msk.f32.mxu0 %vm234_vm1, %v888_v27  ;;  %v957_v34 = vsel %vm234_vm1, %v941_v54, 0.0 }
 0x414   :  { %958 = vadd.xlane.f32.xlu0 %v957_v34  ;;  %v1423_v37 = vpop.f32.mrf.mxu0  ;;  %1441 = vmatmul.mubr.msk.f32.gmra.mxu0 %vm234_vm1, %v1420_v28 }
 0x415   :  { %v943_v49 = vmul.f32 %v931_v44, %v931_v44  ;;  %v934_v30 = vsub.f32 %v1423_v37, %v1661_v46  ;;  %v966_v40 = vsel %vm234_vm1, %v944_v43, 0.0 }
 0x416   :  { %967 = vadd.xlane.f32.xlu1 %v966_v40  ;;  %v898_v61 = vpop.f32.mrf.mxu0 }
 0x417   :  { %v946_v24 = vmul.f32 %v934_v30, %v934_v30  ;;  %v933_v5 = vsub.f32 %v898_v61, %v1665_v48  ;;  %1443 = vmatprep.mubr.msk.f32.mxu0 %vm234_vm1, %v898_v61  ;;  %v963_v41 = vsel %vm234_vm1, %v943_v49, 0.0 }
 0x418   :  { %964 = vadd.xlane.f32.xlu0 %v963_v41  ;;  %v1426_v55 = vpop.f32.mrf.mxu0  ;;  %1444 = vmatmul.mubr.msk.f32.gmra.mxu0 %vm234_vm1, %v1423_v37 }
 0x419   :  { %v945_v23 = vmul.f32 %v933_v5, %v933_v5  ;;  %v936_v50 = vsub.f32 %v1426_v55, %v1679_v56  ;;  %v972_v46 = vsel %vm234_vm1, %v946_v24, 0.0 }
 0x41a   :  { %973 = vadd.xlane.f32.xlu1 %v972_v46  ;;  %v908_v31 = vpop.f32.mrf.mxu0 }
 0x41b   :  { %v948_v59 = vmul.f32 %v936_v50, %v936_v50  ;;  %v935_v52 = vsub.f32 %v908_v31, %v1681_v57  ;;  %1446 = vmatprep.mubr.msk.f32.mxu0 %vm234_vm1, %v908_v31  ;;  %v969_v48 = vsel %vm234_vm1, %v945_v23, 0.0 }
 0x41c   :  { %970 = vadd.xlane.f32.xlu0 %v969_v48  ;;  %v1429_v63 = vpop.f32.mrf.mxu0  ;;  %1447 = vmatmul.mubr.msk.f32.gmra.mxu0 %vm234_vm1, %v1426_v55 }
 0x41d   :  { %v947_v2 = vmul.f32 %v935_v52, %v935_v52  ;;  %v938_v11 = vsub.f32 %v1429_v63, %v1692_v0  ;;  %v978_v56 = vsel %vm234_vm1, %v948_v59, 0.0 }
 0x41e   :  { %979 = vadd.xlane.f32.xlu1 %v978_v56  ;;  %v918_v6 = vpop.f32.mrf.mxu0 }
 0x41f   :  { %v950_v7 = vmul.f32 %v938_v11, %v938_v11  ;;  %v937_v8 = vsub.f32 %v918_v6, %v1694_v1  ;;  %1449 = vmatprep.mubr.msk.f32.mxu0 %vm234_vm1, %v918_v6  ;;  %v975_v57 = vsel %vm234_vm1, %v947_v2, 0.0 }
 0x420   :  { %976 = vadd.xlane.f32.xlu0 %v975_v57  ;;  %1450 = vmatmul.mubr.msk.f32.gmra.mxu0 %vm234_vm1, %v1429_v63 }
 0x421   :  { %v949_v35 = vmul.f32 %v937_v8, %v937_v8  ;;  %v984_v51 = vsel %vm234_vm1, %v950_v7, 0.0 }
 0x422   :  { %985 = vadd.xlane.f32.xlu1 %v984_v51 }
 0x423   :  { %v981_v0 = vsel %vm234_vm1, %v949_v35, 0.0  ;;  %vm1005_vm1 = vcmask 0  }
 0x424   :  { %982 = vadd.xlane.f32.xlu0 %v981_v0 }
 0x497   :  { %v956_v10 = vpop.xlane.xlu1 %955 }
 0x499   :  { %v953_v17 = vpop.xlane.xlu0 %952 }
 0x49a   :  { %v987_v58 = vadd.f32 %v956_v10, %v953_v17 }
 0x49b   :  { %v962_v12 = vpop.xlane.xlu1 %961 }
 0x49d   :  { %v959_v13 = vpop.xlane.xlu0 %958 }
 0x49e   :  { %v988_v1 = vadd.f32 %v987_v58, %v959_v13 }
 0x49f   :  { %v968_v62 = vpop.xlane.xlu1 %967 }
 0x4a0   :  { %v989_v15 = vadd.f32 %v988_v1, %v962_v12 }
 0x4a1   :  { %v965_v16 = vpop.xlane.xlu0 %964 }
 0x4a2   :  { %v990_v38 = vadd.f32 %v989_v15, %v965_v16 }
 0x4a3   :  { %v974_v3 = vpop.xlane.xlu1 %973 }
 0x4a4   :  { %v991_v18 = vadd.f32 %v990_v38, %v968_v62 }
 0x4a5   :  { %v971_v45 = vpop.xlane.xlu0 %970 }
 0x4a6   :  { %v992_v4 = vadd.f32 %v991_v18, %v971_v45 }
 0x4a7   :  { %v980_v53 = vpop.xlane.xlu1 %979 }
 0x4a8   :  { %v993_v19 = vadd.f32 %v992_v4, %v974_v3 }
 0x4a9   :  { %v977_v9 = vpop.xlane.xlu0 %976 }
 0x4aa   :  { %v994_v60 = vadd.f32 %v993_v19, %v977_v9 }
 0x4ab   :  { %v986_v14 = vpop.xlane.xlu1 %985 }
 0x4ac   :  { %v995_v22 = vadd.f32 %v994_v60, %v980_v53 }
 0x4ad   :  { %v983_v25 = vpop.xlane.xlu0 %982 }
 0x4ae   :  { %v996_v47 = vadd.f32 %v995_v22, %v983_v25 }
 0x4b0   :  { %v997_v39 = vadd.f32 %v996_v47, %v986_v14 }
 0x4b2   :  { %v998_v29 = vrot.slane %v997_v39, 4 }
 0x4b4   :  { %v999_v32 = vadd.f32 %v998_v29, %v997_v39 }
 0x4b6   :  { %v1000_v21 = vrot.slane %v999_v32, 2 }
 0x4b8   :  { %v1001_v20 = vadd.f32 %v1000_v21, %v999_v32 }
 0x4ba   :  { %v1002_v36 = vrot.slane %v1001_v20, 1 }
 0x4bc   :  { %v1003_v26 = vadd.f32 %v1002_v36, %v1001_v20 }
 0x4be   :  { %v1004_v28 = vmul.f32 0.0006510417, %v1003_v26 }
 0x4c0   :  { %1006 = vst.msk [vmem:[#allocation2] sm:$0x1] %vm1005_vm1, %v1004_v28 }
 0x4c1   :  { %1465 = shalt.err (!%p1462_p4)
}
 0x4c2   :  { %1200 = dma.vmem_to_hbm [thread:$0]  %s1198_s11, 16, %s2097_s8, [#allocation3]   ;;  %v1253_v54 = vld [vmem:[%s2095_s6] ss:$0 sm:$0xff] }
 0x4cc   :  { %v1436_v42 = vpop.f32.mrf.mxu0 }
 0x4cd   :  { %v1124_v33 = vadd.f32 %v1436_v42, %v1253_v54 }
 0x4ce   :  { %v1118_v27 = vpop.f32.mrf.mxu0 }
 0x4cf   :  { %1178 = vst.msk [vmem:[%s2096_s7 + $0x8] sm:$0xff] %vm52_vm0, %v1124_v33  ;;  %v1119_v43 = vadd.f32 %v1253_v54, %v1118_v27 }
 0x4d0   :  { %v1439_v44 = vpop.f32.mrf.mxu0 }
 0x4d1   :  { %1177 = vst.msk [vmem:[%s2096_s7] sm:$0xff] %vm52_vm0, %v1119_v43  ;;  %v1134_v34 = vadd.f32 %v1439_v44, %v1253_v54 }
 0x4d2   :  { %v1128_v37 = vpop.f32.mrf.mxu0 }
 0x4d3   :  { %1180 = vst.msk [vmem:[%s2096_s7 + $0x18] sm:$0xff] %vm52_vm0, %v1134_v34  ;;  %v1129_v49 = vadd.f32 %v1253_v54, %v1128_v37 }
 0x4d4   :  { %v1442_v30 = vpop.f32.mrf.mxu0 }
 0x4d5   :  { %1179 = vst.msk [vmem:[%s2096_s7 + $0x10] sm:$0xff] %vm52_vm0, %v1129_v49  ;;  %v1144_v40 = vadd.f32 %v1442_v30, %v1253_v54 }
 0x4d6   :  { %v1138_v61 = vpop.f32.mrf.mxu0 }
 0x4d7   :  { %1182 = vst.msk [vmem:[%s2096_s7 + $0x28] sm:$0xff] %vm52_vm0, %v1144_v40  ;;  %v1139_v24 = vadd.f32 %v1253_v54, %v1138_v61 }
 0x4d8   :  { %v1445_v5 = vpop.f32.mrf.mxu0 }
 0x4d9   :  { %1181 = vst.msk [vmem:[%s2096_s7 + $0x20] sm:$0xff] %vm52_vm0, %v1139_v24  ;;  %v1154_v41 = vadd.f32 %v1445_v5, %v1253_v54 }
 0x4da   :  { %v1148_v55 = vpop.f32.mrf.mxu0 }
 0x4db   :  { %1184 = vst.msk [vmem:[%s2096_s7 + $0x38] sm:$0xff] %vm52_vm0, %v1154_v41  ;;  %v1149_v23 = vadd.f32 %v1253_v54, %v1148_v55 }
 0x4dc   :  { %v1448_v50 = vpop.f32.mrf.mxu0 }
 0x4dd   :  { %1183 = vst.msk [vmem:[%s2096_s7 + $0x30] sm:$0xff] %vm52_vm0, %v1149_v23  ;;  %v1164_v46 = vadd.f32 %v1448_v50, %v1253_v54 }
 0x4de   :  { %v1158_v31 = vpop.f32.mrf.mxu0 }
 0x4df   :  { %1186 = vst.msk [vmem:[%s2096_s7 + $0x48] sm:$0xff] %vm52_vm0, %v1164_v46  ;;  %v1159_v59 = vadd.f32 %v1253_v54, %v1158_v31 }
 0x4e0   :  { %v1451_v52 = vpop.f32.mrf.mxu0 }
 0x4e1   :  { %1185 = vst.msk [vmem:[%s2096_s7 + $0x40] sm:$0xff] %vm52_vm0, %v1159_v59  ;;  %v1174_v48 = vadd.f32 %v1451_v52, %v1253_v54 }
 0x4e2   :  { %v1168_v63 = vpop.f32.mrf.mxu0 }
 0x4e3   :  { %1188 = vst.msk [vmem:[%s2096_s7 + $0x58] sm:$0xff] %vm52_vm0, %v1174_v48  ;;  %v1169_v2 = vadd.f32 %v1253_v54, %v1168_v63 }
 0x4e5   :  { %1187 = vst.msk [vmem:[%s2096_s7 + $0x50] sm:$0xff] %vm52_vm0, %v1169_v2 }
 0x4e6   :  { %1474 = dma.done.wait [#allocation3], 16  }
 0x4e7   :  { %1475 = vsyncadd [#allocation3], 4294967280 }
 0x4e8   :  { %1206 = vsyncpa [#allocation3], 1 }

// kernel: vivit_forward.11
= control target key start
LH: loop header
LB: loop body
LE: loop exit
PB: predicated region body
PF: predicated region fallthrough
CT: control target
= control target key end

     0   :  { %s5054_s0 = inlined_call_operand.vmem [shape: f32[96,32], index: 0, kind: input, shape index: {}]   ;;  %s5055_s1 = inlined_call_operand.vmem [shape: f32[48,48], index: 1, kind: input, shape index: {}]   ;;  %s5056_s2 = inlined_call_operand.vmem [shape: f32[1,32], index: 2, kind: input, shape index: {}]   ;;  %s5057_s3 = inlined_call_operand.vmem [shape: f32[1,32], index: 3, kind: input, shape index: {}]   ;;  %s5058_s4 = inlined_call_operand.vmem [shape: f32[32,32], index: 4, kind: input, shape index: {}]   ;;  %s5059_s5 = inlined_call_operand.vmem [shape: f32[32,32], index: 5, kind: input, shape index: {}]   ;;  %s5060_s6 = inlined_call_operand.vmem [shape: f32[32,32], index: 6, kind: input, shape index: {}]   ;;  %s5061_s7 = inlined_call_operand.vmem [shape: f32[1,32], index: 7, kind: input, shape index: {}]   ;;  %s5062_s8 = inlined_call_operand.vmem [shape: f32[1,32], index: 8, kind: input, shape index: {}]   ;;  %s5063_s9 = inlined_call_operand.vmem [shape: f32[1,32], index: 9, kind: input, shape index: {}]   ;;  %s5064_s10 = inlined_call_operand.vmem [shape: f32[32,32], index: 10, kind: input, shape index: {}]   ;;  %s5065_s11 = inlined_call_operand.vmem [shape: f32[1,32], index: 11, kind: input, shape index: {}]   ;;  %s5066_s12 = inlined_call_operand.vmem [shape: f32[1,32], index: 12, kind: input, shape index: {}]   ;;  %s5067_s13 = inlined_call_operand.vmem [shape: f32[1,32], index: 13, kind: input, shape index: {}]   ;;  %s5068_s14 = inlined_call_operand.vmem [shape: f32[32,128], index: 14, kind: input, shape index: {}]   ;;  %s5069_s15 = inlined_call_operand.vmem [shape: f32[1,128], index: 15, kind: input, shape index: {}]   ;;  %s5070_s16 = inlined_call_operand.vmem [shape: f32[128,32], index: 16, kind: input, shape index: {}]   ;;  %s5071_s17 = inlined_call_operand.vmem [shape: f32[1,32], index: 17, kind: input, shape index: {}]   ;;  %s5072_s18 = inlined_call_operand.vmem [shape: f32[1,32], index: 18, kind: input, shape index: {}]   ;;  %s5073_s19 = inlined_call_operand.vmem [shape: f32[1,32], index: 19, kind: input, shape index: {}]   ;;  %s5074_s20 = inlined_call_operand.vmem [shape: f32[96,32], index: 20, kind: output, shape index: {}]  }
   0x1   :  { %5077 = sst [smem:[#allocation2_spill]] %s5054_s0 }
   0x2   :  { %5078 = sst [smem:[#allocation3_spill]] %s5055_s1  ;;  %s4092_s1 = smov 0  }
   0x3   :  { %5079 = sst [smem:[#allocation4_spill]] %s5056_s2 }
   0x4   :  { %5080 = sst [smem:[#allocation5_spill]] %s5057_s3 }
   0x5   :  { %5081 = sst [smem:[#allocation6_spill]] %s5058_s4 }
   0x6 LB: > { %s3222_s22 = sadd.s32 4294967295, %s3984_s1   ;;  %p3226_p0 = scmp.ge.s32.totalorder %s3984_s1, 1  ;;  %s3984_s1 = sphi %s4092_s1, %s30_s1  }
   0x7   : > { %p563_p1 = scmp.lt.s32.totalorder %s3984_s1, 3 }
   0x9   : > { %p564_p2 = pnand %p3226_p0, %p563_p1 }
   0xa   : > { %s621_s23 = smul.u32 (!%p564_p2), 6, %s3222_s22  ;;  %s5082_s3 = sld [smem:[#allocation2_spill]] (!%p564_p2) }
   0xb   : > { %567 = sbr.rel (%p564_p2) target bundleno = 3628 (0xe2c), region = 100  ;;  %s5083_s4 = sld [smem:[#allocation6_spill]] (!%p564_p2) }
   0xc   : > { %p622_p3 = scmp.lt.s32.totalorder (!%p564_p2), %s621_s23, 11  ;;  %s5084_s29 = sld [smem:[#allocation4_spill]] (!%p564_p2) }
   0xd   : > { %s5085_s21 = sld [smem:[#allocation5_spill]] (!%p564_p2) }
   0xe   : > { %s5086_s25 = sld [smem:[#allocation3_spill]] (!%p564_p2) }
  0x10   : > { %s5088_s23 = smov (!%p622_p3, %s621_s23), 11  ;;  %vm641_vm0 = vcmask 261120   ;;  %v872_v46 = vld [vmem:[%s5059_s5 + $0x18] sm:$0xff]  ;;  %vm1242_vm11 = vcmask 392192  }
  0x11   : > { %s3227_s24 = sshll.u32 %s5088_s23, 3  ;;  %v748_v42 = vld [vmem:[%s5083_s4 + $0x18] sm:$0xff]  ;;  %v747_v43 = vld [vmem:[%s5083_s4 + $0x10] sm:$0xff]  ;;  %v746_v44 = vld [vmem:[%s5083_s4 + $0x8] sm:$0xff] }
  0x12   : > { %s4108_s26 = scalar_lea.vmem %s5082_s3, %s3227_s24  ;;  %3513 = vmatprep.subr.mxu0 %v748_v42  ;;  %v745_v45 = vld [vmem:[%s5083_s4] sm:$0xff]  ;;  %s631_s0 = scalar_lea.vmem %s5074_s20, %s3227_s24 }
  0x13   : > { %v633_v0 = vld [vmem:[%s4108_s26] sm:$0xff]  ;;  %v635_v1 = vld [vmem:[%s4108_s26 + $0x10] sm:$0xff]  ;;  %v634_v2 = vld [vmem:[%s4108_s26 + $0x8] sm:$0xff]  ;;  %3514 = vmatpush3.msra.mxu0 %v748_v42 }
  0x14   : > { %v642_v3 = vsel %vm641_vm0, %v633_v0, 0.0  ;;  %v648_v4 = vsel %vm641_vm0, %v635_v1, 0.0  ;;  %v636_v5 = vld [vmem:[%s4108_s26 + $0x18] sm:$0xff]  ;;  %v645_v6 = vsel %vm641_vm0, %v634_v2, 0.0  ;;  %v637_v8 = vld [vmem:[%s4108_s26 + $0x20] sm:$0xff]  ;;  %v638_v9 = vld [vmem:[%s4108_s26 + $0x28] sm:$0xff]  ;;  %3515 = vmatprep.subr.mxu0 %v747_v43 }
  0x15   : > { %643 = vadd.xlane.f32.xlu0 %v642_v3  ;;  %649 = vadd.xlane.f32.xlu1 %v648_v4  ;;  %v651_v7 = vsel %vm641_vm0, %v636_v5, 0.0  ;;  %v654_v10 = vsel %vm641_vm0, %v637_v8, 0.0  ;;  %v657_v11 = vsel %vm641_vm0, %v638_v9, 0.0  ;;  %v3230_v4 = vld [vmem:[%s5085_s21] ss:$0 sm:$0xff] }
  0x16   : > { %3516 = vmatpush3.msra.mxu0 %v747_v43 }
  0x17   : > { %3517 = vmatprep.subr.mxu0 %v746_v44 }
  0x18   : > { %3518 = vmatpush3.msra.mxu0 %v746_v44 }
  0x19   : > { %646 = vadd.xlane.f32.xlu0 %v645_v6  ;;  %652 = vadd.xlane.f32.xlu1 %v651_v7 }
  0x1a   : > { %3519 = vmatprep.subr.mxu0 %v745_v45 }
  0x1b   : > { %3520 = vmatpush3.msra.mxu0 %v745_v45 }
  0x1c   : > { %3530 = vmatprep.subr.mxu0 %v872_v46 }
  0x1d   : > { %655 = vadd.xlane.f32.xlu0 %v654_v10  ;;  %658 = vadd.xlane.f32.xlu1 %v657_v11 }
  0x9e   : > { %v644_v12 = vpop.xlane.xlu0 %643  ;;  %v650_v13 = vpop.xlane.xlu1 %649 }
  0x9f   : > { %v661_v14 = vmul.f32 0.03125, %v644_v12  ;;  %v663_v15 = vmul.f32 0.03125, %v650_v13 }
  0xa1   : > { %v4122_v16 = vsub.f32 %v633_v0, %v661_v14  ;;  %v4124_v17 = vsub.f32 %v635_v1, %v663_v15 }
  0xa2   : > { %v647_v18 = vpop.xlane.xlu0 %646  ;;  %v653_v19 = vpop.xlane.xlu1 %652 }
  0xa3   : > { %v662_v20 = vmul.f32 0.03125, %v647_v18  ;;  %v664_v21 = vmul.f32 0.03125, %v653_v19  ;;  %v673_v22 = vmul.f32 %v4122_v16, %v4122_v16  ;;  %v675_v23 = vmul.f32 %v4124_v17, %v4124_v17  ;;  %v871_v19 = vld [vmem:[%s5059_s5 + $0x10] sm:$0xff] }
  0xa5   : > { %v4130_v24 = vsub.f32 %v634_v2, %v662_v20  ;;  %v4132_v25 = vsub.f32 %v636_v5, %v664_v21  ;;  %v679_v26 = vsel %vm641_vm0, %v673_v22, 0.0  ;;  %v685_v29 = vsel %vm641_vm0, %v675_v23, 0.0  ;;  %v3229_v2 = vld [vmem:[%s5084_s29] ss:$0 sm:$0xff]  ;;  %v870_v23 = vld [vmem:[%s5059_s5 + $0x8] sm:$0xff] }
  0xa6   : > { %680 = vadd.xlane.f32.xlu0 %v679_v26  ;;  %v656_v27 = vpop.xlane.xlu0 %655  ;;  %v659_v28 = vpop.xlane.xlu1 %658 }
  0xa7   : > { %v665_v30 = vmul.f32 0.03125, %v656_v27  ;;  %v666_v31 = vmul.f32 0.03125, %v659_v28  ;;  %v674_v32 = vmul.f32 %v4130_v24, %v4130_v24  ;;  %v676_v33 = vmul.f32 %v4132_v25, %v4132_v25  ;;  %v869_v27 = vld [vmem:[%s5059_s5] sm:$0xff] }
  0xa9   : > { %v4140_v34 = vsub.f32 %v637_v8, %v665_v30  ;;  %v4142_v35 = vsub.f32 %v638_v9, %v666_v31  ;;  %v682_v36 = vsel %vm641_vm0, %v674_v32, 0.0  ;;  %v688_v37 = vsel %vm641_vm0, %v676_v33, 0.0  ;;  %v977_v31 = vld [vmem:[%s5060_s6 + $0x10] sm:$0xff]  ;;  %v976_v32 = vld [vmem:[%s5060_s6 + $0x8] sm:$0xff]  ;;  %v975_v33 = vld [vmem:[%s5060_s6] sm:$0xff] }
  0xaa   : > { %686 = vadd.xlane.f32.xlu0 %v685_v29  ;;  %683 = vadd.xlane.f32.xlu1 %v682_v36  ;;  %v978_v29 = vld [vmem:[%s5060_s6 + $0x18] sm:$0xff]  ;;  %v3986_v36 = vmov 0.0  }
  0xab   : > { %v677_v38 = vmul.f32 %v4140_v34, %v4140_v34  ;;  %v678_v39 = vmul.f32 %v4142_v35, %v4142_v35 }
  0xad   : > { %v691_v40 = vsel %vm641_vm0, %v677_v38, 0.0  ;;  %v694_v41 = vsel %vm641_vm0, %v678_v39, 0.0  ;;  %v3231_v38 = vld [vmem:[%s5061_s7] ss:$0 sm:$0xff] }
  0xae   : > { %689 = vadd.xlane.f32.xlu1 %v688_v37  ;;  %692 = vadd.xlane.f32.xlu0 %v691_v40 }
  0xb2   : > { %695 = vadd.xlane.f32.xlu1 %v694_v41 }
 0x12f   : > { %v681_v47 = vpop.xlane.xlu0 %680 }
 0x130   : > { %v697_v48 = vmul.f32 0.03125, %v681_v47 }
 0x132   : > { %v703_v49 = vadd.f32 1e-05, %v697_v48 }
 0x133   : > { %v684_v50 = vpop.xlane.xlu1 %683  ;;  %v687_v51 = vpop.xlane.xlu0 %686 }
 0x134   : > { %3816 = vrsqrt.f32 %v703_v49  ;;  %v698_v52 = vmul.f32 0.03125, %v684_v50  ;;  %v699_v53 = vmul.f32 0.03125, %v687_v51 }
 0x136   : > { %v704_v54 = vadd.f32 1e-05, %v698_v52  ;;  %v705_v55 = vadd.f32 1e-05, %v699_v53 }
 0x137   : > { %v690_v56 = vpop.xlane.xlu1 %689  ;;  %v693_v57 = vpop.xlane.xlu0 %692 }
 0x138   : > { %3818 = vrsqrt.f32 %v704_v54  ;;  %v700_v58 = vmul.f32 0.03125, %v690_v56  ;;  %v701_v59 = vmul.f32 0.03125, %v693_v57 }
 0x139   : > { %3820 = vrsqrt.f32 %v705_v55 }
 0x13a   : > { %v706_v60 = vadd.f32 1e-05, %v700_v58  ;;  %v707_v61 = vadd.f32 1e-05, %v701_v59 }
 0x13b   : > { %v696_v62 = vpop.xlane.xlu1 %695 }
 0x13c   : > { %3822 = vrsqrt.f32 %v706_v60  ;;  %v702_v63 = vmul.f32 0.03125, %v696_v62 }
 0x13d   : > { %3824 = vrsqrt.f32 %v707_v61 }
 0x13e   : > { %v708_v0 = vadd.f32 1e-05, %v702_v63 }
 0x140   : > { %3826 = vrsqrt.f32 %v708_v0 }
 0x141   : > { %v3817_v1 = vpop.eup %3816 }
 0x142   : > { %v715_v3 = vmul.f32 %v3817_v1, %v4122_v16 }
 0x144   : > { %v727_v5 = vmul.f32 %v3229_v2, %v715_v3 }
 0x145   : > { %v3819_v6 = vpop.eup %3818 }
 0x146   : > { %v3821_v7 = vpop.eup %3820  ;;  %v739_v8 = vadd.f32 %v3230_v4, %v727_v5  ;;  %v716_v9 = vmul.f32 %v3819_v6, %v4130_v24 }
 0x147   : > { %v717_v10 = vmul.f32 %v3821_v7, %v4124_v17 }
 0x148   : > { %3521 = vmatprep.mubr.msk.f32.mxu0 %vm641_vm0, %v739_v8  ;;  %v728_v11 = vmul.f32 %v3229_v2, %v716_v9 }
 0x149   : > { %v3823_v12 = vpop.eup %3822  ;;  %v729_v13 = vmul.f32 %v3229_v2, %v717_v10 }
 0x14a   : > { %v3825_v14 = vpop.eup %3824  ;;  %v740_v15 = vadd.f32 %v3230_v4, %v728_v11  ;;  %v718_v16 = vmul.f32 %v3823_v12, %v4132_v25  ;;  %v3245_v12 = vld [vmem:[%s5063_s9] ss:$0 sm:$0xff] }
 0x14b   : > { %v741_v18 = vadd.f32 %v3230_v4, %v729_v13  ;;  %v719_v20 = vmul.f32 %v3825_v14, %v4140_v34  ;;  %v1087_v34 = vlaneseq }
 0x14c   : > { %3522 = vmatmul.mubr.msk.f32.vlgmr.msra.gmra.mxu0 %vm641_vm0, %v740_v15  ;;  %v730_v21 = vmul.f32 %v3229_v2, %v718_v16 }
 0x14d   : > { %v3827_v17 = vpop.eup %3826  ;;  %3531 = vmatpush3.msra.mxu0 %v872_v46  ;;  %3524 = vmatprep.mubr.msk.f32.mxu0 %vm641_vm0, %v741_v18  ;;  %v731_v22 = vmul.f32 %v3229_v2, %v719_v20 }
 0x14e   : > { %3532 = vmatprep.subr.mxu0 %v871_v19  ;;  %v742_v24 = vadd.f32 %v3230_v4, %v730_v21  ;;  %v720_v25 = vmul.f32 %v3827_v17, %v4142_v35  ;;  %v1088_v35 = vand.u32 127, %v1087_v34 }
 0x14f   : > { %3533 = vmatpush3.msra.mxu0 %v871_v19  ;;  %v743_v26 = vadd.f32 %v3230_v4, %v731_v22 }
 0x150   : > { %3525 = vmatmul.mubr.msk.f32.gmra.mxu0 %vm641_vm0, %v742_v24  ;;  %3534 = vmatprep.subr.mxu0 %v870_v23  ;;  %v732_v28 = vmul.f32 %v3229_v2, %v720_v25  ;;  %vm2074_vm1 = vcmp.ge.s32.totalorder %v1088_v35, 24  ;;  %vm2075_vm2 = vcmp.lt.s32.totalorder %v1088_v35, 32  ;;  %vm1748_vm4 = vcmp.ge.s32.totalorder %v1088_v35, 16 }
 0x151   : > { %3527 = vmatprep.mubr.msk.f32.mxu0 %vm641_vm0, %v743_v26  ;;  %3535 = vmatpush3.msra.mxu0 %v870_v23  ;;  %vm2076_vm3 = vmand %vm2074_vm1, %vm2075_vm2  ;;  %vm1749_vm5 = vcmp.lt.s32.totalorder %v1088_v35, 24  ;;  %vm1315_vm7 = vcmp.ge.s32.totalorder %v1088_v35, 8  ;;  %vm1316_vm8 = vcmp.lt.s32.totalorder %v1088_v35, 16  ;;  %vm1090_vm10 = vcmp.lt.s32.totalorder %v1088_v35, 8 }
 0x152   : > { %v744_v30 = vadd.f32 %v3230_v4, %v732_v28  ;;  %3536 = vmatprep.subr.mxu0 %v869_v27  ;;  %v4218_v37 = vsel %vm2076_vm3, 1.0, %v3986_v36  ;;  %vm1750_vm6 = vmand %vm1748_vm4, %vm1749_vm5  ;;  %v4237_v48 = vsel %vm1090_vm10, 1.0, %v3986_v36 }
 0x153   : > { %3537 = vmatpush3.msra.mxu0 %v869_v27  ;;  %v4223_v40 = vsel %vm1750_vm6, 1.0, %v3986_v36  ;;  %vm1317_vm9 = vmand %vm1315_vm7, %vm1316_vm8 }
 0x154   : > { %3528 = vmatmul.mubr.msk.f32.gmra.mxu0 %vm641_vm0, %v744_v30  ;;  %3547 = vmatprep.subr.mxu0 %v978_v29  ;;  %v4235_v46 = vsel %vm1317_vm9, 1.0, %v3986_v36 }
 0x155   : > { %3538 = vmatprep.mubr.msk.f32.mxu0 %vm641_vm0, %v739_v8 }
 0x158   : > { %3539 = vmatmul.mubr.msk.f32.vlgmr.msra.gmra.mxu0 %vm641_vm0, %v740_v15 }
 0x159   : > { %3541 = vmatprep.mubr.msk.f32.mxu0 %vm641_vm0, %v741_v18  ;;  %3548 = vmatpush3.msra.mxu0 %v978_v29 }
 0x15a   : > { %3549 = vmatprep.subr.mxu0 %v977_v31 }
 0x15b   : > { %3550 = vmatpush3.msra.mxu0 %v977_v31 }
 0x15c   : > { %3542 = vmatmul.mubr.msk.f32.gmra.mxu0 %vm641_vm0, %v742_v24  ;;  %3551 = vmatprep.subr.mxu0 %v976_v32 }
 0x15d   : > { %3544 = vmatprep.mubr.msk.f32.mxu0 %vm641_vm0, %v743_v26  ;;  %3552 = vmatpush3.msra.mxu0 %v976_v32 }
 0x15e   : > { %3553 = vmatprep.subr.mxu0 %v975_v33 }
 0x15f   : > { %3554 = vmatpush3.msra.mxu0 %v975_v33 }
 0x160   : > { %3545 = vmatmul.mubr.msk.f32.gmra.mxu0 %vm641_vm0, %v744_v30 }
 0x161   : > { %3555 = vmatprep.mubr.msk.f32.mxu0 %vm641_vm0, %v739_v8  ;;  %v3238_v8 = vld [vmem:[%s5062_s8] ss:$0 sm:$0xff] }
 0x164   : > { %3556 = vmatmul.mubr.msk.f32.vlgmr.msra.gmra.mxu0 %vm641_vm0, %v740_v15 }
 0x165   : > { %3558 = vmatprep.mubr.msk.f32.mxu0 %vm641_vm0, %v741_v18 }
 0x168   : > { %3559 = vmatmul.mubr.msk.f32.gmra.mxu0 %vm641_vm0, %v742_v24 }
 0x169   : > { %3561 = vmatprep.mubr.msk.f32.mxu0 %vm641_vm0, %v743_v26 }
 0x16c   : > { %3562 = vmatmul.mubr.msk.f32.gmra.mxu0 %vm641_vm0, %v744_v30 }
 0x20c   : > { %v3523_v39 = vpop.f32.mrf.mxu0 }
 0x20d   : > { %v4225_v41 = vadd.f32 %v3523_v39, %v3231_v38 }
 0x20e   : > { %v840_v42 = vpop.f32.mrf.mxu0 }
 0x20f   : > { %v4229_v43 = vmul.f32 %v4223_v40, %v4225_v41  ;;  %v4233_v44 = vmul.f32 %v4218_v37, %v4225_v41  ;;  %v841_v45 = vadd.f32 %v3231_v38, %v840_v42 }
 0x210   : > { %v3526_v47 = vpop.f32.mrf.mxu0 }
 0x211   : > { %v4239_v49 = vadd.f32 %v3526_v47, %v3231_v38  ;;  %v1093_v50 = vmul.f32 %v4237_v48, %v841_v45  ;;  %v1319_v51 = vmul.f32 %v4235_v46, %v841_v45  ;;  %v4244_v52 = vmul.f32 %v4223_v40, %v841_v45 }
 0x212   : > { %v850_v53 = vpop.f32.mrf.mxu0  ;;  %v4247_v54 = vmul.f32 %v4218_v37, %v841_v45 }
 0x213   : > { %v4249_v55 = vadd.f32 %v3231_v38, %v850_v53  ;;  %3576 = vmatprep.mubr.msk.f32.mxu1 %vm641_vm0, %v1093_v50  ;;  %3597 = vmatprep.mubr.msk.f32.mxu0 %vm641_vm0, %v1319_v51  ;;  %v4255_v57 = vmul.f32 %v4223_v40, %v4239_v49  ;;  %v4259_v58 = vmul.f32 %v4218_v37, %v4239_v49 }
 0x214   : > { %v3529_v56 = vpop.f32.mrf.mxu0  ;;  %v1320_v50 = vmul.f32 %v4235_v46, %v4225_v41  ;;  %v1094_v51 = vmul.f32 %v4237_v48, %v4225_v41  ;;  %v1096_v41 = vmul.f32 %v4237_v48, %v4239_v49 }
 0x215   : > { %v4261_v59 = vadd.f32 %v3529_v56, %v3231_v38  ;;  %v4265_v60 = vmul.f32 %v4223_v40, %v4249_v55  ;;  %v4269_v62 = vmul.f32 %v4218_v37, %v4249_v55  ;;  %v1095_v53 = vmul.f32 %v4237_v48, %v4249_v55 }
 0x216   : > { %v860_v61 = vpop.f32.mrf.mxu0  ;;  %v1321_v56 = vmul.f32 %v4235_v46, %v4249_v55  ;;  %v1322_v55 = vmul.f32 %v4235_v46, %v4239_v49 }
 0x217   : > { %v4271_v63 = vadd.f32 %v3231_v38, %v860_v61  ;;  %v4275_v0 = vmul.f32 %v4223_v40, %v4261_v59  ;;  %v4279_v2 = vmul.f32 %v4218_v37, %v4261_v59 }
 0x218   : > { %v3540_v1 = vpop.f32.mrf.mxu0 }
 0x219   : > { %v4283_v3 = vmul.f32 %v4223_v40, %v4271_v63  ;;  %v4287_v5 = vmul.f32 %v4218_v37, %v4271_v63  ;;  %v4365_v35 = vadd.f32 %v3540_v1, %v3238_v8 }
 0x21a   : > { %v946_v4 = vpop.f32.mrf.mxu0 }
 0x21b   : > { %v4385_v45 = vadd.f32 %v3238_v8, %v946_v4 }
 0x21c   : > { %v3543_v6 = vpop.f32.mrf.mxu0 }
 0x21d   : > { %v4313_v18 = vadd.f32 %v3543_v6, %v3238_v8 }
 0x21e   : > { %v956_v7 = vpop.f32.mrf.mxu0 }
 0x21f   : > { %v4341_v26 = vadd.f32 %v3238_v8, %v956_v7  ;;  %v1097_v7 = vmul.f32 %v4237_v48, %v4271_v63 }
 0x220   : > { %v3546_v9 = vpop.f32.mrf.mxu0 }
 0x221   : > { %v4292_v10 = vadd.f32 %v3546_v9, %v3238_v8 }
 0x222   : > { %v966_v11 = vpop.f32.mrf.mxu0 }
 0x223   : > { %v4297_v13 = vadd.f32 %v3238_v8, %v966_v11  ;;  %3564 = vmatprep.subr.msk.mxu1 %vm641_vm0, %v4292_v10  ;;  %3585 = vmatprep.subr.msk.mxu0 %vm641_vm0, %v4292_v10  ;;  %v1323_v8 = vmul.f32 %v4235_v46, %v4271_v63  ;;  %v1098_v11 = vmul.f32 %v4237_v48, %v4261_v59 }
 0x224   : > { %v3557_v14 = vpop.f32.mrf.mxu0  ;;  %3565 = vmatpush3.xpose.msk.msra.mxu1 %vm641_vm0, %v4292_v10  ;;  %3586 = vmatpush3.xpose.msk.msra.mxu0 %vm641_vm0, %v4292_v10  ;;  %v1324_v63 = vmul.f32 %v4235_v46, %v4261_v59 }
 0x225   : > { %v4307_v15 = vadd.f32 %v3557_v14, %v3245_v12  ;;  %3566 = vmatprep.subr.msk.mxu1 %vm641_vm0, %v4297_v13  ;;  %3587 = vmatprep.subr.msk.mxu0 %vm641_vm0, %v4297_v13 }
 0x226   : > { %v1052_v16 = vpop.f32.mrf.mxu0 }
 0x227   : > { %v4315_v19 = vadd.f32 %v3245_v12, %v1052_v16  ;;  %v4319_v20 = vmul.f32 %v4218_v37, %v4307_v15  ;;  %v4327_v17 = vmul.f32 %v4223_v40, %v4307_v15  ;;  %v1310_v14 = vmul.f32 %v4237_v48, %v4307_v15 }
 0x228   : > { %v3560_v21 = vpop.f32.mrf.mxu0  ;;  %3567 = vmatpush3.xpose.msk.msra.mxu1 %vm641_vm0, %v4297_v13  ;;  %3588 = vmatpush3.xpose.msk.msra.mxu0 %vm641_vm0, %v4297_v13 }
 0x229   : > { %v1068_v22 = vadd.f32 %v3560_v21, %v3245_v12  ;;  %3568 = vmatprep.subr.msk.mxu1 %vm641_vm0, %v4313_v18  ;;  %3589 = vmatprep.subr.msk.mxu0 %vm641_vm0, %v4313_v18  ;;  %v4335_v24 = vmul.f32 %v4218_v37, %v4315_v19  ;;  %v4339_v25 = vmul.f32 %v4223_v40, %v4315_v19 }
 0x22a   : > { %v1062_v23 = vpop.f32.mrf.mxu0  ;;  %v1516_v16 = vmul.f32 %v4235_v46, %v4315_v19  ;;  %v1309_v59 = vmul.f32 %v4237_v48, %v4315_v19 }
 0x22b   : > { %v1063_v27 = vadd.f32 %v3245_v12, %v1062_v23  ;;  %v4344_v28 = vmul.f32 %v4218_v37, %v1068_v22  ;;  %v4351_v30 = vmul.f32 %v4223_v40, %v1068_v22  ;;  %v1519_v4 = vmul.f32 %v4235_v46, %v1068_v22 }
 0x22c   : > { %v3563_v29 = vpop.f32.mrf.mxu0  ;;  %3569 = vmatpush3.xpose.msk.msra.mxu1 %vm641_vm0, %v4313_v18  ;;  %3590 = vmatpush3.xpose.msk.msra.mxu0 %vm641_vm0, %v4313_v18  ;;  %v1312_v6 = vmul.f32 %v4237_v48, %v1068_v22 }
 0x22d   : > { %v4353_v31 = vadd.f32 %v3563_v29, %v3245_v12  ;;  %3570 = vmatprep.subr.msk.mxu1 %vm641_vm0, %v4341_v26  ;;  %3591 = vmatprep.subr.msk.mxu0 %vm641_vm0, %v4341_v26  ;;  %v4360_v33 = vmul.f32 %v4218_v37, %v1063_v27  ;;  %v4363_v34 = vmul.f32 %v4223_v40, %v1063_v27 }
 0x22e   : > { %v1072_v32 = vpop.f32.mrf.mxu0  ;;  %v1518_v49 = vmul.f32 %v4235_v46, %v1063_v27  ;;  %v1311_v9 = vmul.f32 %v4237_v48, %v1063_v27 }
 0x22f   : > { %v1073_v36 = vadd.f32 %v3245_v12, %v1072_v32  ;;  %v4373_v38 = vmul.f32 %v4218_v37, %v4353_v31  ;;  %v1314_v47 = vmul.f32 %v4237_v48, %v4353_v31  ;;  %v1517_v12 = vmul.f32 %v4235_v46, %v4307_v15  ;;  %v4470_v32 = vld [vmem:[%s5086_s25 + $0x18] sm:$0xff] }
 0x230   : > { %3571 = vmatpush3.xpose.msk.msra.mxu1 %vm641_vm0, %v4341_v26  ;;  %3592 = vmatpush3.xpose.msk.msra.mxu0 %vm641_vm0, %v4341_v26  ;;  %v4449_v21 = vmul.f32 %v4223_v40, %v4353_v31 }
 0x231   : > { %3572 = vmatprep.subr.msk.mxu1 %vm641_vm0, %v4365_v35  ;;  %3593 = vmatprep.subr.msk.mxu0 %vm641_vm0, %v4365_v35  ;;  %v4380_v39 = vmul.f32 %v4218_v37, %v1073_v36  ;;  %v4383_v42 = vmul.f32 %v4223_v40, %v1073_v36  ;;  %v1521_v37 = vmul.f32 %v4235_v46, %v4353_v31  ;;  %v4462_v40 = vld [vmem:[%s5086_s25] sm:$0xff] }
 0x232   : > { %v1520_v61 = vmul.f32 %v4235_v46, %v1073_v36  ;;  %v1313_v1 = vmul.f32 %v4237_v48, %v1073_v36  ;;  %v4457_v46 = vld [vmem:[%s5086_s25 + $0x8] sm:$0xff] }
 0x234   : > { %3573 = vmatpush3.xpose.msk.msra.mxu1 %vm641_vm0, %v4365_v35  ;;  %3594 = vmatpush3.xpose.msk.msra.mxu0 %vm641_vm0, %v4365_v35 }
 0x235   : > { %3574 = vmatprep.subr.msk.mxu1 %vm641_vm0, %v4385_v45  ;;  %3595 = vmatprep.subr.msk.mxu0 %vm641_vm0, %v4385_v45 }
 0x238   : > { %3575 = vmatpush3.xpose.msk.msra.mxu1 %vm641_vm0, %v4385_v45  ;;  %3596 = vmatpush3.xpose.msk.msra.mxu0 %vm641_vm0, %v4385_v45 }
 0x239   : > { %3606 = vmatprep.subr.mxu1 %v1521_v37  ;;  %3627 = vmatprep.subr.mxu0 %v1314_v47 }
 0x23b   : > { %3577 = vmatmul.mubr.msk.f32.vlgmr.msra.gmra.mxu1 %vm641_vm0, %v1094_v51  ;;  %3598 = vmatmul.mubr.msk.f32.vlgmr.msra.gmra.mxu0 %vm641_vm0, %v1320_v50  ;;  %v4476_v50 = vld [vmem:[%s5086_s25 + $0x10] sm:$0xff] }
 0x23c   : > { %3579 = vmatprep.mubr.msk.f32.mxu1 %vm641_vm0, %v1095_v53  ;;  %3600 = vmatprep.mubr.msk.f32.mxu0 %vm641_vm0, %v1321_v56 }
 0x23d   : > { %3607 = vmatpush3.msra.mxu1 %v1521_v37  ;;  %3628 = vmatpush3.msra.mxu0 %v1314_v47 }
 0x23e   : > { %3608 = vmatprep.subr.mxu1 %v1520_v61  ;;  %3629 = vmatprep.subr.mxu0 %v1313_v1 }
 0x23f   : > { %3609 = vmatpush3.msra.mxu1 %v1520_v61  ;;  %3630 = vmatpush3.msra.mxu0 %v1313_v1 }
 0x240   : > { %3580 = vmatmul.mubr.msk.f32.gmra.mxu1 %vm641_vm0, %v1096_v41  ;;  %3601 = vmatmul.mubr.msk.f32.gmra.mxu0 %vm641_vm0, %v1322_v55  ;;  %v4484_v41 = vld [vmem:[%s5086_s25 + $0x28] sm:$0xff] }
 0x241   : > { %3610 = vmatprep.subr.mxu1 %v1519_v4  ;;  %3631 = vmatprep.subr.mxu0 %v1312_v6 }
 0x242   : > { %3582 = vmatprep.mubr.msk.f32.mxu1 %vm641_vm0, %v1097_v7  ;;  %3603 = vmatprep.mubr.msk.f32.mxu0 %vm641_vm0, %v1323_v8  ;;  %v4490_v7 = vld [vmem:[%s5086_s25 + $0x20] sm:$0xff] }
 0x243   : > { %3611 = vmatpush3.msra.mxu1 %v1519_v4  ;;  %3632 = vmatpush3.msra.mxu0 %v1312_v6 }
 0x244   : > { %3612 = vmatprep.subr.mxu1 %v1518_v49  ;;  %3633 = vmatprep.subr.mxu0 %v1311_v9 }
 0x245   : > { %3613 = vmatpush3.msra.mxu1 %v1518_v49  ;;  %3634 = vmatpush3.msra.mxu0 %v1311_v9 }
 0x246   : > { %3583 = vmatmul.mubr.msk.f32.gmra.mxu1 %vm641_vm0, %v1098_v11  ;;  %3604 = vmatmul.mubr.msk.f32.gmra.mxu0 %vm641_vm0, %v1324_v63 }
 0x247   : > { %3614 = vmatprep.subr.mxu1 %v1517_v12  ;;  %3635 = vmatprep.subr.mxu0 %v1310_v14 }
 0x248   : > { %3615 = vmatpush3.msra.mxu1 %v1517_v12  ;;  %3636 = vmatpush3.msra.mxu0 %v1310_v14 }
 0x249   : > { %3616 = vmatprep.subr.mxu1 %v1516_v16  ;;  %3637 = vmatprep.subr.mxu0 %v1309_v59 }
 0x24a   : > { %3617 = vmatpush3.msra.mxu1 %v1516_v16  ;;  %3638 = vmatpush3.msra.mxu0 %v1309_v59 }
 0x24b   : > { %3648 = vmatprep.subr.msk.mxu1 %vm641_vm0, %v4292_v10  ;;  %3669 = vmatprep.subr.mxu0 %v4449_v21 }
 0x2fb   : > { %v3599_v15 = vpop.f32.mrf.mxu0 }
 0x2fc   : > { %v1439_v48 = vmul.f32 0.35355338, %v3599_v15 }
 0x2fd   : > { %v1409_v19 = vpop.f32.mrf.mxu0 }
 0x2fe   : > { %v1438_v22 = vmul.f32 0.35355338, %v1409_v19  ;;  %v1445_v23 = vadd.f32 %v1439_v48, %v4457_v46 }
 0x300   : > { %v3602_v27 = vpop.f32.mrf.mxu0  ;;  %v1453_v29 = vsel %vm1242_vm11, %v1445_v23, -inf  ;;  %v1444_v31 = vadd.f32 %v1438_v22, %v4462_v40 }
 0x301   : > { %v1441_v36 = vmul.f32 0.35355338, %v3602_v27  ;;  %1454 = vmax.xlane.f32.xlu1 %v1453_v29 }
 0x302   : > { %v1419_v37 = vpop.f32.mrf.mxu0  ;;  %v1450_v47 = vsel %vm1242_vm11, %v1444_v31, -inf }
 0x303   : > { %v1440_v51 = vmul.f32 0.35355338, %v1419_v37  ;;  %1451 = vmax.xlane.f32.xlu0 %v1450_v47  ;;  %v1447_v53 = vadd.f32 %v1441_v36, %v4470_v32 }
 0x305   : > { %v1459_v56 = vsel %vm1242_vm11, %v1447_v53, -inf  ;;  %v1446_v61 = vadd.f32 %v1440_v51, %v4476_v50 }
 0x306   : > { %v3605_v1 = vpop.f32.mrf.mxu0  ;;  %1460 = vmax.xlane.f32.xlu1 %v1459_v56  ;;  %v3578_v56 = vpop.f32.mrf.mxu1 }
 0x307   : > { %v1443_v55 = vmul.f32 0.35355338, %v3605_v1  ;;  %v1456_v4 = vsel %vm1242_vm11, %v1446_v61, -inf }
 0x308   : > { %v1429_v6 = vpop.f32.mrf.mxu0  ;;  %1457 = vmax.xlane.f32.xlu0 %v1456_v4 }
 0x309   : > { %v1442_v8 = vmul.f32 0.35355338, %v1429_v6  ;;  %v1449_v49 = vadd.f32 %v1443_v55, %v4484_v41 }
 0x30b   : > { %v1465_v9 = vsel %vm1242_vm11, %v1449_v49, -inf  ;;  %v1448_v11 = vadd.f32 %v1442_v8, %v4490_v7 }
 0x30c   : > { %1466 = vmax.xlane.f32.xlu1 %v1465_v9 }
 0x30d   : > { %v1462_v63 = vsel %vm1242_vm11, %v1448_v11, -inf }
 0x30e   : > { %1463 = vmax.xlane.f32.xlu0 %v1462_v63 }
 0x38a   : > { %v1455_v12 = vpop.xlane.xlu1 %1454 }
 0x38b   : > { %v1469_v14 = vsub.f32 %v1445_v23, %v1455_v12 }
 0x38c   : > { %v1452_v16 = vpop.xlane.xlu0 %1451 }
 0x38d   : > { %v1476_v59 = vmul.f32 1.442695, %v1469_v14  ;;  %v1468_v15 = vsub.f32 %v1444_v31, %v1452_v16  ;;  %v1201_v31 = vpop.f32.mrf.mxu1 }
 0x38f   : > { %3828 = vpow2.f32 %v1476_v59  ;;  %v1474_v48 = vmul.f32 1.442695, %v1468_v15  ;;  %v1461_v19 = vpop.xlane.xlu1 %1460  ;;  %v3581_v9 = vpop.f32.mrf.mxu1  ;;  %v1230_v59 = vmul.f32 0.35355338, %v1201_v31 }
 0x390   : > { %v1471_v22 = vsub.f32 %v1447_v53, %v1461_v19  ;;  %v1233_v19 = vmul.f32 0.35355338, %v3581_v9 }
 0x391   : > { %3830 = vpow2.f32 %v1474_v48  ;;  %v1458_v27 = vpop.xlane.xlu0 %1457  ;;  %v1211_v14 = vpop.f32.mrf.mxu1 }
 0x392   : > { %v1480_v29 = vmul.f32 1.442695, %v1471_v22  ;;  %v1470_v36 = vsub.f32 %v1446_v61, %v1458_v27 }
 0x393   : > { %v3584_v48 = vpop.f32.mrf.mxu1 }
 0x394   : > { %3832 = vpow2.f32 %v1480_v29  ;;  %v1478_v37 = vmul.f32 1.442695, %v1470_v36  ;;  %v1232_v36 = vmul.f32 0.35355338, %v1211_v14 }
 0x395   : > { %v1467_v47 = vpop.xlane.xlu1 %1466 }
 0x396   : > { %3834 = vpow2.f32 %v1478_v37  ;;  %v1473_v51 = vsub.f32 %v1449_v49, %v1467_v47  ;;  %v4506_v47 = vadd.f32 %v1230_v59, %v4462_v40  ;;  %v4516_v31 = vadd.f32 %v1232_v36, %v4476_v50 }
 0x397   : > { %v1464_v1 = vpop.xlane.xlu0 %1463 }
 0x398   : > { %v1484_v55 = vmul.f32 1.442695, %v1473_v51  ;;  %v1472_v23 = vsub.f32 %v1448_v11, %v1464_v1  ;;  %v1231_v11 = vmul.f32 0.35355338, %v3578_v56  ;;  %v1221_v51 = vpop.f32.mrf.mxu1  ;;  %v1235_v56 = vmul.f32 0.35355338, %v3584_v48 }
 0x39a   : > { %3836 = vpow2.f32 %v1484_v55  ;;  %v1482_v4 = vmul.f32 1.442695, %v1472_v23  ;;  %v4502_v27 = vadd.f32 %v1231_v11, %v4457_v46  ;;  %v4511_v55 = vadd.f32 %v1233_v19, %v4470_v32 }
 0x39b   : > { %v1234_v23 = vmul.f32 0.35355338, %v1221_v51  ;;  %v4521_v9 = vadd.f32 %v1235_v56, %v4484_v41 }
 0x39c   : > { %v3829_v6 = vpop.eup %3828  ;;  %3838 = vpow2.f32 %v1482_v4  ;;  %v1246_v1 = vsel %vm1242_vm11, %v4502_v27, -inf  ;;  %v1243_v4 = vsel %vm1242_vm11, %v4506_v47, -inf }
 0x39d   : > { %v1489_v53 = vsel %vm1242_vm11, %v3829_v6, 0.0  ;;  %v1258_v14 = vsel %vm1242_vm11, %v4521_v9, -inf }
 0x39e   : > { %v3831_v8 = vpop.eup %3830  ;;  %1490 = vadd.xlane.f32.xlu1 %v1489_v53  ;;  %v1252_v53 = vsel %vm1242_vm11, %v4511_v55, -inf }
 0x39f   : > { %v1486_v61 = vsel %vm1242_vm11, %v3831_v8, 0.0 }
 0x3a0   : > { %1487 = vadd.xlane.f32.xlu0 %v1486_v61  ;;  %v1249_v61 = vsel %vm1242_vm11, %v4516_v31, -inf }
 0x3a1   : > { %v3833_v63 = vpop.eup %3832 }
 0x3a2   : > { %v1495_v49 = vsel %vm1242_vm11, %v3833_v63, 0.0 }
 0x3a3   : > { %v3835_v12 = vpop.eup %3834  ;;  %1496 = vadd.xlane.f32.xlu1 %v1495_v49  ;;  %v4526_v49 = vadd.f32 %v1234_v23, %v4490_v7 }
 0x3a4   : > { %v1492_v16 = vsel %vm1242_vm11, %v3835_v12, 0.0 }
 0x3a5   : > { %1493 = vadd.xlane.f32.xlu0 %v1492_v16  ;;  %v1255_v11 = vsel %vm1242_vm11, %v4526_v49, -inf }
 0x3a7   : > { %v3837_v15 = vpop.eup %3836 }
 0x3a8   : > { %v1501_v22 = vsel %vm1242_vm11, %v3837_v15, 0.0 }
 0x3a9   : > { %v3839_v29 = vpop.eup %3838  ;;  %1502 = vadd.xlane.f32.xlu1 %v1501_v22 }
 0x3aa   : > { %v1498_v37 = vsel %vm1242_vm11, %v3839_v29, 0.0 }
 0x3ab   : > { %1499 = vadd.xlane.f32.xlu0 %v1498_v37 }
 0x3ad   : > { %1247 = vmax.xlane.f32.xlu1 %v1246_v1 }
 0x3af   : > { %1244 = vmax.xlane.f32.xlu0 %v1243_v4 }
 0x3b1   : > { %1253 = vmax.xlane.f32.xlu1 %v1252_v53 }
 0x3b3   : > { %1250 = vmax.xlane.f32.xlu0 %v1249_v61 }
 0x3b5   : > { %1259 = vmax.xlane.f32.xlu1 %v1258_v14 }
 0x3b7   : > { %1256 = vmax.xlane.f32.xlu0 %v1255_v11 }
 0x427   : > { %v1491_v16 = vpop.xlane.xlu1 %1490 }
 0x428   : > { %3840 = vrcp.f32 %v1491_v16 }
 0x429   : > { %v1488_v59 = vpop.xlane.xlu0 %1487 }
 0x42a   : > { %3842 = vrcp.f32 %v1488_v59 }
 0x42c   : > { %v1497_v48 = vpop.xlane.xlu1 %1496 }
 0x42d   : > { %3844 = vrcp.f32 %v1497_v48 }
 0x42e   : > { %v1494_v19 = vpop.xlane.xlu0 %1493 }
 0x42f   : > { %3846 = vrcp.f32 %v1494_v19 }
 0x432   : > { %v1503_v22 = vpop.xlane.xlu1 %1502 }
 0x433   : > { %3848 = vrcp.f32 %v1503_v22 }
 0x434   : > { %v1500_v36 = vpop.xlane.xlu0 %1499 }
 0x435   : > { %3850 = vrcp.f32 %v1500_v36  ;;  %v3841_v37 = vpop.eup %3840 }
 0x436   : > { %v1507_v1 = vmul.f32 %v3841_v37, %v3829_v6 }
 0x437   : > { %v3843_v51 = vpop.eup %3842 }
 0x438   : > { %v1505_v56 = vmul.f32 %v3843_v51, %v3831_v8 }
 0x43a   : > { %3618 = vmatprep.mubr.msk.f32.mxu1 %vm1242_vm11, %v1505_v56  ;;  %v3845_v23 = vpop.eup %3844 }
 0x43b   : > { %3619 = vmatmul.mubr.msk.f32.vlgmr.msra.gmra.mxu1 %vm1242_vm11, %v1507_v1  ;;  %v1511_v61 = vmul.f32 %v3845_v23, %v3833_v63 }
 0x43c   : > { %v3847_v4 = vpop.eup %3846  ;;  %3649 = vmatpush3.xpose.msk.msra.mxu1 %vm641_vm0, %v4292_v10 }
 0x43d   : > { %3650 = vmatprep.subr.msk.mxu1 %vm641_vm0, %v4297_v13  ;;  %v1509_v53 = vmul.f32 %v3847_v4, %v3835_v12 }
 0x43f   : > { %3621 = vmatprep.mubr.msk.f32.mxu1 %vm1242_vm11, %v1509_v53 }
 0x440   : > { %3622 = vmatmul.mubr.msk.f32.gmra.mxu1 %vm1242_vm11, %v1511_v61  ;;  %v3849_v8 = vpop.eup %3848 }
 0x441   : > { %3651 = vmatpush3.xpose.msk.msra.mxu1 %vm641_vm0, %v4297_v13  ;;  %v1515_v11 = vmul.f32 %v3849_v8, %v3837_v15 }
 0x442   : > { %v3851_v6 = vpop.eup %3850  ;;  %3652 = vmatprep.subr.msk.mxu1 %vm641_vm0, %v4313_v18 }
 0x443   : > { %v1513_v14 = vmul.f32 %v3851_v6, %v3839_v29 }
 0x445   : > { %3624 = vmatprep.mubr.msk.f32.mxu1 %vm1242_vm11, %v1513_v14  ;;  %3653 = vmatpush3.xpose.msk.msra.mxu1 %vm641_vm0, %v4313_v18 }
 0x446   : > { %3625 = vmatmul.mubr.msk.f32.gmra.mxu1 %vm1242_vm11, %v1515_v11  ;;  %3654 = vmatprep.subr.msk.mxu1 %vm641_vm0, %v4341_v26 }
 0x447   : > { %3660 = vmatprep.mubr.msk.f32.mxu1 %vm641_vm0, %v4244_v52 }
 0x449   : > { %3655 = vmatpush3.xpose.msk.msra.mxu1 %vm641_vm0, %v4341_v26 }
 0x44a   : > { %3656 = vmatprep.subr.msk.mxu1 %vm641_vm0, %v4365_v35 }
 0x44d   : > { %3657 = vmatpush3.xpose.msk.msra.mxu1 %vm641_vm0, %v4365_v35 }
 0x44e   : > { %3658 = vmatprep.subr.msk.mxu1 %vm641_vm0, %v4385_v45 }
 0x451   : > { %3659 = vmatpush3.xpose.msk.msra.mxu1 %vm641_vm0, %v4385_v45 }
 0x452   : > { %3711 = vmatprep.subr.mxu1 %v4373_v38 }
 0x454   : > { %3661 = vmatmul.mubr.msk.f32.vlgmr.msra.gmra.mxu1 %vm641_vm0, %v4229_v43 }
 0x455   : > { %3663 = vmatprep.mubr.msk.f32.mxu1 %vm641_vm0, %v4265_v60  ;;  %3712 = vmatpush3.msra.mxu1 %v4373_v38 }
 0x456   : > { %3713 = vmatprep.subr.mxu1 %v4380_v39 }
 0x457   : > { %3714 = vmatpush3.msra.mxu1 %v4380_v39 }
 0x458   : > { %3664 = vmatmul.mubr.msk.f32.gmra.mxu1 %vm641_vm0, %v4255_v57  ;;  %3715 = vmatprep.subr.mxu1 %v4344_v28  ;;  %v1248_v57 = vpop.xlane.xlu1 %1247 }
 0x459   : > { %3666 = vmatprep.mubr.msk.f32.mxu1 %vm641_vm0, %v4283_v3  ;;  %3716 = vmatpush3.msra.mxu1 %v4344_v28  ;;  %v1245_v3 = vpop.xlane.xlu0 %1244 }
 0x45a   : > { %3717 = vmatprep.subr.mxu1 %v4360_v33 }
 0x45b   : > { %3718 = vmatpush3.msra.mxu1 %v4360_v33 }
 0x45c   : > { %3667 = vmatmul.mubr.msk.f32.gmra.mxu1 %vm641_vm0, %v4275_v0  ;;  %3719 = vmatprep.subr.mxu1 %v4319_v20  ;;  %v1254_v33 = vpop.xlane.xlu1 %1253  ;;  %v1262_v0 = vsub.f32 %v4502_v27, %v1248_v57 }
 0x45d   : > { %3720 = vmatpush3.msra.mxu1 %v4319_v20  ;;  %v1251_v38 = vpop.xlane.xlu0 %1250  ;;  %v1261_v20 = vsub.f32 %v4506_v47, %v1245_v3 }
 0x45e   : > { %3721 = vmatprep.subr.mxu1 %v4335_v24  ;;  %v1269_v63 = vmul.f32 1.442695, %v1262_v0  ;;  %v1263_v12 = vsub.f32 %v4516_v31, %v1251_v38 }
 0x45f   : > { %3722 = vmatpush3.msra.mxu1 %v4335_v24  ;;  %v1264_v24 = vsub.f32 %v4511_v55, %v1254_v33  ;;  %v1267_v16 = vmul.f32 1.442695, %v1261_v20 }
 0x460   : > { %v1260_v15 = vpop.xlane.xlu1 %1259  ;;  %3852 = vpow2.f32 %v1269_v63  ;;  %v1271_v36 = vmul.f32 1.442695, %v1263_v12 }
 0x461   : > { %v1273_v59 = vmul.f32 1.442695, %v1264_v24  ;;  %v1257_v48 = vpop.xlane.xlu0 %1256  ;;  %v1266_v27 = vsub.f32 %v4521_v9, %v1260_v15  ;;  %3854 = vpow2.f32 %v1267_v16 }
 0x462   : > { %v1265_v47 = vsub.f32 %v4526_v49, %v1257_v48 }
 0x463   : > { %3856 = vpow2.f32 %v1273_v59  ;;  %v1277_v56 = vmul.f32 1.442695, %v1266_v27 }
 0x464   : > { %3858 = vpow2.f32 %v1271_v36  ;;  %v1275_v53 = vmul.f32 1.442695, %v1265_v47 }
 0x465   : > { %3860 = vpow2.f32 %v1277_v56 }
 0x466   : > { %3862 = vpow2.f32 %v1275_v53 }
 0x46d   : > { %v4613_v63 = vpop.eup %3852 }
 0x46e   : > { %v4616_v15 = vpop.eup %3854  ;;  %v1282_v59 = vsel %vm1242_vm11, %v4613_v63, 0.0 }
 0x470   : > { %v4618_v16 = vpop.eup %3856 }
 0x471   : > { %v4622_v48 = vpop.eup %3858  ;;  %v1288_v27 = vsel %vm1242_vm11, %v4618_v16, 0.0 }
 0x472   : > { %v1285_v36 = vsel %vm1242_vm11, %v4622_v48, 0.0 }
 0x4fb   : > { %v4584_v43 = vpop.f32.mrf.mxu1 }
 0x4fd   : > { %v4586_v52 = vpop.f32.mrf.mxu1 }
 0x500   : > { %v4588_v60 = vpop.f32.mrf.mxu1 }
 0x502   : > { %v4590_v28 = vpop.f32.mrf.mxu1 }
 0x506   : > { %v4593_v39 = vpop.f32.mrf.mxu1 }
 0x508   : > { %v4598_v29 = vpop.f32.mrf.mxu1 }
 0x514   : > { %v3662_v19 = vpop.f32.mrf.mxu1 }
 0x515   : > { %v1872_v22 = vmul.f32 0.35355338, %v3662_v19  ;;  %v1279_v19 = vsel %vm1242_vm11, %v4616_v15, 0.0 }
 0x516   : > { %v1842_v37 = vpop.f32.mrf.mxu1 }
 0x517   : > { %v1871_v55 = vmul.f32 0.35355338, %v1842_v37  ;;  %v1878_v51 = vadd.f32 %v1872_v22, %v4457_v46  ;;  %v4628_v22 = vpop.eup %3860 }
 0x518   : > { %v3665_v31 = vpop.f32.mrf.mxu1  ;;  %v4632_v37 = vpop.eup %3862  ;;  %v1294_v47 = vsel %vm1242_vm11, %v4628_v22, 0.0 }
 0x519   : > { %v1874_v1 = vmul.f32 0.35355338, %v3665_v31  ;;  %v1886_v23 = vsel %vm1242_vm11, %v1878_v51, -inf  ;;  %v1877_v4 = vadd.f32 %v1871_v55, %v4462_v40  ;;  %v1291_v55 = vsel %vm1242_vm11, %v4632_v37, 0.0 }
 0x51a   : > { %1887 = vmax.xlane.f32.xlu1 %v1886_v23  ;;  %v1852_v9 = vpop.f32.mrf.mxu1 }
 0x51b   : > { %v1873_v61 = vmul.f32 0.35355338, %v1852_v9  ;;  %v1883_v8 = vsel %vm1242_vm11, %v1877_v4, -inf  ;;  %v1880_v49 = vadd.f32 %v1874_v1, %v4470_v32 }
 0x51c   : > { %v3668_v6 = vpop.f32.mrf.mxu1  ;;  %1884 = vmax.xlane.f32.xlu0 %v1883_v8 }
 0x51d   : > { %v1876_v14 = vmul.f32 0.35355338, %v3668_v6  ;;  %v1892_v11 = vsel %vm1242_vm11, %v1880_v49, -inf  ;;  %v1879_v57 = vadd.f32 %v1873_v61, %v4476_v50 }
 0x51e   : > { %1893 = vmax.xlane.f32.xlu1 %v1892_v11  ;;  %v1862_v3 = vpop.f32.mrf.mxu1 }
 0x51f   : > { %v1875_v33 = vmul.f32 0.35355338, %v1862_v3  ;;  %v1889_v0 = vsel %vm1242_vm11, %v1879_v57, -inf  ;;  %v1882_v38 = vadd.f32 %v1876_v14, %v4484_v41 }
 0x520   : > { %1890 = vmax.xlane.f32.xlu0 %v1889_v0 }
 0x521   : > { %v1898_v20 = vsel %vm1242_vm11, %v1882_v38, -inf  ;;  %v1881_v24 = vadd.f32 %v1875_v33, %v4490_v7 }
 0x522   : > { %1899 = vmax.xlane.f32.xlu1 %v1898_v20 }
 0x523   : > { %v1895_v12 = vsel %vm1242_vm11, %v1881_v24, -inf }
 0x524   : > { %1896 = vmax.xlane.f32.xlu0 %v1895_v12 }
 0x526   : > { %1283 = vadd.xlane.f32.xlu1 %v1282_v59 }
 0x528   : > { %1280 = vadd.xlane.f32.xlu0 %v1279_v19 }
 0x52a   : > { %1289 = vadd.xlane.f32.xlu1 %v1288_v27 }
 0x52c   : > { %1286 = vadd.xlane.f32.xlu0 %v1285_v36 }
 0x52e   : > { %1295 = vadd.xlane.f32.xlu1 %v1294_v47 }
 0x530   : > { %1292 = vadd.xlane.f32.xlu0 %v1291_v55 }
 0x5a3   : > { %v1888_v31 = vpop.xlane.xlu1 %1887 }
 0x5a4   : > { %v1902_v56 = vsub.f32 %v1878_v51, %v1888_v31 }
 0x5a5   : > { %v1885_v1 = vpop.xlane.xlu0 %1884 }
 0x5a6   : > { %v1909_v23 = vmul.f32 1.442695, %v1902_v56  ;;  %v1901_v9 = vsub.f32 %v1877_v4, %v1885_v1 }
 0x5a7   : > { %v1894_v53 = vpop.xlane.xlu1 %1893 }
 0x5a8   : > { %3864 = vpow2.f32 %v1909_v23  ;;  %v1907_v61 = vmul.f32 1.442695, %v1901_v9  ;;  %v1904_v8 = vsub.f32 %v1880_v49, %v1894_v53 }
 0x5a9   : > { %v1891_v6 = vpop.xlane.xlu0 %1890 }
 0x5aa   : > { %3866 = vpow2.f32 %v1907_v61  ;;  %v1913_v14 = vmul.f32 1.442695, %v1904_v8  ;;  %v1903_v11 = vsub.f32 %v1879_v57, %v1891_v6 }
 0x5ab   : > { %v1900_v3 = vpop.xlane.xlu1 %1899 }
 0x5ac   : > { %3868 = vpow2.f32 %v1913_v14  ;;  %v1911_v33 = vmul.f32 1.442695, %v1903_v11  ;;  %v1906_v0 = vsub.f32 %v1882_v38, %v1900_v3 }
 0x5ad   : > { %v1897_v20 = vpop.xlane.xlu0 %1896 }
 0x5ae   : > { %3870 = vpow2.f32 %v1911_v33  ;;  %v1917_v12 = vmul.f32 1.442695, %v1906_v0  ;;  %v1905_v59 = vsub.f32 %v1881_v24, %v1897_v20 }
 0x5af   : > { %v1284_v51 = vpop.xlane.xlu1 %1283 }
 0x5b0   : > { %3872 = vpow2.f32 %v1917_v12  ;;  %v1915_v19 = vmul.f32 1.442695, %v1905_v59 }
 0x5b1   : > { %3874 = vrcp.f32 %v1284_v51  ;;  %v1281_v4 = vpop.xlane.xlu0 %1280 }
 0x5b2   : > { %3876 = vpow2.f32 %v1915_v19 }
 0x5b3   : > { %3878 = vrcp.f32 %v1281_v4  ;;  %v1290_v49 = vpop.xlane.xlu1 %1289 }
 0x5b4   : > { %3880 = vrcp.f32 %v1290_v49 }
 0x5b5   : > { %v4638_v27 = vpop.eup %3864  ;;  %v1287_v57 = vpop.xlane.xlu0 %1286 }
 0x5b6   : > { %3882 = vrcp.f32 %v1287_v57  ;;  %v1922_v38 = vsel %vm1242_vm11, %v4638_v27, 0.0 }
 0x5b7   : > { %v4642_v36 = vpop.eup %3866  ;;  %1923 = vadd.xlane.f32.xlu1 %v1922_v38  ;;  %v1296_v24 = vpop.xlane.xlu1 %1295 }
 0x5b8   : > { %v1919_v47 = vsel %vm1242_vm11, %v4642_v36, 0.0  ;;  %3884 = vrcp.f32 %v1296_v24 }
 0x5b9   : > { %v4646_v55 = vpop.eup %3868  ;;  %1920 = vadd.xlane.f32.xlu0 %v1919_v47  ;;  %v1293_v31 = vpop.xlane.xlu0 %1292 }
 0x5ba   : > { %3886 = vrcp.f32 %v1293_v31  ;;  %v1928_v56 = vsel %vm1242_vm11, %v4646_v55, 0.0 }
 0x5bb   : > { %v3871_v1 = vpop.eup %3870  ;;  %1929 = vadd.xlane.f32.xlu1 %v1928_v56 }
 0x5bc   : > { %v1925_v23 = vsel %vm1242_vm11, %v3871_v1, 0.0 }
 0x5bd   : > { %v4651_v9 = vpop.eup %3872  ;;  %1926 = vadd.xlane.f32.xlu0 %v1925_v23 }
 0x5be   : > { %v3875_v53 = vpop.eup %3874  ;;  %v1934_v61 = vsel %vm1242_vm11, %v4651_v9, 0.0 }
 0x5bf   : > { %v3877_v8 = vpop.eup %3876  ;;  %1935 = vadd.xlane.f32.xlu1 %v1934_v61  ;;  %v1300_v33 = vmul.f32 %v3875_v53, %v4613_v63 }
 0x5c0   : > { %v3879_v6 = vpop.eup %3878  ;;  %v1931_v14 = vsel %vm1242_vm11, %v3877_v8, 0.0 }
 0x5c1   : > { %1932 = vadd.xlane.f32.xlu0 %v1931_v14  ;;  %v1298_v11 = vmul.f32 %v3879_v6, %v4616_v15  ;;  %v3881_v3 = vpop.eup %3880 }
 0x5c2   : > { %v1304_v59 = vmul.f32 %v3881_v3, %v4618_v16 }
 0x5c3   : > { %v3883_v0 = vpop.eup %3882  ;;  %3639 = vmatprep.mubr.msk.f32.mxu0 %vm1242_vm11, %v1298_v11 }
 0x5c4   : > { %3640 = vmatmul.mubr.msk.f32.vlgmr.msra.gmra.mxu0 %vm1242_vm11, %v1300_v33  ;;  %v1302_v20 = vmul.f32 %v3883_v0, %v4622_v48 }
 0x5c5   : > { %3670 = vmatpush3.msra.mxu0 %v4449_v21  ;;  %v3885_v12 = vpop.eup %3884 }
 0x5c6   : > { %3671 = vmatprep.subr.mxu0 %v4383_v42  ;;  %3642 = vmatprep.mubr.msk.f32.mxu0 %vm1242_vm11, %v1302_v20  ;;  %v1308_v21 = vmul.f32 %v3885_v12, %v4628_v22 }
 0x5c7   : > { %v3887_v15 = vpop.eup %3886  ;;  %3672 = vmatpush3.msra.mxu0 %v4383_v42 }
 0x5c8   : > { %3673 = vmatprep.subr.mxu0 %v4351_v30  ;;  %3643 = vmatmul.mubr.msk.f32.gmra.mxu0 %vm1242_vm11, %v1304_v59  ;;  %v1306_v63 = vmul.f32 %v3887_v15, %v4632_v37 }
 0x5c9   : > { %3674 = vmatpush3.msra.mxu0 %v4351_v30 }
 0x5ca   : > { %3675 = vmatprep.subr.mxu0 %v4363_v34  ;;  %3645 = vmatprep.mubr.msk.f32.mxu0 %vm1242_vm11, %v1306_v63 }
 0x5cb   : > { %3676 = vmatpush3.msra.mxu0 %v4363_v34 }
 0x5cc   : > { %3677 = vmatprep.subr.mxu0 %v4327_v17  ;;  %3646 = vmatmul.mubr.msk.f32.gmra.mxu0 %vm1242_vm11, %v1308_v21 }
 0x5cd   : > { %3678 = vmatpush3.msra.mxu0 %v4327_v17 }
 0x5ce   : > { %3679 = vmatprep.subr.mxu0 %v4339_v25 }
 0x5cf   : > { %3680 = vmatpush3.msra.mxu0 %v4339_v25 }
 0x5d0   : > { %3690 = vmatprep.subr.msk.mxu0 %vm641_vm0, %v4292_v10 }
 0x640   : > { %v1924_v30 = vpop.xlane.xlu1 %1923 }
 0x641   : > { %3888 = vrcp.f32 %v1924_v30 }
 0x642   : > { %v1921_v42 = vpop.xlane.xlu0 %1920 }
 0x643   : > { %3890 = vrcp.f32 %v1921_v42 }
 0x644   : > { %v1930_v16 = vpop.xlane.xlu1 %1929 }
 0x645   : > { %3892 = vrcp.f32 %v1930_v16 }
 0x646   : > { %v1927_v34 = vpop.xlane.xlu0 %1926 }
 0x647   : > { %3894 = vrcp.f32 %v1927_v34 }
 0x648   : > { %v1936_v48 = vpop.xlane.xlu1 %1935 }
 0x649   : > { %3896 = vrcp.f32 %v1936_v48 }
 0x64a   : > { %v1933_v22 = vpop.xlane.xlu0 %1932 }
 0x64b   : > { %3898 = vrcp.f32 %v1933_v22 }
 0x64e   : > { %v3889_v17 = vpop.eup %3888 }
 0x64f   : > { %v1940_v25 = vmul.f32 %v3889_v17, %v4638_v27 }
 0x650   : > { %v3891_v37 = vpop.eup %3890 }
 0x651   : > { %v1938_v51 = vmul.f32 %v3891_v37, %v4642_v36 }
 0x652   : > { %v3893_v19 = vpop.eup %3892 }
 0x653   : > { %3681 = vmatprep.mubr.msk.f32.mxu0 %vm1242_vm11, %v1938_v51  ;;  %v1944_v57 = vmul.f32 %v3893_v19, %v4646_v55 }
 0x654   : > { %v3895_v4 = vpop.eup %3894  ;;  %3682 = vmatmul.mubr.msk.f32.vlgmr.msra.gmra.mxu0 %vm1242_vm11, %v1940_v25 }
 0x655   : > { %3691 = vmatpush3.xpose.msk.msra.mxu0 %vm641_vm0, %v4292_v10  ;;  %v1942_v49 = vmul.f32 %v3895_v4, %v3871_v1 }
 0x656   : > { %3692 = vmatprep.subr.msk.mxu0 %vm641_vm0, %v4297_v13  ;;  %v3897_v38 = vpop.eup %3896 }
 0x657   : > { %3684 = vmatprep.mubr.msk.f32.mxu0 %vm1242_vm11, %v1942_v49  ;;  %v1948_v10 = vmul.f32 %v3897_v38, %v4651_v9 }
 0x658   : > { %v3899_v36 = vpop.eup %3898  ;;  %3685 = vmatmul.mubr.msk.f32.gmra.mxu0 %vm1242_vm11, %v1944_v57 }
 0x659   : > { %3693 = vmatpush3.xpose.msk.msra.mxu0 %vm641_vm0, %v4297_v13  ;;  %v1946_v27 = vmul.f32 %v3899_v36, %v3877_v8 }
 0x65a   : > { %3694 = vmatprep.subr.msk.mxu0 %vm641_vm0, %v4313_v18 }
 0x65b   : > { %3687 = vmatprep.mubr.msk.f32.mxu0 %vm1242_vm11, %v1946_v27 }
 0x65c   : > { %3688 = vmatmul.mubr.msk.f32.gmra.mxu0 %vm1242_vm11, %v1948_v10 }
 0x65d   : > { %3695 = vmatpush3.xpose.msk.msra.mxu0 %vm641_vm0, %v4313_v18  ;;  %3702 = vmatprep.mubr.msk.f32.mxu0 %vm641_vm0, %v4247_v54 }
 0x65e   : > { %3696 = vmatprep.subr.msk.mxu0 %vm641_vm0, %v4341_v26 }
 0x661   : > { %3697 = vmatpush3.xpose.msk.msra.mxu0 %vm641_vm0, %v4341_v26 }
 0x662   : > { %3698 = vmatprep.subr.msk.mxu0 %vm641_vm0, %v4365_v35 }
 0x665   : > { %3699 = vmatpush3.xpose.msk.msra.mxu0 %vm641_vm0, %v4365_v35 }
 0x666   : > { %3700 = vmatprep.subr.msk.mxu0 %vm641_vm0, %v4385_v45 }
 0x669   : > { %3701 = vmatpush3.xpose.msk.msra.mxu0 %vm641_vm0, %v4385_v45 }
 0x66c   : > { %3703 = vmatmul.mubr.msk.f32.vlgmr.msra.gmra.mxu0 %vm641_vm0, %v4233_v44 }
 0x66d   : > { %3705 = vmatprep.mubr.msk.f32.mxu0 %vm641_vm0, %v4269_v62 }
 0x670   : > { %3706 = vmatmul.mubr.msk.f32.gmra.mxu0 %vm641_vm0, %v4259_v58 }
 0x671   : > { %3708 = vmatprep.mubr.msk.f32.mxu0 %vm641_vm0, %v4287_v5 }
 0x674   : > { %3709 = vmatmul.mubr.msk.f32.gmra.mxu0 %vm641_vm0, %v4279_v2 }
 0x684   : > { %v3641_v54 = vpop.f32.mrf.mxu0 }
 0x685   : > { %v1725_v44 = vadd.f32 %v3641_v54, %v4584_v43 }
 0x686   : > { %v1719_v13 = vpop.f32.mrf.mxu0 }
 0x687   : > { %v1720_v62 = vadd.f32 %v1719_v13, %v4586_v52 }
 0x688   : > { %v3644_v18 = vpop.f32.mrf.mxu0 }
 0x689   : > { %v1735_v5 = vadd.f32 %v3644_v18, %v4588_v60 }
 0x68a   : > { %v1729_v26 = vpop.f32.mrf.mxu0 }
 0x68b   : > { %v1730_v31 = vadd.f32 %v1729_v26, %v4590_v28 }
 0x68c   : > { %v3647_v35 = vpop.f32.mrf.mxu0 }
 0x68d   : > { %v1745_v23 = vadd.f32 %v3647_v35, %v4593_v39 }
 0x68e   : > { %v4725_v45 = vpop.f32.mrf.mxu0 }
 0x714   : > { %v3683_v24 = vpop.f32.mrf.mxu0 }
 0x715   : > { %v4729_v47 = vadd.f32 %v3683_v24, %v1725_v44 }
 0x716   : > { %v2039_v58 = vpop.f32.mrf.mxu0 }
 0x717   : > { %v4732_v55 = vadd.f32 %v2039_v58, %v1720_v62 }
 0x718   : > { %v3686_v2 = vpop.f32.mrf.mxu0 }
 0x719   : > { %v4735_v56 = vadd.f32 %v3686_v2, %v1735_v5 }
 0x71a   : > { %v2049_v1 = vpop.f32.mrf.mxu0 }
 0x71b   : > { %v4738_v9 = vadd.f32 %v2049_v1, %v1730_v31 }
 0x71c   : > { %v3689_v43 = vpop.f32.mrf.mxu0 }
 0x71d   : > { %v4740_v53 = vadd.f32 %v3689_v43, %v1745_v23  ;;  %v2403_v23 = vld [vmem:[%s5064_s10 + $0x18] sm:$0xff] }
 0x71e   : > { %v4742_v52 = vpop.f32.mrf.mxu0  ;;  %3732 = vmatprep.subr.mxu1 %v2403_v23 }
 0x72c   : > { %v3704_v61 = vpop.f32.mrf.mxu0 }
 0x72d   : > { %v2198_v8 = vmul.f32 0.35355338, %v3704_v61 }
 0x72e   : > { %v2168_v60 = vpop.f32.mrf.mxu0 }
 0x72f   : > { %v2197_v6 = vmul.f32 0.35355338, %v2168_v60  ;;  %v2204_v14 = vadd.f32 %v2198_v8, %v4457_v46 }
 0x730   : > { %v3707_v11 = vpop.f32.mrf.mxu0 }
 0x731   : > { %v2200_v28 = vmul.f32 0.35355338, %v3707_v11  ;;  %v2212_v3 = vsel %vm1242_vm11, %v2204_v14, -inf  ;;  %v2203_v33 = vadd.f32 %v2197_v6, %v4462_v40 }
 0x732   : > { %2213 = vmax.xlane.f32.xlu1 %v2212_v3  ;;  %v2178_v39 = vpop.f32.mrf.mxu0 }
 0x733   : > { %v2199_v0 = vmul.f32 0.35355338, %v2178_v39  ;;  %v2209_v20 = vsel %vm1242_vm11, %v2203_v33, -inf  ;;  %v2206_v12 = vadd.f32 %v2200_v28, %v4470_v32 }
 0x734   : > { %2210 = vmax.xlane.f32.xlu0 %v2209_v20  ;;  %v3710_v59 = vpop.f32.mrf.mxu0 }
 0x735   : > { %v2202_v15 = vmul.f32 0.35355338, %v3710_v59  ;;  %v2218_v63 = vsel %vm1242_vm11, %v2206_v12, -inf  ;;  %v2205_v46 = vadd.f32 %v2199_v0, %v4476_v50  ;;  %v2402_v0 = vld [vmem:[%s5064_s10 + $0x10] sm:$0xff]  ;;  %v2401_v59 = vld [vmem:[%s5064_s10 + $0x8] sm:$0xff] }
 0x736   : > { %2219 = vmax.xlane.f32.xlu1 %v2218_v63  ;;  %v2188_v21 = vpop.f32.mrf.mxu0 }
 0x737   : > { %v2201_v30 = vmul.f32 0.35355338, %v2188_v21  ;;  %v2215_v42 = vsel %vm1242_vm11, %v2205_v46, -inf  ;;  %v2208_v40 = vadd.f32 %v2202_v15, %v4484_v41 }
 0x738   : > { %2216 = vmax.xlane.f32.xlu0 %v2215_v42  ;;  %v2400_v42 = vld [vmem:[%s5064_s10] sm:$0xff] }
 0x739   : > { %v2224_v16 = vsel %vm1242_vm11, %v2208_v40, -inf  ;;  %v2207_v34 = vadd.f32 %v2201_v30, %v4490_v7 }
 0x73a   : > { %2225 = vmax.xlane.f32.xlu1 %v2224_v16 }
 0x73b   : > { %v2221_v32 = vsel %vm1242_vm11, %v2207_v34, -inf }
 0x73c   : > { %2222 = vmax.xlane.f32.xlu0 %v2221_v32 }
 0x7bb   : > { %v2214_v48 = vpop.xlane.xlu1 %2213 }
 0x7bc   : > { %v2228_v22 = vsub.f32 %v2204_v14, %v2214_v48 }
 0x7bd   : > { %v2211_v17 = vpop.xlane.xlu0 %2210 }
 0x7be   : > { %v2235_v50 = vmul.f32 1.442695, %v2228_v22  ;;  %v2227_v37 = vsub.f32 %v2203_v33, %v2211_v17  ;;  %v1740_v17 = vadd.f32 %v4725_v45, %v4598_v29  ;;  %v3330_v45 = vld [vmem:[%s5065_s11] ss:$0 sm:$0xff] }
 0x7bf   : > { %v2220_v51 = vpop.xlane.xlu1 %2219 }
 0x7c0   : > { %3900 = vpow2.f32 %v2235_v50  ;;  %v2233_v25 = vmul.f32 1.442695, %v2227_v37  ;;  %v2230_v19 = vsub.f32 %v2206_v12, %v2220_v51 }
 0x7c1   : > { %v2217_v4 = vpop.xlane.xlu0 %2216 }
 0x7c2   : > { %3902 = vpow2.f32 %v2233_v25  ;;  %v2239_v41 = vmul.f32 1.442695, %v2230_v19  ;;  %v2229_v49 = vsub.f32 %v2205_v46, %v2217_v4 }
 0x7c3   : > { %v2226_v57 = vpop.xlane.xlu1 %2225 }
 0x7c4   : > { %3904 = vpow2.f32 %v2239_v41  ;;  %v2237_v7 = vmul.f32 1.442695, %v2229_v49  ;;  %v2232_v38 = vsub.f32 %v2208_v40, %v2226_v57  ;;  %v3973_v41 = vld [vmem:[%s4108_s26] sm:$0xff] }
 0x7c5   : > { %v2223_v36 = vpop.xlane.xlu0 %2222 }
 0x7c6   : > { %3906 = vpow2.f32 %v2237_v7  ;;  %v2243_v27 = vmul.f32 1.442695, %v2232_v38  ;;  %v2231_v10 = vsub.f32 %v2207_v34, %v2223_v36  ;;  %v3974_v7 = vld [vmem:[%s4108_s26 + $0x18] sm:$0xff] }
 0x7c8   : > { %3908 = vpow2.f32 %v2243_v27  ;;  %v2241_v54 = vmul.f32 1.442695, %v2231_v10 }
 0x7ca   : > { %3910 = vpow2.f32 %v2241_v54  ;;  %v3975_v54 = vld [vmem:[%s4108_s26 + $0x10] sm:$0xff] }
 0x7cd   : > { %v3901_v13 = vpop.eup %3900 }
 0x7ce   : > { %v2248_v18 = vsel %vm1242_vm11, %v3901_v13, 0.0 }
 0x7cf   : > { %v3903_v26 = vpop.eup %3902  ;;  %2249 = vadd.xlane.f32.xlu1 %v2248_v18 }
 0x7d0   : > { %v2245_v35 = vsel %vm1242_vm11, %v3903_v26, 0.0 }
 0x7d1   : > { %v3905_v44 = vpop.eup %3904  ;;  %2246 = vadd.xlane.f32.xlu0 %v2245_v35 }
 0x7d2   : > { %v2254_v24 = vsel %vm1242_vm11, %v3905_v44, 0.0 }
 0x7d3   : > { %v3907_v62 = vpop.eup %3906  ;;  %2255 = vadd.xlane.f32.xlu1 %v2254_v24 }
 0x7d4   : > { %v2251_v58 = vsel %vm1242_vm11, %v3907_v62, 0.0 }
 0x7d5   : > { %v3909_v5 = vpop.eup %3908  ;;  %2252 = vadd.xlane.f32.xlu0 %v2251_v58 }
 0x7d6   : > { %v2260_v2 = vsel %vm1242_vm11, %v3909_v5, 0.0 }
 0x7d7   : > { %v3911_v31 = vpop.eup %3910  ;;  %2261 = vadd.xlane.f32.xlu1 %v2260_v2  ;;  %v3977_v2 = vld [vmem:[%s4108_s26 + $0x20] sm:$0xff] }
 0x7d8   : > { %v2257_v1 = vsel %vm1242_vm11, %v3911_v31, 0.0 }
 0x7d9   : > { %2258 = vadd.xlane.f32.xlu0 %v2257_v1 }
 0x858   : > { %v2250_v43 = vpop.xlane.xlu1 %2249 }
 0x859   : > { %3912 = vrcp.f32 %v2250_v43 }
 0x85a   : > { %v2247_v61 = vpop.xlane.xlu0 %2246 }
 0x85b   : > { %3914 = vrcp.f32 %v2247_v61 }
 0x85c   : > { %v2256_v8 = vpop.xlane.xlu1 %2255 }
 0x85d   : > { %3916 = vrcp.f32 %v2256_v8 }
 0x85e   : > { %v2253_v60 = vpop.xlane.xlu0 %2252 }
 0x85f   : > { %3918 = vrcp.f32 %v2253_v60 }
 0x860   : > { %v2262_v6 = vpop.xlane.xlu1 %2261 }
 0x861   : > { %3920 = vrcp.f32 %v2262_v6 }
 0x862   : > { %v2259_v14 = vpop.xlane.xlu0 %2258 }
 0x863   : > { %3922 = vrcp.f32 %v2259_v14 }
 0x866   : > { %v3913_v11 = vpop.eup %3912 }
 0x867   : > { %v2266_v33 = vmul.f32 %v3913_v11, %v3901_v13 }
 0x868   : > { %v3915_v28 = vpop.eup %3914 }
 0x869   : > { %v2264_v3 = vmul.f32 %v3915_v28, %v3903_v26 }
 0x86a   : > { %v3917_v39 = vpop.eup %3916 }
 0x86b   : > { %3723 = vmatprep.mubr.msk.f32.mxu1 %vm1242_vm11, %v2264_v3  ;;  %v2270_v15 = vmul.f32 %v3917_v39, %v3905_v44  ;;  %v3976_v44 = vld [vmem:[%s4108_s26 + $0x28] sm:$0xff] }
 0x86c   : > { %v3919_v20 = vpop.eup %3918  ;;  %3724 = vmatmul.mubr.msk.f32.vlgmr.msra.gmra.mxu1 %vm1242_vm11, %v2266_v33 }
 0x86d   : > { %v2268_v12 = vmul.f32 %v3919_v20, %v3907_v62  ;;  %3733 = vmatpush3.msra.mxu1 %v2403_v23 }
 0x86e   : > { %3734 = vmatprep.subr.mxu1 %v2402_v0  ;;  %v3921_v63 = vpop.eup %3920 }
 0x86f   : > { %3726 = vmatprep.mubr.msk.f32.mxu1 %vm1242_vm11, %v2268_v12  ;;  %3735 = vmatpush3.msra.mxu1 %v2402_v0  ;;  %v2274_v30 = vmul.f32 %v3921_v63, %v3909_v5 }
 0x870   : > { %v3923_v46 = vpop.eup %3922  ;;  %3727 = vmatmul.mubr.msk.f32.gmra.mxu1 %vm1242_vm11, %v2270_v15  ;;  %3736 = vmatprep.subr.mxu1 %v2401_v59 }
 0x871   : > { %v2272_v21 = vmul.f32 %v3923_v46, %v3911_v31  ;;  %3737 = vmatpush3.msra.mxu1 %v2401_v59 }
 0x872   : > { %3738 = vmatprep.subr.mxu1 %v2400_v42 }
 0x873   : > { %3729 = vmatprep.mubr.msk.f32.mxu1 %vm1242_vm11, %v2272_v21  ;;  %3739 = vmatpush3.msra.mxu1 %v2400_v42 }
 0x874   : > { %3730 = vmatmul.mubr.msk.f32.gmra.mxu1 %vm1242_vm11, %v2274_v30 }
 0x92c   : > { %v3725_v40 = vpop.f32.mrf.mxu1 }
 0x92d   : > { %v2395_v32 = vadd.f32 %v3725_v40, %v4729_v47 }
 0x92e   : > { %v2365_v16 = vpop.f32.mrf.mxu1 }
 0x92f   : > { %v2394_v34 = vadd.f32 %v2365_v16, %v4732_v55  ;;  %v2072_v55 = vadd.f32 %v4742_v52, %v1740_v17 }
 0x930   : > { %v3728_v48 = vpop.f32.mrf.mxu1 }
 0x931   : > { %3740 = vmatprep.mubr.msk.f32.mxu1 %vm641_vm0, %v2394_v34  ;;  %v2397_v37 = vadd.f32 %v3728_v48, %v4735_v56  ;;  %v3972_v56 = vld [vmem:[%s4108_s26 + $0x8] sm:$0xff] }
 0x932   : > { %v2375_v22 = vpop.f32.mrf.mxu1  ;;  %3741 = vmatmul.mubr.msk.f32.vlgmr.msra.gmra.mxu1 %vm641_vm0, %v2395_v32 }
 0x933   : > { %v2396_v50 = vadd.f32 %v2375_v22, %v4738_v9 }
 0x934   : > { %v3731_v51 = vpop.f32.mrf.mxu1 }
 0x935   : > { %3743 = vmatprep.mubr.msk.f32.mxu1 %vm641_vm0, %v2396_v50  ;;  %v2399_v19 = vadd.f32 %v3731_v51, %v4740_v53 }
 0x936   : > { %v2385_v47 = vpop.f32.mrf.mxu1  ;;  %3744 = vmatmul.mubr.msk.f32.gmra.mxu1 %vm641_vm0, %v2397_v37 }
 0x937   : > { %v2398_v25 = vadd.f32 %v2385_v47, %v2072_v55  ;;  %v2643_v47 = vld [vmem:[%s5068_s14 + $0x18] sm:$0xff] }
 0x938   : > { %3749 = vmatprep.subr.mxu0 %v2643_v47 }
 0x939   : > { %3746 = vmatprep.mubr.msk.f32.mxu1 %vm641_vm0, %v2398_v25  ;;  %v2642_v25 = vld [vmem:[%s5068_s14 + $0x10] sm:$0xff]  ;;  %3750 = vmatpush3.msra.mxu0 %v2643_v47  ;;  %v2931_v47 = vld [vmem:[%s5070_s16 + $0x28] sm:$0xff] }
 0x93a   : > { %3747 = vmatmul.mubr.msk.f32.gmra.mxu1 %vm641_vm0, %v2399_v19  ;;  %v2641_v19 = vld [vmem:[%s5068_s14 + $0x8] sm:$0xff]  ;;  %3751 = vmatprep.subr.mxu0 %v2642_v25 }
 0x93b   : > { %3752 = vmatpush3.msra.mxu0 %v2642_v25  ;;  %v2930_v25 = vld [vmem:[%s5070_s16 + $0x20] sm:$0xff] }
 0x93c   : > { %3753 = vmatprep.subr.mxu0 %v2641_v19 }
 0x93d   : > { %3754 = vmatpush3.msra.mxu0 %v2641_v19  ;;  %v2929_v19 = vld [vmem:[%s5070_s16 + $0x18] sm:$0xff] }
 0x9f2   : > { %v3742_v29 = vpop.f32.mrf.mxu1 }
 0x9f3   : > { %v2518_v9 = vadd.f32 %v3972_v56, %v3742_v29  ;;  %v2640_v29 = vld [vmem:[%s5068_s14] sm:$0xff] }
 0x9f4   : > { %v2488_v52 = vpop.f32.mrf.mxu1  ;;  %3755 = vmatprep.subr.mxu0 %v2640_v29 }
 0x9f5   : > { %v4798_v4 = vadd.f32 %v3330_v45, %v2518_v9  ;;  %v2517_v49 = vadd.f32 %v3973_v41, %v2488_v52  ;;  %3756 = vmatpush3.msra.mxu0 %v2640_v29  ;;  %v2928_v29 = vld [vmem:[%s5070_s16 + $0x10] sm:$0xff] }
 0x9f6   : > { %v3745_v57 = vpop.f32.mrf.mxu1 }
 0x9f7   : > { %v4801_v53 = vadd.f32 %v3330_v45, %v2517_v49  ;;  %v2520_v38 = vadd.f32 %v3974_v7, %v3745_v57  ;;  %v2541_v36 = vsel %vm641_vm0, %v4798_v4, 0.0 }
 0x9f8   : > { %2542 = vadd.xlane.f32.xlu1 %v2541_v36  ;;  %v2498_v27 = vpop.f32.mrf.mxu1 }
 0x9f9   : > { %v4806_v10 = vadd.f32 %v3330_v45, %v2520_v38  ;;  %v2519_v13 = vadd.f32 %v3975_v54, %v2498_v27  ;;  %v2538_v18 = vsel %vm641_vm0, %v4801_v53, 0.0 }
 0x9fa   : > { %2539 = vadd.xlane.f32.xlu0 %v2538_v18  ;;  %v3748_v26 = vpop.f32.mrf.mxu1 }
 0x9fb   : > { %v4811_v35 = vadd.f32 %v3330_v45, %v2519_v13  ;;  %v2522_v24 = vadd.f32 %v3976_v44, %v3748_v26  ;;  %v2547_v62 = vsel %vm641_vm0, %v4806_v10, 0.0 }
 0x9fc   : > { %2548 = vadd.xlane.f32.xlu1 %v2547_v62  ;;  %v2508_v58 = vpop.f32.mrf.mxu1 }
 0x9fd   : > { %v4816_v5 = vadd.f32 %v3330_v45, %v2522_v24  ;;  %v2521_v31 = vadd.f32 %v3977_v2, %v2508_v58  ;;  %v2544_v1 = vsel %vm641_vm0, %v4811_v35, 0.0  ;;  %v3331_v2 = vld [vmem:[%s5066_s12] ss:$0 sm:$0xff] }
 0x9fe   : > { %2545 = vadd.xlane.f32.xlu0 %v2544_v1 }
 0x9ff   : > { %v4821_v23 = vadd.f32 %v3330_v45, %v2521_v31  ;;  %v2553_v43 = vsel %vm641_vm0, %v4816_v5, 0.0 }
 0xa00   : > { %2554 = vadd.xlane.f32.xlu1 %v2553_v43 }
 0xa01   : > { %v2550_v61 = vsel %vm641_vm0, %v4821_v23, 0.0 }
 0xa02   : > { %2551 = vadd.xlane.f32.xlu0 %v2550_v61 }
 0xa81   : > { %v2543_v8 = vpop.xlane.xlu1 %2542 }
 0xa82   : > { %v2557_v60 = vmul.f32 0.03125, %v2543_v8 }
 0xa83   : > { %v2540_v6 = vpop.xlane.xlu0 %2539 }
 0xa84   : > { %v4828_v14 = vsub.f32 %v4798_v4, %v2557_v60  ;;  %v2556_v11 = vmul.f32 0.03125, %v2540_v6  ;;  %v3332_v60 = vld [vmem:[%s5067_s13] ss:$0 sm:$0xff] }
 0xa85   : > { %v2549_v28 = vpop.xlane.xlu1 %2548 }
 0xa86   : > { %v4831_v3 = vsub.f32 %v4801_v53, %v2556_v11  ;;  %v2559_v33 = vmul.f32 0.03125, %v2549_v28  ;;  %v2569_v39 = vmul.f32 %v4828_v14, %v4828_v14 }
 0xa87   : > { %v2546_v0 = vpop.xlane.xlu0 %2545 }
 0xa88   : > { %v4836_v20 = vsub.f32 %v4806_v10, %v2559_v33  ;;  %v2558_v12 = vmul.f32 0.03125, %v2546_v0  ;;  %v2577_v59 = vsel %vm641_vm0, %v2569_v39, 0.0  ;;  %v2568_v15 = vmul.f32 %v4831_v3, %v4831_v3 }
 0xa89   : > { %2578 = vadd.xlane.f32.xlu1 %v2577_v59  ;;  %v2555_v63 = vpop.xlane.xlu1 %2554 }
 0xa8a   : > { %v4842_v46 = vsub.f32 %v4811_v35, %v2558_v12  ;;  %v2561_v21 = vmul.f32 0.03125, %v2555_v63  ;;  %v2574_v30 = vsel %vm641_vm0, %v2568_v15, 0.0  ;;  %v2571_v42 = vmul.f32 %v4836_v20, %v4836_v20 }
 0xa8b   : > { %2575 = vadd.xlane.f32.xlu0 %v2574_v30  ;;  %v2552_v40 = vpop.xlane.xlu0 %2551 }
 0xa8c   : > { %v4848_v16 = vsub.f32 %v4816_v5, %v2561_v21  ;;  %v2560_v34 = vmul.f32 0.03125, %v2552_v40  ;;  %v2583_v32 = vsel %vm641_vm0, %v2571_v42, 0.0  ;;  %v2570_v48 = vmul.f32 %v4842_v46, %v4842_v46 }
 0xa8d   : > { %2584 = vadd.xlane.f32.xlu1 %v2583_v32  ;;  %v2939_v32 = vld [vmem:[%s5070_s16 + $0x68] sm:$0xff] }
 0xa8e   : > { %v4854_v22 = vsub.f32 %v4821_v23, %v2560_v34  ;;  %v2580_v17 = vsel %vm641_vm0, %v2570_v48, 0.0  ;;  %v2573_v50 = vmul.f32 %v4848_v16, %v4848_v16  ;;  %v2940_v34 = vld [vmem:[%s5070_s16 + $0x70] sm:$0xff]  ;;  %v2938_v48 = vld [vmem:[%s5070_s16 + $0x60] sm:$0xff] }
 0xa8f   : > { %2581 = vadd.xlane.f32.xlu0 %v2580_v17  ;;  %v2936_v17 = vld [vmem:[%s5070_s16 + $0x50] sm:$0xff] }
 0xa90   : > { %v2589_v37 = vsel %vm641_vm0, %v2573_v50, 0.0  ;;  %v2572_v51 = vmul.f32 %v4854_v22, %v4854_v22  ;;  %v2935_v50 = vld [vmem:[%s5070_s16 + $0x48] sm:$0xff] }
 0xa91   : > { %2590 = vadd.xlane.f32.xlu1 %v2589_v37  ;;  %v2934_v37 = vld [vmem:[%s5070_s16 + $0x40] sm:$0xff] }
 0xa92   : > { %v2586_v55 = vsel %vm641_vm0, %v2572_v51, 0.0  ;;  %v2933_v51 = vld [vmem:[%s5070_s16 + $0x38] sm:$0xff] }
 0xa93   : > { %2587 = vadd.xlane.f32.xlu0 %v2586_v55  ;;  %v2932_v55 = vld [vmem:[%s5070_s16 + $0x30] sm:$0xff] }
 0xb12   : > { %v2579_v45 = vpop.xlane.xlu1 %2578 }
 0xb13   : > { %v2593_v56 = vmul.f32 0.03125, %v2579_v45  ;;  %v2927_v45 = vld [vmem:[%s5070_s16 + $0x8] sm:$0xff] }
 0xb14   : > { %v2576_v9 = vpop.xlane.xlu0 %2575 }
 0xb15   : > { %v2599_v52 = vadd.f32 1e-05, %v2593_v56  ;;  %v2592_v41 = vmul.f32 0.03125, %v2576_v9  ;;  %v2926_v56 = vld [vmem:[%s5070_s16] sm:$0xff] }
 0xb16   : > { %v2585_v49 = vpop.xlane.xlu1 %2584  ;;  %v3333_v9 = vld [vmem:[%s5069_s15] ss:$0 sm:$0xff] }
 0xb17   : > { %3924 = vrsqrt.f32 %v2599_v52  ;;  %v2598_v57 = vadd.f32 1e-05, %v2592_v41  ;;  %v2595_v7 = vmul.f32 0.03125, %v2585_v49 }
 0xb18   : > { %v2582_v38 = vpop.xlane.xlu0 %2581 }
 0xb19   : > { %3926 = vrsqrt.f32 %v2598_v57  ;;  %v2601_v36 = vadd.f32 1e-05, %v2595_v7  ;;  %v2594_v27 = vmul.f32 0.03125, %v2582_v38 }
 0xb1a   : > { %v2591_v54 = vpop.xlane.xlu1 %2590 }
 0xb1b   : > { %3928 = vrsqrt.f32 %v2601_v36  ;;  %v2600_v13 = vadd.f32 1e-05, %v2594_v27  ;;  %v2597_v18 = vmul.f32 0.03125, %v2591_v54 }
 0xb1c   : > { %v2588_v26 = vpop.xlane.xlu0 %2587 }
 0xb1d   : > { %3930 = vrsqrt.f32 %v2600_v13  ;;  %v2603_v44 = vadd.f32 1e-05, %v2597_v18  ;;  %v2596_v24 = vmul.f32 0.03125, %v2588_v26 }
 0xb1f   : > { %3932 = vrsqrt.f32 %v2603_v44  ;;  %v2602_v62 = vadd.f32 1e-05, %v2596_v24 }
 0xb21   : > { %3934 = vrsqrt.f32 %v2602_v62 }
 0xb24   : > { %v3925_v58 = vpop.eup %3924 }
 0xb25   : > { %v2611_v31 = vmul.f32 %v3925_v58, %v4828_v14 }
 0xb26   : > { %v3927_v1 = vpop.eup %3926 }
 0xb27   : > { %v2610_v43 = vmul.f32 %v3927_v1, %v4831_v3  ;;  %v2623_v8 = vmul.f32 %v3331_v2, %v2611_v31 }
 0xb28   : > { %v3929_v61 = vpop.eup %3928 }
 0xb29   : > { %v2622_v6 = vmul.f32 %v3331_v2, %v2610_v43  ;;  %v2613_v11 = vmul.f32 %v3929_v61, %v4836_v20  ;;  %v2635_v12 = vadd.f32 %v3332_v60, %v2623_v8 }
 0xb2a   : > { %v3931_v28 = vpop.eup %3930 }
 0xb2b   : > { %v2634_v33 = vadd.f32 %v3332_v60, %v2622_v6  ;;  %v2612_v39 = vmul.f32 %v3931_v28, %v4842_v46  ;;  %v2625_v59 = vmul.f32 %v3331_v2, %v2613_v11 }
 0xb2c   : > { %v3933_v0 = vpop.eup %3932 }
 0xb2d   : > { %3757 = vmatprep.mubr.msk.f32.mxu0 %vm641_vm0, %v2634_v33  ;;  %v2624_v14 = vmul.f32 %v3331_v2, %v2612_v39  ;;  %v2615_v3 = vmul.f32 %v3933_v0, %v4848_v16  ;;  %v2637_v30 = vadd.f32 %v3332_v60, %v2625_v59  ;;  %v2941_v16 = vld [vmem:[%s5070_s16 + $0x78] sm:$0xff] }
 0xb2e   : > { %v3935_v15 = vpop.eup %3934  ;;  %3758 = vmatmul.mubr.msk.f32.vlgmr.msra.gmra.mxu0 %vm641_vm0, %v2635_v12  ;;  %3766 = vmatprep.subr.mxu1 %v2941_v16 }
 0xb2f   : > { %v2636_v63 = vadd.f32 %v3332_v60, %v2624_v14  ;;  %v2614_v21 = vmul.f32 %v3935_v15, %v4854_v22  ;;  %v2627_v20 = vmul.f32 %v3331_v2, %v2615_v3  ;;  %3767 = vmatpush3.msra.mxu1 %v2941_v16  ;;  %v2937_v22 = vld [vmem:[%s5070_s16 + $0x58] sm:$0xff] }
 0xb30   : > { %3768 = vmatprep.subr.mxu1 %v2940_v34 }
 0xb31   : > { %3760 = vmatprep.mubr.msk.f32.mxu0 %vm641_vm0, %v2636_v63  ;;  %v2626_v42 = vmul.f32 %v3331_v2, %v2614_v21  ;;  %v2639_v40 = vadd.f32 %v3332_v60, %v2627_v20  ;;  %3769 = vmatpush3.msra.mxu1 %v2940_v34 }
 0xb32   : > { %3761 = vmatmul.mubr.msk.f32.gmra.mxu0 %vm641_vm0, %v2637_v30  ;;  %3770 = vmatprep.subr.mxu1 %v2939_v32 }
 0xb33   : > { %v2638_v46 = vadd.f32 %v3332_v60, %v2626_v42  ;;  %3771 = vmatpush3.msra.mxu1 %v2939_v32 }
 0xb34   : > { %3772 = vmatprep.subr.mxu1 %v2938_v48 }
 0xb35   : > { %3763 = vmatprep.mubr.msk.f32.mxu0 %vm641_vm0, %v2638_v46  ;;  %3773 = vmatpush3.msra.mxu1 %v2938_v48 }
 0xb36   : > { %3764 = vmatmul.mubr.msk.f32.gmra.mxu0 %vm641_vm0, %v2639_v40  ;;  %3774 = vmatprep.subr.mxu1 %v2937_v22 }
 0xb37   : > { %3775 = vmatpush3.msra.mxu1 %v2937_v22 }
 0xb38   : > { %3776 = vmatprep.subr.mxu1 %v2936_v17 }
 0xb39   : > { %3777 = vmatpush3.msra.mxu1 %v2936_v17 }
 0xb3a   : > { %3778 = vmatprep.subr.mxu1 %v2935_v50 }
 0xb3b   : > { %3779 = vmatpush3.msra.mxu1 %v2935_v50 }
 0xb3c   : > { %3780 = vmatprep.subr.mxu1 %v2934_v37 }
 0xb3d   : > { %3781 = vmatpush3.msra.mxu1 %v2934_v37 }
 0xb3e   : > { %3782 = vmatprep.subr.mxu1 %v2933_v51 }
 0xb3f   : > { %3783 = vmatpush3.msra.mxu1 %v2933_v51 }
 0xb40   : > { %3784 = vmatprep.subr.mxu1 %v2932_v55 }
 0xb41   : > { %3785 = vmatpush3.msra.mxu1 %v2932_v55 }
 0xb42   : > { %3786 = vmatprep.subr.mxu1 %v2931_v47 }
 0xb43   : > { %3787 = vmatpush3.msra.mxu1 %v2931_v47 }
 0xb44   : > { %3788 = vmatprep.subr.mxu1 %v2930_v25 }
 0xb45   : > { %3789 = vmatpush3.msra.mxu1 %v2930_v25 }
 0xb46   : > { %3790 = vmatprep.subr.mxu1 %v2929_v19 }
 0xb47   : > { %3791 = vmatpush3.msra.mxu1 %v2929_v19 }
 0xb48   : > { %3792 = vmatprep.subr.mxu1 %v2928_v29 }
 0xb49   : > { %3793 = vmatpush3.msra.mxu1 %v2928_v29 }
 0xb4a   : > { %3794 = vmatprep.subr.mxu1 %v2927_v45 }
 0xb4b   : > { %3795 = vmatpush3.msra.mxu1 %v2927_v45 }
 0xb4c   : > { %3796 = vmatprep.subr.mxu1 %v2926_v56 }
 0xb4d   : > { %3797 = vmatpush3.msra.mxu1 %v2926_v56 }
 0xbee   : > { %v3759_v52 = vpop.f32.mrf.mxu0 }
 0xbef   : > { %v4944_v41 = vadd.f32 %v3759_v52, %v3333_v9 }
 0xbf0   : > { %v2735_v49 = vpop.f32.mrf.mxu0 }
 0xbf1   : > { %v4947_v57 = vmul.f32 0.70710677, %v4944_v41  ;;  %v4949_v7 = vadd.f32 %v3333_v9, %v2735_v49 }
 0xbf2   : > { %v3762_v38 = vpop.f32.mrf.mxu0 }
 0xbf3   : > { %v2777_v36 = vand.u32 2147483647, %v4947_v57  ;;  %v4953_v27 = vmul.f32 0.70710677, %v4949_v7  ;;  %v4955_v54 = vadd.f32 %v3762_v38, %v3333_v9  ;;  %vm2897_vm12 = vcmp.ge.f32.partialorder %v4947_v57, 0.0 }
 0xbf4   : > { %v2745_v13 = vpop.f32.mrf.mxu0 }
 0xbf5   : > { %v2783_v18 = vmul.f32 0.3275911, %v2777_v36  ;;  %v2776_v26 = vand.u32 2147483647, %v4953_v27  ;;  %v4959_v44 = vmul.f32 0.70710677, %v4955_v54  ;;  %v4961_v24 = vadd.f32 %v3333_v9, %v2745_v13 }
 0xbf6   : > { %v3765_v62 = vpop.f32.mrf.mxu0  ;;  %v2861_v12 = vsub.f32 0.0, %v2777_v36  ;;  %vm2896_vm13 = vcmp.ge.f32.partialorder %v4953_v27, 0.0 }
 0xbf7   : > { %v2789_v58 = vadd.f32 1.0, %v2783_v18  ;;  %v2782_v2 = vmul.f32 0.3275911, %v2776_v26  ;;  %v2779_v31 = vand.u32 2147483647, %v4959_v44  ;;  %v4968_v6 = vadd.f32 %v3765_v62, %v3333_v9 }
 0xbf8   : > { %v4965_v1 = vmul.f32 0.70710677, %v4961_v24  ;;  %v2755_v43 = vpop.f32.mrf.mxu0  ;;  %v2860_v3 = vsub.f32 0.0, %v2776_v26  ;;  %v2867_v21 = vmul.f32 %v2861_v12, %v2777_v36  ;;  %vm2899_vm14 = vcmp.ge.f32.partialorder %v4959_v44, 0.0 }
 0xbf9   : > { %3936 = vrcp.f32 %v2789_v58  ;;  %v2788_v61 = vadd.f32 1.0, %v2782_v2  ;;  %v2785_v8 = vmul.f32 0.3275911, %v2779_v31  ;;  %v4970_v11 = vadd.f32 %v3333_v9, %v2755_v43 }
 0xbfa   : > { %v2778_v60 = vand.u32 2147483647, %v4965_v1  ;;  %v4973_v39 = vmul.f32 0.70710677, %v4968_v6  ;;  %v2863_v20 = vsub.f32 0.0, %v2779_v31  ;;  %v2866_v46 = vmul.f32 %v2860_v3, %v2776_v26 }
 0xbfb   : > { %3938 = vrcp.f32 %v2788_v61  ;;  %v2791_v28 = vadd.f32 1.0, %v2785_v8  ;;  %v4977_v14 = vmul.f32 0.70710677, %v4970_v11  ;;  %v2874_v48 = vmul.f32 1.442695, %v2867_v21 }
 0xbfc   : > { %v2784_v33 = vmul.f32 0.3275911, %v2778_v60  ;;  %v2781_v59 = vand.u32 2147483647, %v4973_v39  ;;  %v2862_v16 = vsub.f32 0.0, %v2778_v60  ;;  %v2869_v22 = vmul.f32 %v2863_v20, %v2779_v31 }
 0xbfd   : > { %3940 = vrcp.f32 %v2791_v28  ;;  %v2780_v63 = vand.u32 2147483647, %v4977_v14  ;;  %v2872_v37 = vmul.f32 1.442695, %v2866_v46  ;;  %vm2898_vm15 = vcmp.ge.f32.partialorder %v4965_v1, 0.0 }
 0xbfe   : > { %v2790_v0 = vadd.f32 1.0, %v2784_v33  ;;  %v2787_v15 = vmul.f32 0.3275911, %v2781_v59  ;;  %v2868_v51 = vmul.f32 %v2862_v16, %v2778_v60  ;;  %v2865_v19 = vsub.f32 0.0, %v2781_v59 }
 0xbff   : > { %v2786_v42 = vmul.f32 0.3275911, %v2780_v63  ;;  %v2878_v29 = vmul.f32 1.442695, %v2869_v22  ;;  %v2864_v38 = vsub.f32 0.0, %v2780_v63  ;;  %vm2901_vm1 = vcmp.ge.f32.partialorder %v4973_v39, 0.0 }
 0xc00   : > { %3942 = vrcp.f32 %v2790_v0  ;;  %v2793_v30 = vadd.f32 1.0, %v2787_v15  ;;  %v2876_v49 = vmul.f32 1.442695, %v2868_v51  ;;  %v2871_v26 = vmul.f32 %v2865_v19, %v2781_v59 }
 0xc01   : > { %v2792_v34 = vadd.f32 1.0, %v2786_v42  ;;  %v2870_v8 = vmul.f32 %v2864_v38, %v2780_v63  ;;  %vm2900_vm2 = vcmp.ge.f32.partialorder %v4977_v14, 0.0 }
 0xc02   : > { %3944 = vrcp.f32 %v2793_v30  ;;  %v2882_v0 = vmul.f32 1.442695, %v2871_v26 }
 0xc03   : > { %3946 = vrcp.f32 %v2792_v34  ;;  %v2880_v46 = vmul.f32 1.442695, %v2870_v8 }
 0xc04   : > { %3948 = vpow2.f32 %v2874_v48 }
 0xc05   : > { %3950 = vpow2.f32 %v2872_v37 }
 0xc06   : > { %v3937_v40 = vpop.eup %3936  ;;  %3952 = vpow2.f32 %v2878_v29 }
 0xc07   : > { %v2807_v32 = vmul.f32 1.0614054, %v3937_v40  ;;  %3954 = vpow2.f32 %v2876_v49 }
 0xc08   : > { %v3939_v17 = vpop.eup %3938  ;;  %3956 = vpow2.f32 %v2882_v0 }
 0xc09   : > { %v2813_v50 = vadd.f32 -1.4531521, %v2807_v32  ;;  %v2806_v55 = vmul.f32 1.0614054, %v3939_v17  ;;  %3958 = vpow2.f32 %v2880_v46 }
 0xc0a   : > { %v3941_v47 = vpop.eup %3940 }
 0xc0b   : > { %v2819_v25 = vmul.f32 %v3937_v40, %v2813_v50  ;;  %v2812_v45 = vadd.f32 -1.4531521, %v2806_v55  ;;  %v2809_v56 = vmul.f32 1.0614054, %v3941_v47 }
 0xc0d   : > { %v2825_v9 = vadd.f32 1.4214138, %v2819_v25  ;;  %v4980_v52 = vpop.eup %3942  ;;  %v2818_v36 = vmul.f32 %v3939_v17, %v2812_v45  ;;  %v2815_v13 = vadd.f32 -1.4531521, %v2809_v56 }
 0xc0e   : > { %v2808_v62 = vmul.f32 1.0614054, %v4980_v52 }
 0xc0f   : > { %v2831_v18 = vmul.f32 %v3937_v40, %v2825_v9  ;;  %v2824_v58 = vadd.f32 1.4214138, %v2818_v36  ;;  %v2821_v2 = vmul.f32 %v3941_v47, %v2815_v13  ;;  %v4983_v61 = vpop.eup %3944 }
 0xc10   : > { %v2814_v43 = vadd.f32 -1.4531521, %v2808_v62  ;;  %v2811_v3 = vmul.f32 1.0614054, %v4983_v61  ;;  %v4987_v21 = vpop.eup %3946 }
 0xc11   : > { %v2837_v31 = vadd.f32 -0.28449672, %v2831_v18  ;;  %v2830_v60 = vmul.f32 %v3939_v17, %v2824_v58  ;;  %v2827_v28 = vadd.f32 1.4214138, %v2821_v2  ;;  %v2810_v63 = vmul.f32 1.0614054, %v4987_v21  ;;  %v3949_v50 = vpop.eup %3948 }
 0xc12   : > { %v2820_v12 = vmul.f32 %v4980_v52, %v2814_v43  ;;  %v2817_v42 = vadd.f32 -1.4531521, %v2811_v3  ;;  %v3951_v45 = vpop.eup %3950 }
 0xc13   : > { %v2843_v33 = vmul.f32 %v3937_v40, %v2837_v31  ;;  %v2836_v59 = vadd.f32 -0.28449672, %v2830_v60  ;;  %v2833_v15 = vmul.f32 %v3941_v47, %v2827_v28  ;;  %v2816_v55 = vadd.f32 -1.4531521, %v2810_v63  ;;  %v3953_v62 = vpop.eup %3952 }
 0xc14   : > { %v2826_v20 = vadd.f32 1.4214138, %v2820_v12  ;;  %v2823_v22 = vmul.f32 %v4983_v61, %v2817_v42  ;;  %v3955_v60 = vpop.eup %3954 }
 0xc15   : > { %v2849_v30 = vadd.f32 0.2548296, %v2843_v33  ;;  %v2842_v16 = vmul.f32 %v3939_v17, %v2836_v59  ;;  %v2839_v34 = vadd.f32 -0.28449672, %v2833_v15  ;;  %v2822_v49 = vmul.f32 %v4987_v21, %v2816_v55  ;;  %v3957_v63 = vpop.eup %3956 }
 0xc16   : > { %v2832_v48 = vmul.f32 %v4980_v52, %v2826_v20  ;;  %v2829_v29 = vadd.f32 1.4214138, %v2823_v22  ;;  %v2764_v59 = vmul.f32 0.5, %v4949_v7  ;;  %v3959_v55 = vpop.eup %3958 }
 0xc17   : > { %v2855_v32 = vmul.f32 %v3937_v40, %v2849_v30  ;;  %v2848_v37 = vadd.f32 0.2548296, %v2842_v16  ;;  %v2845_v51 = vmul.f32 %v3941_v47, %v2839_v34  ;;  %v2828_v26 = vadd.f32 1.4214138, %v2822_v49 }
 0xc18   : > { %v2838_v19 = vadd.f32 -0.28449672, %v2832_v48  ;;  %v2835_v36 = vmul.f32 %v4983_v61, %v2829_v29 }
 0xc19   : > { %v2885_v25 = vmul.f32 %v3949_v50, %v2855_v32  ;;  %v2854_v56 = vmul.f32 %v3939_v17, %v2848_v37  ;;  %v2851_v9 = vadd.f32 0.2548296, %v2845_v51  ;;  %v2834_v17 = vmul.f32 %v4987_v21, %v2828_v26 }
 0xc1a   : > { %v2844_v40 = vmul.f32 %v4980_v52, %v2838_v19  ;;  %v2841_v31 = vadd.f32 -0.28449672, %v2835_v36  ;;  %v2765_v32 = vmul.f32 0.5, %v4944_v41 }
 0xc1b   : > { %v2891_v38 = vsub.f32 1.0, %v2885_v25  ;;  %v2884_v13 = vmul.f32 %v3951_v45, %v2854_v56  ;;  %v2857_v18 = vmul.f32 %v3941_v47, %v2851_v9  ;;  %v2840_v47 = vadd.f32 -0.28449672, %v2834_v17 }
 0xc1c   : > { %v2850_v2 = vadd.f32 0.2548296, %v2844_v40  ;;  %v2847_v0 = vmul.f32 %v4983_v61, %v2841_v31  ;;  %v2767_v45 = vmul.f32 0.5, %v4955_v54 }
 0xc1d   : > { %v2903_v58 = vsub.f32 0.0, %v2891_v38  ;;  %v2890_v43 = vsub.f32 1.0, %v2884_v13  ;;  %v2887_v8 = vmul.f32 %v3953_v62, %v2857_v18  ;;  %v2846_v46 = vmul.f32 %v4987_v21, %v2840_v47  ;;  %v3340_v62 = vld [vmem:[%s5071_s17] ss:$0 sm:$0xff] }
 0xc1e   : > { %v2856_v33 = vmul.f32 %v4980_v52, %v2850_v2  ;;  %v2853_v30 = vadd.f32 0.2548296, %v2847_v0  ;;  %v2769_v18 = vmul.f32 0.5, %v4968_v6 }
 0xc1f   : > { %v2909_v28 = vsel %vm2897_vm12, %v2891_v38, %v2903_v58  ;;  %v2902_v12 = vsub.f32 0.0, %v2890_v43  ;;  %v2893_v3 = vsub.f32 1.0, %v2887_v8  ;;  %v2852_v7 = vadd.f32 0.2548296, %v2846_v46 }
 0xc20   : > { %v2886_v15 = vmul.f32 %v3955_v60, %v2856_v33  ;;  %v2915_v57 = vadd.f32 1.0, %v2909_v28  ;;  %v2859_v34 = vmul.f32 %v4983_v61, %v2853_v30  ;;  %v2766_v61 = vmul.f32 0.5, %v4961_v24 }
 0xc21   : > { %v2908_v20 = vsel %vm2896_vm13, %v2890_v43, %v2902_v12  ;;  %v2905_v42 = vsub.f32 0.0, %v2893_v3  ;;  %v2858_v51 = vmul.f32 %v4987_v21, %v2852_v7  ;;  %v2768_v24 = vmul.f32 0.5, %v4970_v11 }
 0xc22   : > { %v2914_v16 = vadd.f32 1.0, %v2908_v20  ;;  %v2892_v52 = vsub.f32 1.0, %v2886_v15  ;;  %v2889_v50 = vmul.f32 %v3957_v63, %v2859_v34  ;;  %v2921_v37 = vmul.f32 %v2915_v57, %v2765_v32 }
 0xc23   : > { %v2911_v48 = vsel %vm2899_vm14, %v2893_v3, %v2905_v42  ;;  %v2888_v41 = vmul.f32 %v3959_v55, %v2858_v51 }
 0xc24   : > { %v2920_v22 = vmul.f32 %v2914_v16, %v2764_v59  ;;  %v2904_v27 = vsub.f32 0.0, %v2892_v52  ;;  %v2917_v25 = vadd.f32 1.0, %v2911_v48  ;;  %v2895_v19 = vsub.f32 1.0, %v2889_v50 }
 0xc25   : > { %v2894_v49 = vsub.f32 1.0, %v2888_v41 }
 0xc26   : > { %3798 = vmatprep.mubr.f32.mxu1 %v2920_v22  ;;  %v2910_v44 = vsel %vm2898_vm15, %v2892_v52, %v2904_v27  ;;  %v2907_v56 = vsub.f32 0.0, %v2895_v19  ;;  %v2923_v1 = vmul.f32 %v2917_v25, %v2767_v45 }
 0xc27   : > { %3799 = vmatmul.mubr.f32.vlgmr.msra.gmra.mxu1 %v2921_v37  ;;  %v2916_v29 = vadd.f32 1.0, %v2910_v44  ;;  %v2906_v21 = vsub.f32 0.0, %v2894_v49 }
 0xc28   : > { %v2913_v38 = vsel %vm2901_vm1, %v2895_v19, %v2907_v56 }
 0xc29   : > { %v2922_v9 = vmul.f32 %v2916_v29, %v2766_v61  ;;  %v2912_v40 = vsel %vm2900_vm2, %v2894_v49, %v2906_v21  ;;  %v2919_v36 = vadd.f32 1.0, %v2913_v38 }
 0xc2a   : > { %v2918_v13 = vadd.f32 1.0, %v2912_v40 }
 0xc2b   : > { %3801 = vmatprep.mubr.f32.mxu1 %v2922_v9  ;;  %v2925_v26 = vmul.f32 %v2919_v36, %v2769_v18 }
 0xc2c   : > { %3802 = vmatmul.mubr.f32.gmra.mxu1 %v2923_v1  ;;  %v2924_v54 = vmul.f32 %v2918_v13, %v2768_v24 }
 0xc2e   : > { %3804 = vmatprep.mubr.f32.mxu1 %v2924_v54 }
 0xc30   : > { %3805 = vmatmul.mubr.f32.gmra.mxu1 %v2925_v26 }
 0xce7   : > { %v3800_v39 = vpop.f32.mrf.mxu1 }
 0xce8   : > { %v3038_v58 = vadd.f32 %v3800_v39, %v4798_v4 }
 0xce9   : > { %v3008_v14 = vpop.f32.mrf.mxu1 }
 0xcea   : > { %v3037_v2 = vadd.f32 %v3008_v14, %v4801_v53  ;;  %v3051_v31 = vadd.f32 %v3340_v62, %v3038_v58 }
 0xcec   : > { %v3803_v43 = vpop.f32.mrf.mxu1  ;;  %v3061_v11 = vsel %vm641_vm0, %v3051_v31, 0.0  ;;  %v3050_v8 = vadd.f32 %v3340_v62, %v3037_v2 }
 0xced   : > { %v3040_v6 = vadd.f32 %v3803_v43, %v4806_v10  ;;  %3062 = vadd.xlane.f32.xlu1 %v3061_v11 }
 0xcee   : > { %v3018_v17 = vpop.f32.mrf.mxu1  ;;  %v3058_v60 = vsel %vm641_vm0, %v3050_v8, 0.0 }
 0xcef   : > { %v3039_v28 = vadd.f32 %v3018_v17, %v4811_v35  ;;  %3059 = vadd.xlane.f32.xlu0 %v3058_v60  ;;  %v3053_v33 = vadd.f32 %v3340_v62, %v3040_v6  ;;  %v3341_v17 = vld [vmem:[%s5072_s18] ss:$0 sm:$0xff] }
 0xcf0   : > { %v3806_v53 = vpop.f32.mrf.mxu1 }
 0xcf1   : > { %v3067_v4 = vsel %vm641_vm0, %v3053_v33, 0.0  ;;  %v3052_v0 = vadd.f32 %v3340_v62, %v3039_v28  ;;  %v3042_v3 = vadd.f32 %v3806_v53, %v4816_v5 }
 0xcf2   : > { %3068 = vadd.xlane.f32.xlu1 %v3067_v4  ;;  %v3028_v47 = vpop.f32.mrf.mxu1 }
 0xcf3   : > { %v3064_v12 = vsel %vm641_vm0, %v3052_v0, 0.0  ;;  %v3041_v10 = vadd.f32 %v3028_v47, %v4821_v23  ;;  %v3055_v59 = vadd.f32 %v3340_v62, %v3042_v3 }
 0xcf4   : > { %3065 = vadd.xlane.f32.xlu0 %v3064_v12 }
 0xcf5   : > { %v3073_v15 = vsel %vm641_vm0, %v3055_v59, 0.0  ;;  %v3054_v30 = vadd.f32 %v3340_v62, %v3041_v10 }
 0xcf6   : > { %3074 = vadd.xlane.f32.xlu1 %v3073_v15 }
 0xcf7   : > { %v3070_v35 = vsel %vm641_vm0, %v3054_v30, 0.0 }
 0xcf8   : > { %3071 = vadd.xlane.f32.xlu0 %v3070_v35 }
 0xd76   : > { %v3063_v57 = vpop.xlane.xlu1 %3062 }
 0xd77   : > { %v3077_v20 = vmul.f32 0.03125, %v3063_v57 }
 0xd78   : > { %v3060_v42 = vpop.xlane.xlu0 %3059 }
 0xd79   : > { %v3083_v46 = vsub.f32 %v3051_v31, %v3077_v20  ;;  %v3076_v16 = vmul.f32 0.03125, %v3060_v42 }
 0xd7b   : > { %v3082_v52 = vsub.f32 %v3050_v8, %v3076_v16  ;;  %v3069_v34 = vpop.xlane.xlu1 %3068  ;;  %v3089_v5 = vmul.f32 %v3083_v46, %v3083_v46 }
 0xd7c   : > { %v3079_v63 = vmul.f32 0.03125, %v3069_v34 }
 0xd7d   : > { %v3066_v32 = vpop.xlane.xlu0 %3065  ;;  %v3097_v23 = vsel %vm641_vm0, %v3089_v5, 0.0  ;;  %v3088_v48 = vmul.f32 %v3082_v52, %v3082_v52 }
 0xd7e   : > { %v3085_v7 = vsub.f32 %v3053_v33, %v3079_v63  ;;  %v3078_v22 = vmul.f32 0.03125, %v3066_v32  ;;  %3098 = vadd.xlane.f32.xlu1 %v3097_v23  ;;  %v3342_v33 = vld [vmem:[%s5073_s19] ss:$0 sm:$0xff] }
 0xd7f   : > { %v3094_v27 = vsel %vm641_vm0, %v3088_v48, 0.0  ;;  %v3075_v51 = vpop.xlane.xlu1 %3074 }
 0xd80   : > { %v3084_v50 = vsub.f32 %v3052_v0, %v3078_v22  ;;  %3095 = vadd.xlane.f32.xlu0 %v3094_v27  ;;  %v3091_v37 = vmul.f32 %v3085_v7, %v3085_v7  ;;  %v3081_v25 = vmul.f32 0.03125, %v3075_v51 }
 0xd81   : > { %v3072_v19 = vpop.xlane.xlu0 %3071 }
 0xd82   : > { %v3103_v55 = vsel %vm641_vm0, %v3091_v37, 0.0  ;;  %v3090_v44 = vmul.f32 %v3084_v50, %v3084_v50  ;;  %v3087_v29 = vsub.f32 %v3055_v59, %v3081_v25  ;;  %v3080_v41 = vmul.f32 0.03125, %v3072_v19 }
 0xd83   : > { %3104 = vadd.xlane.f32.xlu1 %v3103_v55 }
 0xd84   : > { %v3100_v61 = vsel %vm641_vm0, %v3090_v44, 0.0  ;;  %v3086_v45 = vsub.f32 %v3054_v30, %v3080_v41  ;;  %v3093_v56 = vmul.f32 %v3087_v29, %v3087_v29 }
 0xd85   : > { %3101 = vadd.xlane.f32.xlu0 %v3100_v61 }
 0xd86   : > { %v3109_v9 = vsel %vm641_vm0, %v3093_v56, 0.0  ;;  %v3092_v49 = vmul.f32 %v3086_v45, %v3086_v45 }
 0xd87   : > { %3110 = vadd.xlane.f32.xlu1 %v3109_v9 }
 0xd88   : > { %v3106_v1 = vsel %vm641_vm0, %v3092_v49, 0.0 }
 0xd89   : > { %3107 = vadd.xlane.f32.xlu0 %v3106_v1 }
 0xe07   : > { %v3099_v38 = vpop.xlane.xlu1 %3098 }
 0xe08   : > { %v3113_v21 = vmul.f32 0.03125, %v3099_v38 }
 0xe09   : > { %v3096_v40 = vpop.xlane.xlu0 %3095 }
 0xe0a   : > { %v3119_v36 = vadd.f32 1e-05, %v3113_v21  ;;  %v3112_v24 = vmul.f32 0.03125, %v3096_v40 }
 0xe0c   : > { %3960 = vrsqrt.f32 %v3119_v36  ;;  %v3118_v13 = vadd.f32 1e-05, %v3112_v24  ;;  %v3105_v18 = vpop.xlane.xlu1 %3104 }
 0xe0d   : > { %v3115_v54 = vmul.f32 0.03125, %v3105_v18 }
 0xe0e   : > { %3962 = vrsqrt.f32 %v3118_v13  ;;  %v3102_v26 = vpop.xlane.xlu0 %3101 }
 0xe0f   : > { %v3121_v39 = vadd.f32 1e-05, %v3115_v54  ;;  %v3114_v62 = vmul.f32 0.03125, %v3102_v26 }
 0xe10   : > { %v3111_v14 = vpop.xlane.xlu1 %3110 }
 0xe11   : > { %3964 = vrsqrt.f32 %v3121_v39  ;;  %v3120_v58 = vadd.f32 1e-05, %v3114_v62  ;;  %v3117_v2 = vmul.f32 0.03125, %v3111_v14 }
 0xe12   : > { %v3108_v31 = vpop.xlane.xlu0 %3107 }
 0xe13   : > { %3966 = vrsqrt.f32 %v3120_v58  ;;  %v3123_v43 = vadd.f32 1e-05, %v3117_v2  ;;  %v3116_v11 = vmul.f32 0.03125, %v3108_v31 }
 0xe15   : > { %3968 = vrsqrt.f32 %v3123_v43  ;;  %v3122_v8 = vadd.f32 1e-05, %v3116_v11 }
 0xe17   : > { %3970 = vrsqrt.f32 %v3122_v8 }
 0xe19   : > { %v3961_v6 = vpop.eup %3960 }
 0xe1a   : > { %v3131_v60 = vmul.f32 %v3961_v6, %v3083_v46 }
 0xe1b   : > { %v3963_v28 = vpop.eup %3962 }
 0xe1c   : > { %v3143_v4 = vmul.f32 %v3341_v17, %v3131_v60  ;;  %v3130_v0 = vmul.f32 %v3963_v28, %v3082_v52 }
 0xe1e   : > { %v3965_v53 = vpop.eup %3964  ;;  %v3155_v12 = vadd.f32 %v3342_v33, %v3143_v4  ;;  %v3142_v3 = vmul.f32 %v3341_v17, %v3130_v0 }
 0xe1f   : > { %v3133_v47 = vmul.f32 %v3965_v53, %v3085_v7 }
 0xe20   : > { %v3967_v10 = vpop.eup %3966  ;;  %3161 = vst.msk [vmem:[%s631_s0 + $0x8] sm:$0xff] %vm641_vm0, %v3155_v12  ;;  %v3154_v59 = vadd.f32 %v3342_v33, %v3142_v3 }
 0xe21   : > { %v3145_v15 = vmul.f32 %v3341_v17, %v3133_v47  ;;  %v3132_v30 = vmul.f32 %v3967_v10, %v3084_v50 }
 0xe22   : > { %3160 = vst.msk [vmem:[%s631_s0] sm:$0xff] %vm641_vm0, %v3154_v59  ;;  %v3969_v20 = vpop.eup %3968 }
 0xe23   : > { %v3157_v35 = vadd.f32 %v3342_v33, %v3145_v15  ;;  %v3144_v57 = vmul.f32 %v3341_v17, %v3132_v30  ;;  %v3135_v46 = vmul.f32 %v3969_v20, %v3087_v29 }
 0xe24   : > { %v3971_v16 = vpop.eup %3970 }
 0xe25   : > { %3163 = vst.msk [vmem:[%s631_s0 + $0x18] sm:$0xff] %vm641_vm0, %v3157_v35  ;;  %v3156_v42 = vadd.f32 %v3342_v33, %v3144_v57  ;;  %v3147_v52 = vmul.f32 %v3341_v17, %v3135_v46  ;;  %v3134_v34 = vmul.f32 %v3971_v16, %v3086_v45 }
 0xe27   : > { %3162 = vst.msk [vmem:[%s631_s0 + $0x10] sm:$0xff] %vm641_vm0, %v3156_v42  ;;  %v3159_v5 = vadd.f32 %v3342_v33, %v3147_v52  ;;  %v3146_v63 = vmul.f32 %v3341_v17, %v3134_v34 }
 0xe29   : > { %3165 = vst.msk [vmem:[%s631_s0 + $0x28] sm:$0xff] %vm641_vm0, %v3159_v5  ;;  %v3158_v32 = vadd.f32 %v3342_v33, %v3146_v63 }
 0xe2b   : > { %3164 = vst.msk [vmem:[%s631_s0 + $0x20] sm:$0xff] %vm641_vm0, %v3158_v32 }
 0xe2c PF: > { %s30_s1 = sadd.s32 1, %s3984_s1  }
 0xe2d   : > { %p27_p4 = scmp.ge.s32.totalorder %s30_s1, 4  }
 0xe2f   :  { %29 = sbr.rel (!%p27_p4) target bundleno = 6 (0x6), region = 130 }

// kernel: vivit_forward.17
= control target key start
LH: loop header
LB: loop body
LE: loop exit
PB: predicated region body
PF: predicated region fallthrough
CT: control target
= control target key end

     0   :  { %vm29_vm0 = vcmask 261120   ;;  %vm127_vm1 = vcmask 97280   ;;  %s230_s1 = inlined_call_operand.vmem [shape: f32[32,12], index: 1, kind: input, shape index: {}]   ;;  %s231_s0 = inlined_call_operand.vmem [shape: f32[32,32], index: 0, kind: input, shape index: {}]   ;;  %s232_s2 = inlined_call_operand.vmem [shape: f32[1,12], index: 2, kind: input, shape index: {}]   ;;  %s233_s3 = inlined_call_operand.vmem [shape: f32[32,12], index: 3, kind: output, shape index: {}]  }
   0x1   :  { %v21_v0 = vld [vmem:[%s230_s1 + $0x18] sm:$0xff]  ;;  %v20_v1 = vld [vmem:[%s230_s1 + $0x10] sm:$0xff]  ;;  %v19_v2 = vld [vmem:[%s230_s1 + $0x8] sm:$0xff] }
   0x2   :  { %149 = vmatprep.subr.mxu0 %v21_v0  ;;  %163 = vmatprep.subr.mxu1 %v21_v0  ;;  %v18_v3 = vld [vmem:[%s230_s1] sm:$0xff]  ;;  %v16_v5 = vld [vmem:[%s231_s0 + $0x10] sm:$0xff]  ;;  %v15_v6 = vld [vmem:[%s231_s0 + $0x8] sm:$0xff] }
   0x3   :  { %150 = vmatpush3.msra.mxu0 %v21_v0  ;;  %167 = vmatpush3.msra.mxu1 %v21_v0  ;;  %v14_v4 = vld [vmem:[%s231_s0] sm:$0xff]  ;;  %v17_v7 = vld [vmem:[%s231_s0 + $0x18] sm:$0xff] }
   0x4   :  { %151 = vmatprep.subr.mxu0 %v20_v1  ;;  %164 = vmatprep.subr.mxu1 %v20_v1  ;;  %v136_v8 = vld [vmem:[%s232_s2] ss:$0 sm:$0xff] }
   0x5   :  { %152 = vmatpush3.msra.mxu0 %v20_v1  ;;  %168 = vmatpush3.msra.mxu1 %v20_v1 }
   0x6   :  { %153 = vmatprep.subr.mxu0 %v19_v2  ;;  %165 = vmatprep.subr.mxu1 %v19_v2 }
   0x7   :  { %154 = vmatpush3.msra.mxu0 %v19_v2  ;;  %169 = vmatpush3.msra.mxu1 %v19_v2 }
   0x8   :  { %155 = vmatprep.subr.mxu0 %v18_v3  ;;  %166 = vmatprep.subr.mxu1 %v18_v3 }
   0x9   :  { %156 = vmatpush3.msra.mxu0 %v18_v3  ;;  %170 = vmatpush3.msra.mxu1 %v18_v3 }
   0xa   :  { %157 = vmatprep.mubr.msk.f32.mxu0 %vm29_vm0, %v14_v4  ;;  %160 = vmatprep.mubr.msk.f32.mxu1 %vm29_vm0, %v16_v5 }
   0xb   :  { %158 = vmatmul.mubr.msk.f32.vlgmr.msra.gmra.mxu0 %vm29_vm0, %v15_v6  ;;  %161 = vmatmul.mubr.msk.f32.vlgmr.msra.gmra.mxu1 %vm29_vm0, %v17_v7 }
  0xcb   :  { %v159_v9 = vpop.f32.mrf.mxu0  ;;  %v162_v10 = vpop.f32.mrf.mxu1 }
  0xcc   :  { %v114_v11 = vadd.f32 %v159_v9, %v136_v8  ;;  %v124_v12 = vadd.f32 %v162_v10, %v136_v8 }
  0xcd   :  { %v108_v13 = vpop.f32.mrf.mxu0  ;;  %v118_v14 = vpop.f32.mrf.mxu1 }
  0xce   :  { %129 = vst.msk [vmem:[%s233_s3 + $0x8] sm:$0xff] %vm127_vm1, %v114_v11  ;;  %131 = vst.msk [vmem:[%s233_s3 + $0x18] sm:$0xff] %vm127_vm1, %v124_v12  ;;  %v109_v15 = vadd.f32 %v136_v8, %v108_v13  ;;  %v119_v16 = vadd.f32 %v136_v8, %v118_v14 }
  0xd0   :  { %128 = vst.msk [vmem:[%s233_s3] sm:$0xff] %vm127_vm1, %v109_v15  ;;  %130 = vst.msk [vmem:[%s233_s3 + $0x10] sm:$0xff] %vm127_vm1, %v119_v16 }

</bundles_post_ra>
